<compile_context>
chip_gen: v5e
topology: v5e:2x2
jax: 0.10.0
libtpu: 0.0.40
codegen_flags: <defaults>
</compile_context>

<pallas_src>
import functools
import numpy as np
import jax
import jax.numpy as jnp
from jax.experimental import pallas as pl
from jax.experimental.pallas import tpu as pltpu

QS = (0.0, 0.01, 0.1, 0.25, 0.5, 0.75, 0.9, 0.99, 1.0)
T_ROWS = 16  # thresholds padded to a sublane-friendly 16 rows (9 used)


def _quantile_kernel(x_row_ref, x_keys_ref, thr_lo_ref, thr_hi_ref, frac_ref, o_ref,
                     *, batch, n_chunks):
    # x_row_ref : (1, B, n_pad)    queries, lane-dense
    # x_keys_ref: (1, B*128, R)    per-sample key slab, keys down the sublane axis
    # thr_*_ref : (T_ROWS, 1)      k_lo / k_hi order-statistic thresholds (padded)
    # frac_ref  : (T_ROWS, 1)      interpolation weights (padded with 0)
    # o_ref     : (1, T_ROWS, B)   per-sample quantile columns
    neg_inf = jnp.float32(-jnp.inf)
    thr_lo = thr_lo_ref[...]                       # (16, 1)
    thr_hi = thr_hi_ref[...]                       # (16, 1)
    frac = frac_ref[...]                           # (16, 1)
    # MXU LHS (all-ones), hoisted out of the loops; scalar-broadcast -> no array const.
    ones8 = jnp.ones((8, 128), jnp.bfloat16)

    cols = []
    for b in range(batch):
        q_row = x_row_ref[0, b:b + 1, :]           # (1, n_pad) queries on lanes
        n_pad = q_row.shape[1]

        # rank_less accumulated on the MXU: ones(8,128) @ cmp(128,n) -> (8,n) f32
        # (8 identical rows; keeps all matmul dims 8/128-aligned). Counts are exact
        # in f32 for n < 2^24.
        rank8 = jnp.zeros((8, n_pad), jnp.float32)
        for c in range(n_chunks):
            key_col = x_keys_ref[0, b * 128:(b + 1) * 128, c:c + 1]   # (128, 1)
            cmp = (key_col < q_row).astype(jnp.bfloat16)              # (128, n_pad) 0/1
            rank8 = rank8 + jnp.dot(ones8, cmp,
                                    preferred_element_type=jnp.float32)
        rank = rank8[0:1, :]                                          # (1, n_pad)

        # Order-statistic selection: thresholds on sublanes -> dense (16, n) pass.
        v_lo = jnp.max(jnp.where(rank <= thr_lo, q_row, neg_inf),
                       axis=1, keepdims=True)                          # (16, 1)
        v_hi = jnp.max(jnp.where(rank <= thr_hi, q_row, neg_inf),
                       axis=1, keepdims=True)                          # (16, 1)
        cols.append(v_lo + frac * (v_hi - v_lo))                       # (16, 1)

    out_block = cols[0] if batch == 1 else jnp.concatenate(cols, axis=1)  # (16, B)
    o_ref[0, :, :] = out_block


def naive_model_forward(x, *, max_samples_per_step=8):
    """x: (N, C, H, W) -> (N, 9) float32 per-sample quantiles."""
    N = x.shape[0]
    n_real = int(np.prod(x.shape[1:]))
    x_flat = x.reshape(N, n_real).astype(jnp.float32)

    # Pad each sample to a multiple of 128 with +inf: pads never count as "smaller"
    # keys and can never be selected (their rank_less = n_real > every threshold).
    n_pad = ((n_real + 127) // 128) * 128
    if n_pad != n_real:
        pad = jnp.full((N, n_pad - n_real), jnp.inf, jnp.float32)
        x_flat = jnp.concatenate([x_flat, pad], axis=1)
    R = n_pad // 128

    # Samples per grid step: divide N, keep grid length >= 2 so both v7x cores get work.
    B = 1
    for cand in range(min(max_samples_per_step, N), 1, -1):
        if N % cand == 0 and N // cand >= 2:
            B = cand
            break
    num_steps = N // B

    # Two contiguous, lane-dense views of the same data (layout plumbing in XLA):
    #   query rows (num_steps, B, n_pad) and key slabs (num_steps, B*128, R)
    #   with keys running down the sublane axis.
    x_row = x_flat.reshape(num_steps, B, n_pad)
    x_keys = jnp.transpose(x_flat.reshape(N, R, 128), (0, 2, 1)).reshape(
        num_steps, B * 128, R)

    # Interpolation bookkeeping (numpy's default "linear" method), passed as inputs.
    pos = np.asarray(QS, np.float64) * (n_real - 1)
    k_lo = np.floor(pos)
    k_hi = np.minimum(k_lo + 1.0, n_real - 1)
    frac = pos - k_lo
    thr_lo = np.full((T_ROWS, 1), float(n_real - 1), np.float32)
    thr_hi = np.full((T_ROWS, 1), float(n_real - 1), np.float32)
    frac_c = np.zeros((T_ROWS, 1), np.float32)
    thr_lo[:len(QS), 0] = k_lo
    thr_hi[:len(QS), 0] = k_hi
    frac_c[:len(QS), 0] = frac

    kernel = functools.partial(_quantile_kernel, batch=B, n_chunks=R)

    out = pl.pallas_call(
        kernel,
        out_shape=jax.ShapeDtypeStruct((num_steps, T_ROWS, B), jnp.float32),
        grid=(num_steps,),
        in_specs=[
            pl.BlockSpec((1, B, n_pad), lambda g: (g, 0, 0)),
            pl.BlockSpec((1, B * 128, R), lambda g: (g, 0, 0)),
            pl.BlockSpec((T_ROWS, 1), lambda g: (0, 0)),
            pl.BlockSpec((T_ROWS, 1), lambda g: (0, 0)),
            pl.BlockSpec((T_ROWS, 1), lambda g: (0, 0)),
        ],
        out_specs=pl.BlockSpec((1, T_ROWS, B), lambda g: (g, 0, 0)),
        compiler_params=pltpu.CompilerParams(
            dimension_semantics=("parallel",),
            vmem_limit_bytes=32 * 1024 * 1024,  # fits v7x's 64 MiB physical VMEM
        ),
    )(x_row, x_keys, jnp.asarray(thr_lo), jnp.asarray(thr_hi), jnp.asarray(frac_c))

    # (num_steps, 16, B) -> (N, 16) -> (N, 9)  (free wrapper-side layout plumbing)
    out = jnp.transpose(out, (0, 2, 1)).reshape(N, T_ROWS)
    return out[:, :len(QS)]


if __name__ == "__main__":
    key = jax.random.PRNGKey(0)
    # small NCHW batch consistent with the module's expected input
    x = jax.random.normal(key, (2, 4, 16, 16), dtype=jnp.float32)

    result = jax.block_until_ready(naive_model_forward(x))

    # reference: what the PyTorch module computes with numpy.quantile
    x_np = np.asarray(x)
    expected = np.quantile(x_np, q=list(QS), axis=(1, 2, 3)).T.astype(np.float32)

    assert result.shape == (2, len(QS)), result.shape
    np.testing.assert_allclose(np.asarray(result), expected, rtol=1e-4, atol=1e-5)

    print("KERNEL_OK")
</pallas_src>

<mosaic_0001>
module attributes {stable_mosaic.version = 11 : i64} {
  func.func @_quantile_kernel(%arg0: i32, %arg1: memref<1x1x1024xf32, #tpu.memory_space<vmem>>, %arg2: memref<1x128x8xf32, #tpu.memory_space<vmem>>, %arg3: memref<16x1xf32, #tpu.memory_space<vmem>>, %arg4: memref<16x1xf32, #tpu.memory_space<vmem>>, %arg5: memref<16x1xf32, #tpu.memory_space<vmem>>, %arg6: memref<1x16x1xf32, #tpu.memory_space<vmem>>) attributes {dimension_semantics = [#tpu.dimension_semantics<parallel>], iteration_bounds = array<i64: 2>, scalar_prefetch = 0 : i64, scratch_operands = 0 : i64, tpu.core_type = #tpu.core_type<tc>, window_params = [{transform_indices = @transform_0, window_bounds = array<i64: 1, 1, 1024>}, {transform_indices = @transform_1, window_bounds = array<i64: 1, 128, 8>}, {pipeline_mode = #tpu.pipeline_mode<synchronous>, transform_indices = @transform_2, window_bounds = array<i64: 16, 1>}, {pipeline_mode = #tpu.pipeline_mode<synchronous>, transform_indices = @transform_3, window_bounds = array<i64: 16, 1>}, {pipeline_mode = #tpu.pipeline_mode<synchronous>, transform_indices = @transform_4, window_bounds = array<i64: 16, 1>}, {transform_indices = @transform_5, window_bounds = array<i64: 1, 16, 1>}]} {
    %c0 = arith.constant 0 : index
    %c0_0 = arith.constant 0 : index
    %0 = vector.load %arg3[%c0, %c0_0] : memref<16x1xf32, #tpu.memory_space<vmem>>, vector<16x1xf32>
    %c0_1 = arith.constant 0 : index
    %c0_2 = arith.constant 0 : index
    %1 = vector.load %arg4[%c0_1, %c0_2] : memref<16x1xf32, #tpu.memory_space<vmem>>, vector<16x1xf32>
    %c0_3 = arith.constant 0 : index
    %c0_4 = arith.constant 0 : index
    %2 = vector.load %arg5[%c0_3, %c0_4] : memref<16x1xf32, #tpu.memory_space<vmem>>, vector<16x1xf32>
    %cst = arith.constant 1.000000e+00 : bf16
    %3 = vector.broadcast %cst : bf16 to vector<8x128xbf16>
    %c0_5 = arith.constant 0 : index
    %c0_6 = arith.constant 0 : index
    %c0_7 = arith.constant 0 : index
    %4 = vector.load %arg1[%c0_5, %c0_6, %c0_7] : memref<1x1x1024xf32, #tpu.memory_space<vmem>>, vector<1x1x1024xf32>
    %5 = vector.shape_cast %4 : vector<1x1x1024xf32> to vector<1x1024xf32>
    %cst_8 = arith.constant 0.000000e+00 : f32
    %6 = vector.broadcast %cst_8 : f32 to vector<8x1024xf32>
    %c0_9 = arith.constant 0 : index
    %c0_10 = arith.constant 0 : index
    %c0_11 = arith.constant 0 : index
    %7 = vector.load %arg2[%c0_9, %c0_10, %c0_11] : memref<1x128x8xf32, #tpu.memory_space<vmem>>, vector<1x128x1xf32>
    %8 = vector.shape_cast %7 : vector<1x128x1xf32> to vector<128x1xf32>
    %9 = vector.broadcast %8 : vector<128x1xf32> to vector<128x1024xf32>
    %10 = vector.broadcast %5 : vector<1x1024xf32> to vector<128x1024xf32>
    %11 = arith.cmpf olt, %9, %10 : vector<128x1024xf32>
    %12 = arith.extui %11 : vector<128x1024xi1> to vector<128x1024xi32>
    %13 = arith.sitofp %12 : vector<128x1024xi32> to vector<128x1024xf32>
    %14 = arith.truncf %13 : vector<128x1024xf32> to vector<128x1024xbf16>
    %cst_12 = arith.constant dense<0.000000e+00> : vector<8x1024xf32>
    %15 = tpu.matmul %3, %14, %cst_12 {dimension_numbers = #tpu.dot_dimension_numbers<[1], [0], [0], [1], [0, 0, 1, 1], [], []>} : vector<8x128xbf16>, vector<128x1024xbf16>, vector<8x1024xf32> -> vector<8x1024xf32>
    %16 = arith.addf %6, %15 : vector<8x1024xf32>
    %c0_13 = arith.constant 0 : index
    %c0_14 = arith.constant 0 : index
    %c1 = arith.constant 1 : index
    %17 = vector.load %arg2[%c0_13, %c0_14, %c1] : memref<1x128x8xf32, #tpu.memory_space<vmem>>, vector<1x128x1xf32>
    %18 = vector.shape_cast %17 : vector<1x128x1xf32> to vector<128x1xf32>
    %19 = vector.broadcast %18 : vector<128x1xf32> to vector<128x1024xf32>
    %20 = vector.broadcast %5 : vector<1x1024xf32> to vector<128x1024xf32>
    %21 = arith.cmpf olt, %19, %20 : vector<128x1024xf32>
    %22 = arith.extui %21 : vector<128x1024xi1> to vector<128x1024xi32>
    %23 = arith.sitofp %22 : vector<128x1024xi32> to vector<128x1024xf32>
    %24 = arith.truncf %23 : vector<128x1024xf32> to vector<128x1024xbf16>
    %cst_15 = arith.constant dense<0.000000e+00> : vector<8x1024xf32>
    %25 = tpu.matmul %3, %24, %cst_15 {dimension_numbers = #tpu.dot_dimension_numbers<[1], [0], [0], [1], [0, 0, 1, 1], [], []>} : vector<8x128xbf16>, vector<128x1024xbf16>, vector<8x1024xf32> -> vector<8x1024xf32>
    %26 = arith.addf %16, %25 : vector<8x1024xf32>
    %c0_16 = arith.constant 0 : index
    %c0_17 = arith.constant 0 : index
    %c2 = arith.constant 2 : index
    %27 = vector.load %arg2[%c0_16, %c0_17, %c2] : memref<1x128x8xf32, #tpu.memory_space<vmem>>, vector<1x128x1xf32>
    %28 = vector.shape_cast %27 : vector<1x128x1xf32> to vector<128x1xf32>
    %29 = vector.broadcast %28 : vector<128x1xf32> to vector<128x1024xf32>
    %30 = vector.broadcast %5 : vector<1x1024xf32> to vector<128x1024xf32>
    %31 = arith.cmpf olt, %29, %30 : vector<128x1024xf32>
    %32 = arith.extui %31 : vector<128x1024xi1> to vector<128x1024xi32>
    %33 = arith.sitofp %32 : vector<128x1024xi32> to vector<128x1024xf32>
    %34 = arith.truncf %33 : vector<128x1024xf32> to vector<128x1024xbf16>
    %cst_18 = arith.constant dense<0.000000e+00> : vector<8x1024xf32>
    %35 = tpu.matmul %3, %34, %cst_18 {dimension_numbers = #tpu.dot_dimension_numbers<[1], [0], [0], [1], [0, 0, 1, 1], [], []>} : vector<8x128xbf16>, vector<128x1024xbf16>, vector<8x1024xf32> -> vector<8x1024xf32>
    %36 = arith.addf %26, %35 : vector<8x1024xf32>
    %c0_19 = arith.constant 0 : index
    %c0_20 = arith.constant 0 : index
    %c3 = arith.constant 3 : index
    %37 = vector.load %arg2[%c0_19, %c0_20, %c3] : memref<1x128x8xf32, #tpu.memory_space<vmem>>, vector<1x128x1xf32>
    %38 = vector.shape_cast %37 : vector<1x128x1xf32> to vector<128x1xf32>
    %39 = vector.broadcast %38 : vector<128x1xf32> to vector<128x1024xf32>
    %40 = vector.broadcast %5 : vector<1x1024xf32> to vector<128x1024xf32>
    %41 = arith.cmpf olt, %39, %40 : vector<128x1024xf32>
    %42 = arith.extui %41 : vector<128x1024xi1> to vector<128x1024xi32>
    %43 = arith.sitofp %42 : vector<128x1024xi32> to vector<128x1024xf32>
    %44 = arith.truncf %43 : vector<128x1024xf32> to vector<128x1024xbf16>
    %cst_21 = arith.constant dense<0.000000e+00> : vector<8x1024xf32>
    %45 = tpu.matmul %3, %44, %cst_21 {dimension_numbers = #tpu.dot_dimension_numbers<[1], [0], [0], [1], [0, 0, 1, 1], [], []>} : vector<8x128xbf16>, vector<128x1024xbf16>, vector<8x1024xf32> -> vector<8x1024xf32>
    %46 = arith.addf %36, %45 : vector<8x1024xf32>
    %c0_22 = arith.constant 0 : index
    %c0_23 = arith.constant 0 : index
    %c4 = arith.constant 4 : index
    %47 = vector.load %arg2[%c0_22, %c0_23, %c4] : memref<1x128x8xf32, #tpu.memory_space<vmem>>, vector<1x128x1xf32>
    %48 = vector.shape_cast %47 : vector<1x128x1xf32> to vector<128x1xf32>
    %49 = vector.broadcast %48 : vector<128x1xf32> to vector<128x1024xf32>
    %50 = vector.broadcast %5 : vector<1x1024xf32> to vector<128x1024xf32>
    %51 = arith.cmpf olt, %49, %50 : vector<128x1024xf32>
    %52 = arith.extui %51 : vector<128x1024xi1> to vector<128x1024xi32>
    %53 = arith.sitofp %52 : vector<128x1024xi32> to vector<128x1024xf32>
    %54 = arith.truncf %53 : vector<128x1024xf32> to vector<128x1024xbf16>
    %cst_24 = arith.constant dense<0.000000e+00> : vector<8x1024xf32>
    %55 = tpu.matmul %3, %54, %cst_24 {dimension_numbers = #tpu.dot_dimension_numbers<[1], [0], [0], [1], [0, 0, 1, 1], [], []>} : vector<8x128xbf16>, vector<128x1024xbf16>, vector<8x1024xf32> -> vector<8x1024xf32>
    %56 = arith.addf %46, %55 : vector<8x1024xf32>
    %c0_25 = arith.constant 0 : index
    %c0_26 = arith.constant 0 : index
    %c5 = arith.constant 5 : index
    %57 = vector.load %arg2[%c0_25, %c0_26, %c5] : memref<1x128x8xf32, #tpu.memory_space<vmem>>, vector<1x128x1xf32>
    %58 = vector.shape_cast %57 : vector<1x128x1xf32> to vector<128x1xf32>
    %59 = vector.broadcast %58 : vector<128x1xf32> to vector<128x1024xf32>
    %60 = vector.broadcast %5 : vector<1x1024xf32> to vector<128x1024xf32>
    %61 = arith.cmpf olt, %59, %60 : vector<128x1024xf32>
    %62 = arith.extui %61 : vector<128x1024xi1> to vector<128x1024xi32>
    %63 = arith.sitofp %62 : vector<128x1024xi32> to vector<128x1024xf32>
    %64 = arith.truncf %63 : vector<128x1024xf32> to vector<128x1024xbf16>
    %cst_27 = arith.constant dense<0.000000e+00> : vector<8x1024xf32>
    %65 = tpu.matmul %3, %64, %cst_27 {dimension_numbers = #tpu.dot_dimension_numbers<[1], [0], [0], [1], [0, 0, 1, 1], [], []>} : vector<8x128xbf16>, vector<128x1024xbf16>, vector<8x1024xf32> -> vector<8x1024xf32>
    %66 = arith.addf %56, %65 : vector<8x1024xf32>
    %c0_28 = arith.constant 0 : index
    %c0_29 = arith.constant 0 : index
    %c6 = arith.constant 6 : index
    %67 = vector.load %arg2[%c0_28, %c0_29, %c6] : memref<1x128x8xf32, #tpu.memory_space<vmem>>, vector<1x128x1xf32>
    %68 = vector.shape_cast %67 : vector<1x128x1xf32> to vector<128x1xf32>
    %69 = vector.broadcast %68 : vector<128x1xf32> to vector<128x1024xf32>
    %70 = vector.broadcast %5 : vector<1x1024xf32> to vector<128x1024xf32>
    %71 = arith.cmpf olt, %69, %70 : vector<128x1024xf32>
    %72 = arith.extui %71 : vector<128x1024xi1> to vector<128x1024xi32>
    %73 = arith.sitofp %72 : vector<128x1024xi32> to vector<128x1024xf32>
    %74 = arith.truncf %73 : vector<128x1024xf32> to vector<128x1024xbf16>
    %cst_30 = arith.constant dense<0.000000e+00> : vector<8x1024xf32>
    %75 = tpu.matmul %3, %74, %cst_30 {dimension_numbers = #tpu.dot_dimension_numbers<[1], [0], [0], [1], [0, 0, 1, 1], [], []>} : vector<8x128xbf16>, vector<128x1024xbf16>, vector<8x1024xf32> -> vector<8x1024xf32>
    %76 = arith.addf %66, %75 : vector<8x1024xf32>
    %c0_31 = arith.constant 0 : index
    %c0_32 = arith.constant 0 : index
    %c7 = arith.constant 7 : index
    %77 = vector.load %arg2[%c0_31, %c0_32, %c7] : memref<1x128x8xf32, #tpu.memory_space<vmem>>, vector<1x128x1xf32>
    %78 = vector.shape_cast %77 : vector<1x128x1xf32> to vector<128x1xf32>
    %79 = vector.broadcast %78 : vector<128x1xf32> to vector<128x1024xf32>
    %80 = vector.broadcast %5 : vector<1x1024xf32> to vector<128x1024xf32>
    %81 = arith.cmpf olt, %79, %80 : vector<128x1024xf32>
    %82 = arith.extui %81 : vector<128x1024xi1> to vector<128x1024xi32>
    %83 = arith.sitofp %82 : vector<128x1024xi32> to vector<128x1024xf32>
    %84 = arith.truncf %83 : vector<128x1024xf32> to vector<128x1024xbf16>
    %cst_33 = arith.constant dense<0.000000e+00> : vector<8x1024xf32>
    %85 = tpu.matmul %3, %84, %cst_33 {dimension_numbers = #tpu.dot_dimension_numbers<[1], [0], [0], [1], [0, 0, 1, 1], [], []>} : vector<8x128xbf16>, vector<128x1024xbf16>, vector<8x1024xf32> -> vector<8x1024xf32>
    %86 = arith.addf %76, %85 : vector<8x1024xf32>
    %87 = vector.extract_strided_slice %86 {offsets = [0, 0], sizes = [1, 1024], strides = [1, 1]} : vector<8x1024xf32> to vector<1x1024xf32>
    %88 = vector.broadcast %87 : vector<1x1024xf32> to vector<16x1024xf32>
    %89 = vector.broadcast %0 : vector<16x1xf32> to vector<16x1024xf32>
    %90 = arith.cmpf ole, %88, %89 : vector<16x1024xf32>
    %cst_34 = arith.constant 0xFF800000 : f32
    %91 = vector.shape_cast %5 : vector<1x1024xf32> to vector<1x1024xf32>
    %92 = vector.broadcast %91 : vector<1x1024xf32> to vector<16x1024xf32>
    %93 = vector.broadcast %cst_34 : f32 to vector<16x1024xf32>
    %94 = arith.select %90, %92, %93 : vector<16x1024xi1>, vector<16x1024xf32>
    %cst_35 = arith.constant dense<0xFF800000> : vector<16xf32>
    %95 = vector.multi_reduction <maximumf>, %94, %cst_35 [1] : vector<16x1024xf32> to vector<16xf32>
    %96 = vector.shape_cast %95 : vector<16xf32> to vector<16x1xf32>
    %97 = vector.broadcast %87 : vector<1x1024xf32> to vector<16x1024xf32>
    %98 = vector.broadcast %1 : vector<16x1xf32> to vector<16x1024xf32>
    %99 = arith.cmpf ole, %97, %98 : vector<16x1024xf32>
    %cst_36 = arith.constant 0xFF800000 : f32
    %100 = vector.shape_cast %5 : vector<1x1024xf32> to vector<1x1024xf32>
    %101 = vector.broadcast %100 : vector<1x1024xf32> to vector<16x1024xf32>
    %102 = vector.broadcast %cst_36 : f32 to vector<16x1024xf32>
    %103 = arith.select %99, %101, %102 : vector<16x1024xi1>, vector<16x1024xf32>
    %cst_37 = arith.constant dense<0xFF800000> : vector<16xf32>
    %104 = vector.multi_reduction <maximumf>, %103, %cst_37 [1] : vector<16x1024xf32> to vector<16xf32>
    %105 = vector.shape_cast %104 : vector<16xf32> to vector<16x1xf32>
    %106 = arith.subf %105, %96 : vector<16x1xf32>
    %107 = arith.mulf %2, %106 : vector<16x1xf32>
    %108 = arith.addf %96, %107 : vector<16x1xf32>
    %c0_38 = arith.constant 0 : index
    %c0_39 = arith.constant 0 : index
    %c0_40 = arith.constant 0 : index
    %109 = vector.load %arg6[%c0_38, %c0_39, %c0_40] : memref<1x16x1xf32, #tpu.memory_space<vmem>>, vector<1x16x1xf32>
    %110 = vector.shape_cast %109 : vector<1x16x1xf32> to vector<16x1xf32>
    %111 = vector.shape_cast %108 : vector<16x1xf32> to vector<1x16x1xf32>
    tpu.vector_store %arg6[%c0_38, %c0_39, %c0_40], %111 {strides = array<i32>} : memref<1x16x1xf32, #tpu.memory_space<vmem>>, vector<1x16x1xf32>,
    return
  }
  func.func @transform_0(%arg0: i32) -> (i32, i32, i32) {
    %c0_i32 = arith.constant 0 : i32
    %c0_i32_0 = arith.constant 0 : i32
    %c0_i32_1 = arith.constant 0 : i32
    return %arg0, %c0_i32, %c0_i32_0 : i32, i32, i32
  }
  func.func @transform_1(%arg0: i32) -> (i32, i32, i32) {
    %c0_i32 = arith.constant 0 : i32
    %c0_i32_0 = arith.constant 0 : i32
    %c0_i32_1 = arith.constant 0 : i32
    return %arg0, %c0_i32, %c0_i32_0 : i32, i32, i32
  }
  func.func @transform_2(%arg0: i32) -> (i32, i32) {
    %c0_i32 = arith.constant 0 : i32
    %c0_i32_0 = arith.constant 0 : i32
    %c0_i32_1 = arith.constant 0 : i32
    return %c0_i32, %c0_i32_0 : i32, i32
  }
  func.func @transform_3(%arg0: i32) -> (i32, i32) {
    %c0_i32 = arith.constant 0 : i32
    %c0_i32_0 = arith.constant 0 : i32
    %c0_i32_1 = arith.constant 0 : i32
    return %c0_i32, %c0_i32_0 : i32, i32
  }
  func.func @transform_4(%arg0: i32) -> (i32, i32) {
    %c0_i32 = arith.constant 0 : i32
    %c0_i32_0 = arith.constant 0 : i32
    %c0_i32_1 = arith.constant 0 : i32
    return %c0_i32, %c0_i32_0 : i32, i32
  }
  func.func @transform_5(%arg0: i32) -> (i32, i32, i32) {
    %c0_i32 = arith.constant 0 : i32
    %c0_i32_0 = arith.constant 0 : i32
    %c0_i32_1 = arith.constant 0 : i32
    return %arg0, %c0_i32, %c0_i32_0 : i32, i32, i32
  }
}

</mosaic_0001>

<bundles_post_ra>
// kernel: tpu_custom_call.1
= control target key start
LH: loop header
LB: loop body
LE: loop exit
PB: predicated region body
PF: predicated region fallthrough
CT: control target
= control target key end

     0   :  { %s7665_s18 = smov 0   ;;  %s14610_s0 = inlined_call_operand.vmem [shape: f32[2,1,1024], index: 0, kind: input, shape index: {}]   ;;  %s14611_s1 = inlined_call_operand.vmem [shape: f32[2,128,8], index: 1, kind: input, shape index: {}]   ;;  %s14612_s2 = inlined_call_operand.vmem [shape: f32[16,1], index: 2, kind: input, shape index: {}]   ;;  %s14613_s3 = inlined_call_operand.vmem [shape: f32[16,1], index: 3, kind: input, shape index: {}]   ;;  %s14614_s4 = inlined_call_operand.vmem [shape: f32[16,1], index: 4, kind: input, shape index: {}]   ;;  %s14615_s5 = inlined_call_operand.vmem [shape: f32[2,16,1], index: 5, kind: output, shape index: {}]  }
   0x1 LB: > { %s5479_s19 = sadd.s32 4294967295, %s7623_s18   ;;  %p5483_p0 = scmp.ge.s32.totalorder %s7623_s18, 1  ;;  %s7623_s18 = sphi %s7665_s18, %s15_s18  }
   0x2   : > { %p196_p1 = scmp.lt.s32.totalorder %s7623_s18, 3 }
   0x4   : > { %p197_p2 = pnand %p5483_p0, %p196_p1 }
   0x6   : > { %200 = sbr.rel (%p197_p2) target bundleno = 1023 (0x3ff), region = 40 }
   0xb   : > { %p228_p3 = scmp.lt.s32.totalorder %s5479_s19, 1  ;;  %v14616_v0 = vmov 0   ;;  %v7626_v17 = vmov 1   ;;  %v7627_v18 = vmov 2   ;;  %v7628_v35 = vmov 3  }
   0xc   : > { %7561 = vset.pattern.permute.xlu2 %v14616_v0  ;;  %7560 = vset.pattern.permute.xlu1 %v14616_v0  ;;  %v14624_v44 = vmov 0  ;;  %v14626_v45 = vmov 0  ;;  %v14628_v46 = vmov 0  ;;  %v14630_v47 = vmov 0 }
   0xd   : > { %7559 = vset.pattern.permute.xlu0 %v14616_v0  ;;  %s15728_s19 = smov (!%p228_p3, %s5479_s19), 1  ;;  %v7629_v61 = vmov 1.0|1.0   ;;  %v7630_v62 = vmov 4   ;;  %v14786_v0 = vmov 0 }
   0xe   : > { %s7539_s20 = sshll.u32 %s15728_s19, 7  ;;  %s5484_s24 = sshll.u32 %s15728_s19, 3 }
   0xf   : > { %s7682_s23 = scalar_lea.vmem %s14611_s1, %s7539_s20  ;;  %s231_s27 = scalar_lea.vmem %s14610_s0, %s5484_s24 }
  0x10   : > { %v7685_v1 = vld [vmem:[%s7682_s23 + $0x20] sm:$0xff]  ;;  %v7688_v2 = vld [vmem:[%s7682_s23 + $0x10] sm:$0xff]  ;;  %v7697_v4 = vld [vmem:[%s7682_s23 + $0x28] sm:$0xff]  ;;  %s7540_s13 = sshll.u32 %s15728_s19, 4 }
  0x11   : > { %288 = vperm.xlu2 %7561, %v7685_v1   ;;  %278 = vperm.xlu1 %7560, %v7688_v2   ;;  %v7693_v3 = vld [vmem:[%s7682_s23] sm:$0xff]  ;;  %v7700_v5 = vld [vmem:[%s7682_s23 + $0x18] sm:$0xff]  ;;  %v7703_v6 = vld [vmem:[%s7682_s23 + $0x8] sm:$0xff]  ;;  %s241_s16 = scalar_lea.vmem %s14615_s5, %s7540_s13 }
  0x12   : > { %268 = vperm.xlu0 %7559, %v7693_v3   ;;  %v7709_v7 = vld [vmem:[%s7682_s23 + $0x40] sm:$0xff]  ;;  %v7712_v8 = vld [vmem:[%s7682_s23 + $0x38] sm:$0xff]  ;;  %v7715_v9 = vld [vmem:[%s7682_s23 + $0x30] sm:$0xff] }
  0x13   : > { %v7721_v10 = vld [vmem:[%s7682_s23 + $0x58] sm:$0xff]  ;;  %v7724_v11 = vld [vmem:[%s7682_s23 + $0x50] sm:$0xff]  ;;  %v7727_v12 = vld [vmem:[%s7682_s23 + $0x48] sm:$0xff] }
  0x14   : > { %v7733_v13 = vld [vmem:[%s7682_s23 + $0x70] sm:$0xff]  ;;  %v7736_v14 = vld [vmem:[%s7682_s23 + $0x68] sm:$0xff]  ;;  %v7739_v15 = vld [vmem:[%s7682_s23 + $0x60] sm:$0xff] }
  0x15   : > { %v7745_v16 = vld [vmem:[%s7682_s23 + $0x78] sm:$0xff]  ;;  %v7816_v36 = vld [vmem:[%s231_s27] sm:$0xff] }
  0x16   : > { %v7822_v37 = vperm.slane %v7816_v36, 0  ;;  %v7825_v38 = vperm.slane %v7816_v36, 1  ;;  %v7830_v40 = vperm.slane %v7816_v36, 2  ;;  %v7835_v41 = vperm.slane %v7816_v36, 3 }
  0x17   : > { %v8154_v63 = vperm.slane %v7816_v36, 7 }
  0x19   : > { %293 = vperm.xlu2 %7561, %v7697_v4   ;;  %283 = vperm.xlu1 %7560, %v7700_v5  }
  0x1a   : > { %273 = vperm.xlu0 %7559, %v7703_v6  }
  0x21   : > { %308 = vperm.xlu2 %7561, %v7709_v7   ;;  %303 = vperm.xlu1 %7560, %v7712_v8  }
  0x22   : > { %298 = vperm.xlu0 %7559, %v7715_v9  }
  0x29   : > { %323 = vperm.xlu2 %7561, %v7721_v10   ;;  %318 = vperm.xlu1 %7560, %v7724_v11  }
  0x2a   : > { %313 = vperm.xlu0 %7559, %v7727_v12  }
  0x31   : > { %338 = vperm.xlu2 %7561, %v7733_v13   ;;  %333 = vperm.xlu1 %7560, %v7736_v14  }
  0x32   : > { %328 = vperm.xlu0 %7559, %v7739_v15  }
  0x39   : > { %7563 = vset.pattern.permute.xlu2 %v7626_v17  ;;  %7562 = vset.pattern.permute.xlu1 %v7626_v17 }
  0x3a   : > { %343 = vperm.xlu0 %7559, %v7745_v16   ;;  %816 = vperm.xlu2 %7563, %v7703_v6  }
  0x3b   : > { %812 = vperm.xlu1 %7562, %v7693_v3  }
  0x42   : > { %7564 = vset.pattern.permute.xlu0 %v7626_v17  ;;  %828 = vperm.xlu2 %7563, %v7685_v1   ;;  %v14678_v17 = vmov 0 }
  0x43   : > { %824 = vperm.xlu1 %7562, %v7700_v5   ;;  %820 = vperm.xlu0 %7564, %v7688_v2  }
  0x4a   : > { %836 = vperm.xlu2 %7563, %v7715_v9  }
  0x4b   : > { %832 = vperm.xlu1 %7562, %v7697_v4   ;;  %840 = vperm.xlu0 %7564, %v7712_v8  }
  0x52   : > { %848 = vperm.xlu2 %7563, %v7727_v12  }
  0x53   : > { %844 = vperm.xlu1 %7562, %v7709_v7   ;;  %852 = vperm.xlu0 %7564, %v7724_v11  }
  0x5a   : > { %860 = vperm.xlu2 %7563, %v7739_v15  }
  0x5b   : > { %856 = vperm.xlu1 %7562, %v7721_v10   ;;  %864 = vperm.xlu0 %7564, %v7736_v14  }
  0x62   : > { %872 = vperm.xlu2 %7563, %v7745_v16  }
  0x63   : > { %868 = vperm.xlu1 %7562, %v7733_v13   ;;  %7565 = vset.pattern.permute.xlu0 %v7627_v18 }
  0x64   : > { %1532 = vperm.xlu0 %7565, %v7693_v3  }
  0x6a   : > { %7567 = vset.pattern.permute.xlu2 %v7627_v18 }
  0x6b   : > { %7566 = vset.pattern.permute.xlu1 %v7627_v18  ;;  %1540 = vperm.xlu2 %7567, %v7688_v2   ;;  %v7768_v19 = vpop.permute.xlu2 %288  ;;  %v8046_v18 = vperm.slane %v7816_v36, 4 }
  0x6c   : > { %1536 = vperm.xlu1 %7566, %v7703_v6   ;;  %1552 = vperm.xlu0 %7565, %v7697_v4  }
  0x73   : > { %1548 = vperm.xlu2 %7567, %v7685_v1   ;;  %v7773_v20 = vpop.permute.xlu2 %293 }
  0x74   : > { %1544 = vperm.xlu1 %7566, %v7700_v5   ;;  %1564 = vperm.xlu0 %7565, %v7709_v7  }
  0x7b   : > { %1560 = vperm.xlu2 %7567, %v7712_v8   ;;  %v7778_v21 = vpop.permute.xlu2 %308 }
  0x7c   : > { %1556 = vperm.xlu1 %7566, %v7715_v9   ;;  %1576 = vperm.xlu0 %7565, %v7721_v10  }
  0x83   : > { %v7780_v22 = vpop.permute.xlu1 %278  ;;  %1572 = vperm.xlu2 %7567, %v7724_v11   ;;  %v7793_v26 = vpop.permute.xlu2 %323 }
  0x84   : > { %14621 = vst [vmem:[#allocation2_spill] sm:$0xff] %v7780_v22  ;;  %v7783_v23 = vpop.permute.xlu0 %268  ;;  %1568 = vperm.xlu1 %7566, %v7727_v12   ;;  %1588 = vperm.xlu0 %7565, %v7733_v13   ;;  %v14690_v22 = vmov 0 }
  0x85   : > { %14622 = vst [vmem:[#allocation3_spill] sm:$0xff] %v7783_v23  ;;  %v14700_v23 = vmov 0 }
  0x8b   : > { %v7787_v24 = vpop.permute.xlu1 %283  ;;  %1584 = vperm.xlu2 %7567, %v7736_v14   ;;  %v7800_v29 = vpop.permute.xlu2 %338 }
  0x8c   : > { %v7790_v25 = vpop.permute.xlu0 %273  ;;  %1580 = vperm.xlu1 %7566, %v7739_v15   ;;  %7569 = vset.pattern.permute.xlu0 %v7628_v35 }
  0x8d   : > { %14623 = vst [vmem:[#allocation4_spill] sm:$0xff] %v7790_v25  ;;  %2160 = vperm.xlu0 %7569, %v7703_v6   ;;  %v14795_v25 = vmov 0 }
  0x93   : > { %v7795_v27 = vpop.permute.xlu1 %303  ;;  %7568 = vset.pattern.permute.xlu2 %v7628_v35 }
  0x94   : > { %v7797_v28 = vpop.permute.xlu0 %298  ;;  %1592 = vperm.xlu1 %7566, %v7745_v16   ;;  %v7807_v32 = vpop.permute.xlu2 %816  ;;  %2156 = vperm.xlu2 %7568, %v7693_v3  }
  0x95   : > { %vm883_vm0 = vcmp.lt.f32.partialorder %v7807_v32, %v7822_v37  ;;  %vm884_vm1 = vcmp.lt.f32.partialorder %v7807_v32, %v7825_v38  ;;  %vm885_vm5 = vcmp.lt.f32.partialorder %v7807_v32, %v7830_v40  ;;  %2180 = vperm.xlu0 %7569, %v7715_v9   ;;  %vm886_vm8 = vcmp.lt.f32.partialorder %v7807_v32, %v7835_v41 }
  0x9b   : > { %v7802_v30 = vpop.permute.xlu1 %318 }
  0x9c   : > { %v7804_v31 = vpop.permute.xlu0 %313  ;;  %7570 = vset.pattern.permute.xlu1 %v7628_v35  ;;  %v7827_v39 = vpop.permute.xlu2 %828  ;;  %2168 = vperm.xlu2 %7568, %v7700_v5   ;;  %v14687_v35 = vmov 0 }
  0x9d   : > { %2164 = vperm.xlu1 %7570, %v7688_v2   ;;  %2192 = vperm.xlu0 %7569, %v7727_v12  }
  0xa3   : > { %v7809_v33 = vpop.permute.xlu1 %333 }
  0xa4   : > { %v7814_v34 = vpop.permute.xlu0 %328  ;;  %v7874_v48 = vpop.permute.xlu2 %836  ;;  %2176 = vperm.xlu2 %7568, %v7697_v4  }
  0xa5   : > { %2172 = vperm.xlu1 %7570, %v7685_v1   ;;  %2204 = vperm.xlu0 %7569, %v7739_v15  }
  0xac   : > { %v7837_v42 = vpop.permute.xlu0 %343  ;;  %v7885_v52 = vpop.permute.xlu2 %848  ;;  %2188 = vperm.xlu2 %7568, %v7709_v7  }
  0xad   : > { %v7839_v43 = vpop.permute.xlu1 %812  ;;  %2184 = vperm.xlu1 %7570, %v7712_v8   ;;  %2216 = vperm.xlu0 %7569, %v7745_v16  }
  0xae   : > { %vm875_vm2 = vcmp.lt.f32.partialorder %v7839_v43, %v7822_v37  ;;  %vm876_vm3 = vcmp.lt.f32.partialorder %v7839_v43, %v7825_v38  ;;  %vm877_vm4 = vcmp.lt.f32.partialorder %v7839_v43, %v7830_v40  ;;  %vm878_vm7 = vcmp.lt.f32.partialorder %v7839_v43, %v7835_v41 }
  0xaf   : > { %vm7853_vm6 = vmpackc.low %vm883_vm0, %vm875_vm2 }
  0xb0   : > { %v14625_v44 = vsel %vm7853_vm6, 4294967295, %v14624_v44  ;;  %vm7861_vm9 = vmpackc.low %vm884_vm1, %vm876_vm3 }
  0xb1   : > { %v14627_v45 = vsel %vm7861_vm9, 4294967295, %v14626_v45  ;;  %vm7866_vm10 = vmpackc.low %vm885_vm5, %vm877_vm4 }
  0xb2   : > { %v14629_v46 = vsel %vm7866_vm10, 4294967295, %v14628_v46  ;;  %vm7870_vm11 = vmpackc.low %vm886_vm8, %vm878_vm7 }
  0xb3   : > { %v14631_v47 = vsel %vm7870_vm11, 4294967295, %v14630_v47 }
  0xb4   : > { %v7896_v55 = vpop.permute.xlu2 %860  ;;  %2200 = vperm.xlu2 %7568, %v7721_v10  }
  0xb5   : > { %v7876_v49 = vpop.permute.xlu1 %824  ;;  %v7878_v50 = vpop.permute.xlu0 %820  ;;  %2196 = vperm.xlu1 %7570, %v7724_v11   ;;  %7573 = vset.pattern.permute.xlu0 %v7630_v62 }
  0xb6   : > { %2788 = vperm.xlu0 %7573, %v7688_v2   ;;  %v14684_v2 = vmov 0 }
  0xbc   : > { %2212 = vperm.xlu2 %7568, %v7733_v13   ;;  %v7904_v58 = vpop.permute.xlu2 %872 }
  0xbd   : > { %v7883_v51 = vpop.permute.xlu1 %832  ;;  %v7889_v53 = vpop.permute.xlu0 %840  ;;  %2208 = vperm.xlu1 %7570, %v7736_v14   ;;  %vm995_vm13 = vcmp.lt.f32.partialorder %v7904_v58, %v7822_v37  ;;  %vm996_vm1 = vcmp.lt.f32.partialorder %v7904_v58, %v7825_v38  ;;  %vm997_vm4 = vcmp.lt.f32.partialorder %v7904_v58, %v7830_v40  ;;  %vm998_vm8 = vcmp.lt.f32.partialorder %v7904_v58, %v7835_v41 }
  0xbe   : > { %2808 = vperm.xlu0 %7573, %v7712_v8   ;;  %v7587_v8 = vld [vmem:[%s7682_s23] sm:$0xff] }
  0xc4   : > { %7572 = vset.pattern.permute.xlu2 %v7630_v62 }
  0xc5   : > { %v7892_v54 = vpop.permute.xlu1 %844  ;;  %v7899_v56 = vpop.permute.xlu0 %852  ;;  %7571 = vset.pattern.permute.xlu1 %v7630_v62  ;;  %2784 = vperm.xlu2 %7572, %v7703_v6   ;;  %v8083_v6 = vperm.slane %v7816_v36, 5  ;;  %v8126_v62 = vperm.slane %v7816_v36, 6  ;;  %v7633_v36 = vmov 6  }
  0xc6   : > { %2780 = vperm.xlu1 %7571, %v7693_v3   ;;  %2820 = vperm.xlu0 %7573, %v7724_v11   ;;  %v14706_v11 = vmov 0  ;;  %v9180_v3 = vld [vmem:[%s7682_s23 + $0x10] sm:$0xff] }
  0xc7   : > { %vm14689_vm6 = vcmp.lt.f32.partialorder %v7883_v51, %v8126_v62 }
  0xcd   : > { %v7901_v57 = vpop.permute.xlu1 %856  ;;  %v7906_v59 = vpop.permute.xlu0 %864  ;;  %2796 = vperm.xlu2 %7572, %v7685_v1   ;;  %v14784_v1 = vld [vmem:[#allocation2_spill] sm:$0xff] }
  0xce   : > { %vm979_vm5 = vcmp.lt.f32.partialorder %v7906_v59, %v7822_v37  ;;  %2792 = vperm.xlu1 %7571, %v7700_v5   ;;  %2836 = vperm.xlu0 %7573, %v7733_v13   ;;  %v14813_v13 = vmov 0  ;;  %v14853_v5 = vmov 0 }
  0xd5   : > { %v7908_v60 = vpop.permute.xlu1 %868  ;;  %2804 = vperm.xlu2 %7572, %v7715_v9   ;;  %v14797_v9 = vmov 0 }
  0xd6   : > { %vm987_vm12 = vcmp.lt.f32.partialorder %v7908_v60, %v7822_v37  ;;  %vm988_vm14 = vcmp.lt.f32.partialorder %v7908_v60, %v7825_v38  ;;  %vm989_vm15 = vcmp.lt.f32.partialorder %v7908_v60, %v7830_v40  ;;  %vm990_vm2 = vcmp.lt.f32.partialorder %v7908_v60, %v7835_v41  ;;  %2800 = vperm.xlu1 %7571, %v7697_v4   ;;  %v14792_v4 = vld [vmem:[#allocation4_spill] sm:$0xff] }
  0xd7   : > { %vm5745_vm0 = vmpackc.low %vm995_vm13, %vm987_vm12  ;;  %vm980_vm12 = vcmp.lt.f32.partialorder %v7906_v59, %v7825_v38 }
  0xd8   : > { %5746 = vmatpush.bf16.msk.msra.mxu0 %vm5745_vm0, %v7629_v61  ;;  %vm5761_vm3 = vmpackc.low %vm996_vm1, %vm988_vm14  ;;  %vm971_vm14 = vcmp.lt.f32.partialorder %v7896_v55, %v7822_v37  ;;  %vm981_vm0 = vcmp.lt.f32.partialorder %v7906_v59, %v7830_v40 }
  0xd9   : > { %5762 = vmatpush.bf16.msk.msra.mxu1 %vm5761_vm3, %v7629_v61  ;;  %vm5777_vm7 = vmpackc.low %vm997_vm4, %vm989_vm15  ;;  %vm972_vm15 = vcmp.lt.f32.partialorder %v7896_v55, %v7825_v38  ;;  %vm982_vm3 = vcmp.lt.f32.partialorder %v7906_v59, %v7835_v41  ;;  %vm974_vm4 = vcmp.lt.f32.partialorder %v7896_v55, %v7835_v41 }
  0xda   : > { %5778 = vmatpush.bf16.msk.msra.mxu2 %vm5777_vm7, %v7629_v61  ;;  %vm5793_vm13 = vmpackc.low %vm998_vm8, %vm990_vm2  ;;  %vm973_vm8 = vcmp.lt.f32.partialorder %v7896_v55, %v7830_v40  ;;  %vm964_vm2 = vcmp.lt.f32.partialorder %v7901_v57, %v7825_v38 }
  0xdb   : > { %5794 = vmatpush.bf16.msk.msra.mxu3 %vm5793_vm13, %v7629_v61  ;;  %vm5747_vm1 = vmpackc.low %vm979_vm5, %vm971_vm14  ;;  %vm963_vm5 = vcmp.lt.f32.partialorder %v7901_v57, %v7822_v37  ;;  %vm931_vm13 = vcmp.lt.f32.partialorder %v7889_v53, %v7822_v37 }
  0xdc   : > { %5748 = vmatpush.bf16.msk.msra.mxu0 %vm5747_vm1, %v7629_v61  ;;  %vm5763_vm7 = vmpackc.low %vm980_vm12, %vm972_vm15  ;;  %vm932_vm12 = vcmp.lt.f32.partialorder %v7889_v53, %v7825_v38  ;;  %vm965_vm15 = vcmp.lt.f32.partialorder %v7901_v57, %v7830_v40 }
  0xdd   : > { %5764 = vmatpush.bf16.msk.msra.mxu1 %vm5763_vm7, %v7629_v61  ;;  %vm5779_vm14 = vmpackc.low %vm981_vm0, %vm973_vm8  ;;  %vm955_vm0 = vcmp.lt.f32.partialorder %v7899_v56, %v7822_v37  ;;  %2816 = vperm.xlu2 %7572, %v7727_v12   ;;  %v14728_v12 = vmov 0 }
  0xde   : > { %5780 = vmatpush.bf16.msk.msra.mxu2 %vm5779_vm14, %v7629_v61  ;;  %vm5795_vm1 = vmpackc.low %vm982_vm3, %vm974_vm4  ;;  %vm956_vm3 = vcmp.lt.f32.partialorder %v7899_v56, %v7825_v38  ;;  %vm14632_vm14 = vcmp.lt.f32.partialorder %v7874_v48, %v7822_v37  ;;  %2812 = vperm.xlu1 %7571, %v7709_v7   ;;  %v9288_v7 = vld [vmem:[%s7682_s23 + $0x60] sm:$0xff] }
  0xdf   : > { %5796 = vmatpush.bf16.msk.msra.mxu3 %vm5795_vm1, %v7629_v61  ;;  %vm5749_vm8 = vmpackc.low %vm963_vm5, %vm955_vm0  ;;  %vm957_vm0 = vcmp.lt.f32.partialorder %v7899_v56, %v7830_v40  ;;  %vm14646_vm1 = vcmp.lt.f32.partialorder %v7892_v54, %v7825_v38 }
  0xe0   : > { %vm7985_vm7 = vmpackc.low %vm931_vm13, %vm14632_vm14  ;;  %5750 = vmatpush.bf16.msk.msra.mxu0 %vm5749_vm8, %v7629_v61  ;;  %vm14635_vm13 = vcmp.lt.f32.partialorder %v7874_v48, %v7825_v38  ;;  %vm925_vm8 = vcmp.lt.f32.partialorder %v7874_v48, %v7830_v40 }
  0xe1   : > { %vm5765_vm5 = vmpackc.low %vm964_vm2, %vm956_vm3  ;;  %vm958_vm3 = vcmp.lt.f32.partialorder %v7899_v56, %v7835_v41 }
  0xe2   : > { %vm8005_vm14 = vmpackc.low %vm932_vm12, %vm14635_vm13  ;;  %5766 = vmatpush.bf16.msk.msra.mxu1 %vm5765_vm5, %v7629_v61  ;;  %vm14638_vm13 = vcmp.lt.f32.partialorder %v7889_v53, %v7830_v40  ;;  %vm926_vm5 = vcmp.lt.f32.partialorder %v7874_v48, %v7835_v41  ;;  %vm947_vm12 = vcmp.lt.f32.partialorder %v7885_v52, %v7822_v37 }
  0xe3   : > { %vm5781_vm2 = vmpackc.low %vm965_vm15, %vm957_vm0  ;;  %vm14641_vm15 = vcmp.lt.f32.partialorder %v7901_v57, %v7835_v41 }
  0xe4   : > { %vm8023_vm4 = vmpackc.low %vm14638_vm13, %vm925_vm8  ;;  %5782 = vmatpush.bf16.msk.msra.mxu2 %vm5781_vm2, %v7629_v61  ;;  %vm14642_vm8 = vcmp.lt.f32.partialorder %v7889_v53, %v7835_v41  ;;  %vm14645_vm2 = vcmp.lt.f32.partialorder %v7892_v54, %v7822_v37 }
  0xe5   : > { %vm5797_vm0 = vmpackc.low %vm14641_vm15, %vm958_vm3  ;;  %vm948_vm15 = vcmp.lt.f32.partialorder %v7885_v52, %v7825_v38  ;;  %2828 = vperm.xlu2 %7572, %v7739_v15   ;;  %v8546_v15 = vpop.permute.xlu1 %1536 }
  0xe6   : > { %vm8040_vm13 = vmpackc.low %vm14642_vm8, %vm926_vm5  ;;  %5798 = vmatpush.bf16.msk.msra.mxu3 %vm5797_vm0, %v7629_v61  ;;  %vm949_vm0 = vcmp.lt.f32.partialorder %v7885_v52, %v7830_v40  ;;  %vm899_vm5 = vcmp.lt.f32.partialorder %v7876_v49, %v7822_v37  ;;  %2824 = vperm.xlu1 %7571, %v7721_v10   ;;  %v14725_v10 = vmov 0 }
  0xe7   : > { %vm5751_vm3 = vmpackc.low %vm947_vm12, %vm14645_vm2  ;;  %vm14650_vm2 = vcmp.lt.f32.partialorder %v7883_v51, %v7822_v37  ;;  %vm14656_vm12 = vcmp.lt.f32.partialorder %v7883_v51, %v7825_v38 }
  0xe8   : > { %5752 = vmatpush.bf16.msk.msra.mxu0 %vm5751_vm3, %v7629_v61  ;;  %vm5767_vm11 = vmpackc.low %vm948_vm15, %vm14646_vm1  ;;  %vm14647_vm3 = vcmp.lt.f32.partialorder %v7892_v54, %v7830_v40  ;;  %vm950_vm1 = vcmp.lt.f32.partialorder %v7885_v52, %v7835_v41  ;;  %vm14653_vm15 = vcmp.lt.f32.partialorder %v7878_v50, %v7822_v37 }
  0xe9   : > { %5768 = vmatpush.bf16.msk.msra.mxu1 %vm5767_vm11, %v7629_v61  ;;  %vm5783_vm8 = vmpackc.low %vm949_vm0, %vm14647_vm3  ;;  %vm14648_vm11 = vcmp.lt.f32.partialorder %v7892_v54, %v7835_v41 }
  0xea   : > { %5784 = vmatpush.bf16.msk.msra.mxu2 %vm5783_vm8, %v7629_v61  ;;  %vm5799_vm0 = vmpackc.low %vm950_vm1, %vm14648_vm11  ;;  %vm14649_vm8 = vcmp.lt.f32.partialorder %v7827_v39, %v7822_v37  ;;  %vm908_vm11 = vcmp.lt.f32.partialorder %v7827_v39, %v7825_v38 }
  0xeb   : > { %5800 = vmatpush.bf16.msk.msra.mxu3 %vm5799_vm0, %v7629_v61  ;;  %vm8103_vm1 = vmpackc.low %vm14650_vm2, %vm14649_vm8  ;;  %vm14659_vm8 = vcmp.lt.f32.partialorder %v7878_v50, %v7825_v38  ;;  %vm14660_vm2 = vcmp.lt.f32.partialorder %v7876_v49, %v7825_v38 }
  0xec   : > { %vm8117_vm0 = vmpackc.low %vm899_vm5, %vm14653_vm15  ;;  %5754 = vmatpush.bf16.msk.msra.mxu0 %vm7985_vm7, %v7629_v61  ;;  %vm909_vm15 = vcmp.lt.f32.partialorder %v7827_v39, %v7830_v40  ;;  %vm14667_vm7 = vcmp.lt.f32.partialorder %v7876_v49, %v7830_v40 }
  0xed   : > { %vm8134_vm5 = vmpackc.low %vm14656_vm12, %vm908_vm11  ;;  %5770 = vmatpush.bf16.msk.msra.mxu1 %vm8005_vm14, %v7629_v61  ;;  %vm14663_vm12 = vcmp.lt.f32.partialorder %v7883_v51, %v7830_v40  ;;  %2832 = vperm.xlu2 %7572, %v7736_v14   ;;  %v14905_v14 = vmov 0 }
  0xee   : > { %vm8146_vm3 = vmpackc.low %vm14660_vm2, %vm14659_vm8  ;;  %vm910_vm2 = vcmp.lt.f32.partialorder %v7827_v39, %v7835_v41  ;;  %vm14666_vm8 = vcmp.lt.f32.partialorder %v7878_v50, %v7830_v40  ;;  %5786 = vmatpush.bf16.msk.msra.mxu2 %vm8023_vm4, %v7629_v61  ;;  %2840 = vperm.xlu1 %7571, %v7745_v16   ;;  %v9389_v16 = vld [vmem:[%s7682_s23 + $0x68] sm:$0xff] }
  0xef   : > { %vm8162_vm11 = vmpackc.low %vm14663_vm12, %vm909_vm15  ;;  %vm14670_vm12 = vcmp.lt.f32.partialorder %v7883_v51, %v7835_v41  ;;  %vm911_vm15 = vcmp.lt.f32.partialorder %v7827_v39, %v8046_v18  ;;  %5802 = vmatpush.bf16.msk.msra.mxu3 %vm8040_vm13, %v7629_v61  ;;  %vm14680_vm13 = vcmp.lt.f32.partialorder %v7908_v60, %v8046_v18 }
  0xf0   : > { %vm8174_vm10 = vmpackc.low %vm14667_vm7, %vm14666_vm8  ;;  %vm14673_vm7 = vcmp.lt.f32.partialorder %v7878_v50, %v7835_v41  ;;  %vm14674_vm8 = vcmp.lt.f32.partialorder %v7876_v49, %v7835_v41  ;;  %5756 = vmatpush.bf16.msk.msra.mxu0 %vm8103_vm1, %v7629_v61  ;;  %vm913_vm1 = vcmp.lt.f32.partialorder %v7827_v39, %v8126_v62 }
  0xf1   : > { %vm8188_vm9 = vmpackc.low %vm14670_vm12, %vm910_vm2  ;;  %vm999_vm12 = vcmp.lt.f32.partialorder %v7904_v58, %v8046_v18  ;;  %vm912_vm2 = vcmp.lt.f32.partialorder %v7827_v39, %v8083_v6  ;;  %5772 = vmatpush.bf16.msk.msra.mxu1 %vm8134_vm5, %v7629_v61  ;;  %vm914_vm5 = vcmp.lt.f32.partialorder %v7827_v39, %v8154_v63  ;;  %v14696_v39 = vmov 0 }
  0xf2   : > { %vm8198_vm14 = vmpackc.low %vm14674_vm8, %vm14673_vm7  ;;  %vm14677_vm8 = vcmp.lt.f32.partialorder %v7883_v51, %v8046_v18  ;;  %5788 = vmatpush.bf16.msk.msra.mxu2 %vm8162_vm11, %v7629_v61  ;;  %vm905_vm11 = vcmp.lt.f32.partialorder %v7876_v49, %v8126_v62 }
  0xf3   : > { %vm8219_vm4 = vmpackc.low %vm14677_vm8, %vm911_vm15  ;;  %vm1000_vm15 = vcmp.lt.f32.partialorder %v7904_v58, %v8083_v6  ;;  %vm14683_vm8 = vcmp.lt.f32.partialorder %v7883_v51, %v8083_v6  ;;  %5804 = vmatpush.bf16.msk.msra.mxu3 %vm8188_vm9, %v7629_v61 }
  0xf4   : > { %v14679_v17 = vsel %vm8219_vm4, 4294967295, %v14678_v17  ;;  %vm8233_vm7 = vmpackc.low %vm999_vm12, %vm14680_vm13  ;;  %vm14686_vm13 = vcmp.lt.f32.partialorder %v7908_v60, %v8083_v6  ;;  %vm896_vm12 = vcmp.lt.f32.partialorder %v7878_v50, %v8083_v6  ;;  %5758 = vmatpush.bf16.msk.msra.mxu0 %vm8117_vm0, %v7629_v61  ;;  %vm880_vm0 = vcmp.lt.f32.partialorder %v7839_v43, %v8083_v6 }
  0xf5   : > { %vm8242_vm4 = vmpackc.low %vm14683_vm8, %vm912_vm2  ;;  %vm1001_vm8 = vcmp.lt.f32.partialorder %v7904_v58, %v8126_v62  ;;  %5774 = vmatpush.bf16.msk.msra.mxu1 %vm8146_vm3, %v7629_v61  ;;  %vm881_vm3 = vcmp.lt.f32.partialorder %v7839_v43, %v8126_v62 }
  0xf6   : > { %v14685_v2 = vsel %vm8242_vm4, 4294967295, %v14684_v2  ;;  %vm8258_vm2 = vmpackc.low %vm1000_vm15, %vm14686_vm13  ;;  %vm904_vm15 = vcmp.lt.f32.partialorder %v7876_v49, %v8083_v6  ;;  %vm14692_vm13 = vcmp.lt.f32.partialorder %v7908_v60, %v8126_v62  ;;  %5790 = vmatpush.bf16.msk.msra.mxu2 %vm8174_vm10, %v7629_v61  ;;  %vm882_vm10 = vcmp.lt.f32.partialorder %v7839_v43, %v8154_v63 }
  0xf7   : > { %v14688_v35 = vsel %vm8258_vm2, 4294967295, %v14687_v35  ;;  %vm8267_vm4 = vmpackc.low %vm14689_vm6, %vm913_vm1  ;;  %vm14695_vm1 = vcmp.lt.f32.partialorder %v7883_v51, %v8154_v63  ;;  %vm897_vm2 = vcmp.lt.f32.partialorder %v7878_v50, %v8126_v62  ;;  %5806 = vmatpush.bf16.msk.msra.mxu3 %vm8198_vm14, %v7629_v61  ;;  %vm14713_vm14 = vnez %v14627_v45 }
  0xf8   : > { %v14691_v22 = vsel %vm8267_vm4, 4294967295, %v14690_v22  ;;  %vm8283_vm6 = vmpackc.low %vm1001_vm8, %vm14692_vm13  ;;  %vm14698_vm8 = vcmp.lt.f32.partialorder %v7878_v50, %v8046_v18  ;;  %v14819_v45 = vmov 0 }
  0xf9   : > { %vm8290_vm4 = vmpackc.low %vm14695_vm1, %vm914_vm5  ;;  %vm14699_vm5 = vcmp.lt.f32.partialorder %v7876_v49, %v8046_v18  ;;  %vm898_vm1 = vcmp.lt.f32.partialorder %v7878_v50, %v8154_v63  ;;  %5776 = vmatpush.bf16.msk.msra.mxu1 %vm14713_vm14, %v7629_v61  ;;  %v14964_v50 = vmov 0 }
  0xfa   : > { %v14697_v39 = vsel %vm8290_vm4, 4294967295, %v14696_v39  ;;  %vm8308_vm13 = vmpackc.low %vm14699_vm5, %vm14698_vm8  ;;  %vm906_vm4 = vcmp.lt.f32.partialorder %v7876_v49, %v8154_v63  ;;  %vm879_vm8 = vcmp.lt.f32.partialorder %v7839_v43, %v8046_v18  ;;  %vm887_vm5 = vcmp.lt.f32.partialorder %v7807_v32, %v8046_v18 }
  0xfb   : > { %v14701_v23 = vsel %vm8308_vm13, 4294967295, %v14700_v23  ;;  %vm8319_vm9 = vmpackc.low %vm904_vm15, %vm896_vm12  ;;  %v14704_v49 = vmov 0  ;;  %vm888_vm12 = vcmp.lt.f32.partialorder %v7807_v32, %v8083_v6  ;;  %v14718_v43 = vmov 0 }
  0xfc   : > { %vm8331_vm13 = vmpackc.low %vm905_vm11, %vm897_vm2  ;;  %vm889_vm2 = vcmp.lt.f32.partialorder %v7807_v32, %v8126_v62 }
  0xfd   : > { %v14705_v49 = vsel %vm8331_vm13, 4294967295, %v14704_v49  ;;  %vm8342_vm15 = vmpackc.low %vm906_vm4, %vm898_vm1  ;;  %vm890_vm4 = vcmp.lt.f32.partialorder %v7807_v32, %v8154_v63  ;;  %vm14710_vm1 = vnez %v14625_v44  ;;  %v14714_v32 = vmov 0 }
  0xfe   : > { %v14707_v11 = vsel %vm8342_vm15, 4294967295, %v14706_v11  ;;  %vm8354_vm11 = vmpackc.low %vm887_vm5, %vm879_vm8  ;;  %5760 = vmatpush.bf16.msk.msra.mxu0 %vm14710_vm1, %v7629_v61  ;;  %vm994_vm15 = vcmp.lt.f32.partialorder %v7908_v60, %v8154_v63  ;;  %vm983_vm8 = vcmp.lt.f32.partialorder %v7906_v59, %v8046_v18  ;;  %vm1002_vm1 = vcmp.lt.f32.partialorder %v7904_v58, %v8154_v63 }
  0xff   : > { %vm8367_vm13 = vmpackc.low %vm888_vm12, %vm880_vm0  ;;  %vm14716_vm0 = vnez %v14629_v46  ;;  %vm14717_vm12 = vnez %v14688_v35  ;;  %v7631_v44 = vmov 1065369472   ;;  %v14766_v58 = vmov 0 }
 0x100   : > { %vm8379_vm5 = vmpackc.low %vm889_vm2, %vm881_vm3  ;;  %5792 = vmatpush.bf16.msk.msra.mxu2 %vm14716_vm0, %v7629_v61  ;;  %5826 = vmatpush.bf16.msk.msrb.mxu1 %vm14717_vm12, %v7629_v61  ;;  %vm14720_vm3 = vnez %v14631_v47  ;;  %vm975_vm0 = vcmp.lt.f32.partialorder %v7896_v55, %v8046_v18  ;;  %vm985_vm12 = vcmp.lt.f32.partialorder %v7906_v59, %v8126_v62  ;;  %v14746_v47 = vmov 0 }
 0x101   : > { %v14715_v32 = vsel %vm8379_vm5, 4294967295, %v14714_v32  ;;  %vm8393_vm14 = vmpackc.low %vm890_vm4, %vm882_vm10  ;;  %5808 = vmatpush.bf16.msk.msra.mxu3 %vm14720_vm3, %v7629_v61  ;;  %vm976_vm4 = vcmp.lt.f32.partialorder %v7896_v55, %v8083_v6  ;;  %vm986_vm3 = vcmp.lt.f32.partialorder %v7906_v59, %v8154_v63  ;;  %1331 = vmatmul.bf16.vlgmr.msra.gmra.mxu0 %v7631_v44  ;;  %v14850_v60 = vmov 0 }
 0x102   : > { %5810 = vmatpush.bf16.msk.msrb.mxu0 %vm8233_vm7, %v7629_v61  ;;  %vm984_vm7 = vcmp.lt.f32.partialorder %v7906_v59, %v8083_v6  ;;  %v14719_v43 = vsel %vm8393_vm14, 4294967295, %v14718_v43  ;;  %vm5857_vm2 = vmpackc.low %vm1002_vm1, %vm994_vm15  ;;  %vm977_vm15 = vcmp.lt.f32.partialorder %v7896_v55, %v8126_v62  ;;  %vm967_vm1 = vcmp.lt.f32.partialorder %v7901_v57, %v8046_v18  ;;  %1344 = vmatmul.bf16.vlgmr.msra.gmra.mxu1 %v7631_v44  ;;  %v9110_v59 = vld [vmem:[%s7682_s23 + $0x8] sm:$0xff] }
 0x103   : > { %vm5811_vm10 = vmpackc.low %vm983_vm8, %vm975_vm0  ;;  %1357 = vmatmul.bf16.vlgmr.msra.gmra.mxu2 %v7631_v44  ;;  %vm968_vm0 = vcmp.lt.f32.partialorder %v7901_v57, %v8083_v6 }
 0x104   : > { %5842 = vmatpush.bf16.msk.msrb.mxu2 %vm8283_vm6, %v7629_v61  ;;  %vm5827_vm6 = vmpackc.low %vm984_vm7, %vm976_vm4  ;;  %1370 = vmatmul.bf16.vlgmr.msra.gmra.mxu3 %v7631_v44  ;;  %vm969_vm4 = vcmp.lt.f32.partialorder %v7901_v57, %v8126_v62 }
 0x105   : > { %5858 = vmatpush.bf16.msk.msrb.mxu3 %vm5857_vm2, %v7629_v61  ;;  %5828 = vmatpush.bf16.msk.msrb.mxu1 %vm5827_vm6, %v7629_v61  ;;  %vm5843_vm8 = vmpackc.low %vm985_vm12, %vm977_vm15  ;;  %vm978_vm2 = vcmp.lt.f32.partialorder %v7896_v55, %v8154_v63  ;;  %vm960_vm6 = vcmp.lt.f32.partialorder %v7899_v56, %v8083_v6  ;;  %vm970_vm15 = vcmp.lt.f32.partialorder %v7901_v57, %v8154_v63  ;;  %v14761_v55 = vmov 0  ;;  %v8704_v57 = vpop.permute.xlu2 %1540 }
 0x106   : > { %5812 = vmatpush.bf16.msk.msrb.mxu0 %vm5811_vm10, %v7629_v61  ;;  %vm5859_vm7 = vmpackc.low %vm986_vm3, %vm978_vm2  ;;  %vm959_vm10 = vcmp.lt.f32.partialorder %v7899_v56, %v8046_v18  ;;  %vm943_vm2 = vcmp.lt.f32.partialorder %v7892_v54, %v8046_v18 }
 0x107   : > { %vm5813_vm12 = vmpackc.low %vm967_vm1, %vm959_vm10  ;;  %vm944_vm10 = vcmp.lt.f32.partialorder %v7892_v54, %v8083_v6 }
 0x108   : > { %5844 = vmatpush.bf16.msk.msrb.mxu2 %vm5843_vm8, %v7629_v61  ;;  %vm5829_vm3 = vmpackc.low %vm968_vm0, %vm960_vm6  ;;  %vm961_vm8 = vcmp.lt.f32.partialorder %v7899_v56, %v8126_v62  ;;  %vm945_vm6 = vcmp.lt.f32.partialorder %v7892_v54, %v8126_v62 }
 0x109   : > { %5860 = vmatpush.bf16.msk.msrb.mxu3 %vm5859_vm7, %v7629_v61  ;;  %5830 = vmatpush.bf16.msk.msrb.mxu1 %vm5829_vm3, %v7629_v61  ;;  %vm5845_vm1 = vmpackc.low %vm969_vm4, %vm961_vm8  ;;  %vm962_vm7 = vcmp.lt.f32.partialorder %v7899_v56, %v8154_v63  ;;  %vm952_vm3 = vcmp.lt.f32.partialorder %v7885_v52, %v8083_v6  ;;  %vm946_vm8 = vcmp.lt.f32.partialorder %v7892_v54, %v8154_v63  ;;  %v8670_v54 = vpop.permute.xlu0 %1532  ;;  %v14763_v56 = vmov 0 }
 0x10a   : > { %5814 = vmatpush.bf16.msk.msrb.mxu0 %vm5813_vm12, %v7629_v61  ;;  %vm5861_vm0 = vmpackc.low %vm970_vm15, %vm962_vm7  ;;  %vm951_vm12 = vcmp.lt.f32.partialorder %v7885_v52, %v8046_v18  ;;  %vm953_vm15 = vcmp.lt.f32.partialorder %v7885_v52, %v8126_v62 }
 0x10b   : > { %vm5815_vm4 = vmpackc.low %vm951_vm12, %vm943_vm2  ;;  %vm954_vm2 = vcmp.lt.f32.partialorder %v7885_v52, %v8154_v63 }
 0x10c   : > { %5846 = vmatpush.bf16.msk.msrb.mxu2 %vm5845_vm1, %v7629_v61  ;;  %vm5831_vm14 = vmpackc.low %vm952_vm3, %vm944_vm10  ;;  %vm935_vm1 = vcmp.lt.f32.partialorder %v7889_v53, %v8046_v18  ;;  %vm927_vm10 = vcmp.lt.f32.partialorder %v7874_v48, %v8046_v18 }
 0x10d   : > { %5862 = vmatpush.bf16.msk.msrb.mxu3 %vm5861_vm0, %v7629_v61  ;;  %5832 = vmatpush.bf16.msk.msrb.mxu1 %vm5831_vm14, %v7629_v61  ;;  %vm5847_vm7 = vmpackc.low %vm953_vm15, %vm945_vm6  ;;  %vm936_vm0 = vcmp.lt.f32.partialorder %v7889_v53, %v8083_v6  ;;  %vm928_vm14 = vcmp.lt.f32.partialorder %v7874_v48, %v8083_v6  ;;  %vm938_vm6 = vcmp.lt.f32.partialorder %v7889_v53, %v8154_v63 }
 0x10e   : > { %5816 = vmatpush.bf16.msk.msrb.mxu0 %vm5815_vm4, %v7629_v61  ;;  %vm5863_vm12 = vmpackc.low %vm954_vm2, %vm946_vm8  ;;  %vm937_vm4 = vcmp.lt.f32.partialorder %v7889_v53, %v8126_v62  ;;  %vm929_vm15 = vcmp.lt.f32.partialorder %v7874_v48, %v8126_v62  ;;  %vm483_vm2 = vcmp.lt.f32.partialorder %v7837_v42, %v7822_v37  ;;  %v8668_v53 = vpop.permute.xlu1 %1544 }
 0x10f   : > { %vm5817_vm3 = vmpackc.low %vm935_vm1, %vm927_vm10  ;;  %vm930_vm1 = vcmp.lt.f32.partialorder %v7874_v48, %v8154_v63  ;;  %vm475_vm10 = vcmp.lt.f32.partialorder %v7800_v29, %v7822_v37  ;;  %v14910_v48 = vmov 0 }
 0x110   : > { %5848 = vmatpush.bf16.msk.msrb.mxu2 %vm5847_vm7, %v7629_v61  ;;  %vm5833_vm8 = vmpackc.low %vm936_vm0, %vm928_vm14  ;;  %vm484_vm0 = vcmp.lt.f32.partialorder %v7837_v42, %v7825_v38 }
 0x111   : > { %5864 = vmatpush.bf16.msk.msrb.mxu3 %vm5863_vm12, %v7629_v61  ;;  %5834 = vmatpush.bf16.msk.msrb.mxu1 %vm5833_vm8, %v7629_v61  ;;  %vm5849_vm7 = vmpackc.low %vm937_vm4, %vm929_vm15  ;;  %vm485_vm4 = vcmp.lt.f32.partialorder %v7837_v42, %v7830_v40  ;;  %vm486_vm8 = vcmp.lt.f32.partialorder %v7837_v42, %v7835_v41  ;;  %vm14724_vm15 = vnez %v14685_v2  ;;  %v8798_v35 = vpop.permute.xlu0 %1552 }
 0x112   : > { %5818 = vmatpush.bf16.msk.msrb.mxu0 %vm5817_vm3, %v7629_v61  ;;  %vm5865_vm12 = vmpackc.low %vm938_vm6, %vm930_vm1  ;;  %vm14721_vm3 = vnez %v14679_v17  ;;  %vm476_vm6 = vcmp.lt.f32.partialorder %v7800_v29, %v7825_v38  ;;  %vm477_vm1 = vcmp.lt.f32.partialorder %v7800_v29, %v7830_v40  ;;  %v14782_v17 = vmov 0 }
 0x113   : > { %vm8500_vm14 = vmpackc.low %vm483_vm2, %vm475_vm10  ;;  %vm459_vm2 = vcmp.lt.f32.partialorder %v7814_v34, %v7822_v37  ;;  %vm14727_vm10 = vnez %v14691_v22  ;;  %v14734_v22 = vmov 0 }
 0x114   : > { %5850 = vmatpush.bf16.msk.msrb.mxu2 %vm5849_vm7, %v7629_v61  ;;  %vm8511_vm7 = vmpackc.low %vm484_vm0, %vm476_vm6  ;;  %vm478_vm0 = vcmp.lt.f32.partialorder %v7800_v29, %v7835_v41  ;;  %vm460_vm6 = vcmp.lt.f32.partialorder %v7814_v34, %v7825_v38 }
 0x115   : > { %5866 = vmatpush.bf16.msk.msrb.mxu3 %vm5865_vm12, %v7629_v61  ;;  %5836 = vmatpush.bf16.msk.msrb.mxu1 %vm14724_vm15, %v7629_v61  ;;  %v14726_v10 = vsel %vm8511_vm7, 4294967295, %v14725_v10  ;;  %vm467_vm12 = vcmp.lt.f32.partialorder %v7809_v33, %v7822_v37  ;;  %vm468_vm15 = vcmp.lt.f32.partialorder %v7809_v33, %v7825_v38  ;;  %vm14730_vm7 = vnez %v14697_v39  ;;  %vm8537_vm5 = vmpackc.low %vm486_vm8, %vm478_vm0 }
 0x116   : > { %5820 = vmatpush.bf16.msk.msrb.mxu0 %vm14721_vm3, %v7629_v61  ;;  %vm8524_vm3 = vmpackc.low %vm485_vm4, %vm477_vm1  ;;  %vm461_vm4 = vcmp.lt.f32.partialorder %v7814_v34, %v7830_v40  ;;  %vm469_vm1 = vcmp.lt.f32.partialorder %v7809_v33, %v7830_v40  ;;  %vm462_vm8 = vcmp.lt.f32.partialorder %v7814_v34, %v7835_v41  ;;  %v8796_v2 = vpop.permute.xlu1 %1556  ;;  %v14789_v39 = vmov 0 }
 0x117   : > { %v14729_v12 = vsel %vm8524_vm3, 4294967295, %v14728_v12  ;;  %vm8551_vm3 = vmpackc.low %vm467_vm12, %vm459_vm2  ;;  %vm443_vm2 = vcmp.lt.f32.partialorder %v7802_v30, %v7822_v37  ;;  %vm14738_vm12 = vnez %v14705_v49  ;;  %v8824_v49 = vpop.permute.xlu2 %1548 }
 0x118   : > { %5852 = vmatpush.bf16.msk.msrb.mxu2 %vm14727_vm10, %v7629_v61  ;;  %vm14733_vm10 = vnez %v14701_v23  ;;  %v14735_v22 = vsel %vm8551_vm3, 4294967295, %v14734_v22  ;;  %vm8562_vm0 = vmpackc.low %vm468_vm15, %vm460_vm6  ;;  %vm444_vm3 = vcmp.lt.f32.partialorder %v7802_v30, %v7825_v38  ;;  %vm451_vm15 = vcmp.lt.f32.partialorder %v7793_v26, %v7822_v37  ;;  %v14791_v23 = vld [vmem:[#allocation3_spill] sm:$0xff] }
 0x119   : > { %5868 = vmatpush.bf16.msk.msrb.mxu3 %vm14730_vm7, %v7629_v61  ;;  %vm470_vm7 = vcmp.lt.f32.partialorder %v7809_v33, %v7835_v41  ;;  %5838 = vmatpush.bf16.msk.msrb.mxu1 %vm8319_vm9, %v7629_v61  ;;  %vm14741_vm9 = vnez %v14707_v11  ;;  %v14793_v11 = vmov 0 }
 0x11a   : > { %5822 = vmatpush.bf16.msk.msrb.mxu0 %vm14733_vm10, %v7629_v61  ;;  %vm8571_vm10 = vmpackc.low %vm469_vm1, %vm461_vm4  ;;  %vm445_vm4 = vcmp.lt.f32.partialorder %v7802_v30, %v7830_v40 }
 0x11b   : > { %vm8581_vm6 = vmpackc.low %vm470_vm7, %vm462_vm8  ;;  %vm452_vm8 = vcmp.lt.f32.partialorder %v7793_v26, %v7825_v38  ;;  %vm446_vm7 = vcmp.lt.f32.partialorder %v7802_v30, %v7835_v41 }
 0x11c   : > { %5854 = vmatpush.bf16.msk.msrb.mxu2 %vm14738_vm12, %v7629_v61  ;;  %vm8592_vm1 = vmpackc.low %vm451_vm15, %vm443_vm2  ;;  %vm435_vm2 = vcmp.lt.f32.partialorder %v7804_v31, %v7822_v37 }
 0x11d   : > { %5870 = vmatpush.bf16.msk.msrb.mxu3 %vm14741_vm9, %v7629_v61  ;;  %5840 = vmatpush.bf16.msk.msrb.mxu1 %vm8367_vm13, %v7629_v61  ;;  %vm8606_vm12 = vmpackc.low %vm452_vm8, %vm444_vm3  ;;  %vm14748_vm9 = vnez %v14715_v32  ;;  %vm14749_vm13 = vnez %v14726_v10  ;;  %vm436_vm3 = vcmp.lt.f32.partialorder %v7804_v31, %v7825_v38  ;;  %vm14752_vm8 = vnez %v14719_v43 }
 0x11e   : > { %5824 = vmatpush.bf16.msk.msrb.mxu0 %vm8354_vm11, %v7629_v61  ;;  %v14747_v47 = vsel %vm8606_vm12, 4294967295, %v14746_v47  ;;  %vm453_vm11 = vcmp.lt.f32.partialorder %v7793_v26, %v7830_v40  ;;  %v14805_v10 = vmov 0  ;;  %v14941_v32 = vmov 0 }
 0x11f   : > { %vm8620_vm15 = vmpackc.low %vm453_vm11, %vm445_vm4  ;;  %vm427_vm4 = vcmp.lt.f32.partialorder %v7778_v21, %v7822_v37  ;;  %vm437_vm11 = vcmp.lt.f32.partialorder %v7804_v31, %v7830_v40  ;;  %v8956_v46 = vpop.permute.xlu2 %1560 }
 0x120   : > { %5856 = vmatpush.bf16.msk.msrb.mxu2 %vm14748_vm9, %v7629_v61  ;;  %vm14753_vm9 = vnez %v14729_v12  ;;  %1396 = vmatmul.bf16.vlgmr.msrb.gmra.mxu1 %v7631_v44  ;;  %v9330_v12 = vld [vmem:[%s7682_s23 + $0x78] sm:$0xff] }
 0x121   : > { %5890 = vmatpush.bf16.msk.msra.mxu1 %vm14749_vm13, %v7629_v61  ;;  %5872 = vmatpush.bf16.msk.msrb.mxu3 %vm14752_vm8, %v7629_v61  ;;  %vm8645_vm13 = vmpackc.low %vm435_vm2, %vm427_vm4  ;;  %vm14758_vm8 = vnez %v14735_v22  ;;  %vm411_vm2 = vcmp.lt.f32.partialorder %v7797_v28, %v7822_v37  ;;  %vm420_vm4 = vcmp.lt.f32.partialorder %v7795_v27, %v7825_v38  ;;  %v8934_v22 = vpop.permute.xlu0 %1564 }
 0x122   : > { %5874 = vmatpush.bf16.msk.msra.mxu0 %vm8500_vm14, %v7629_v61  ;;  %vm454_vm14 = vcmp.lt.f32.partialorder %v7793_v26, %v7835_v41 }
 0x123   : > { %vm8634_vm12 = vmpackc.low %vm454_vm14, %vm446_vm7  ;;  %vm428_vm7 = vcmp.lt.f32.partialorder %v7778_v21, %v7825_v38  ;;  %vm438_vm14 = vcmp.lt.f32.partialorder %v7804_v31, %v7835_v41  ;;  %1383 = vmatmul.bf16.vlgmr.msrb.gmra.mxu0 %v7631_v44  ;;  %1409 = vmatmul.bf16.vlgmr.msrb.gmra.mxu2 %v7631_v44 }
 0x124   : > { %5906 = vmatpush.bf16.msk.msra.mxu2 %vm14753_vm9, %v7629_v61  ;;  %vm8657_vm9 = vmpackc.low %vm436_vm3, %vm428_vm7  ;;  %vm430_vm7 = vcmp.lt.f32.partialorder %v7778_v21, %v7835_v41  ;;  %1422 = vmatmul.bf16.vlgmr.msrb.gmra.mxu3 %v7631_v44 }
 0x125   : > { %5922 = vmatpush.bf16.msk.msra.mxu3 %vm8537_vm5, %v7629_v61  ;;  %vm429_vm5 = vcmp.lt.f32.partialorder %v7778_v21, %v7830_v40  ;;  %5892 = vmatpush.bf16.msk.msra.mxu1 %vm8562_vm0, %v7629_v61  ;;  %vm8695_vm0 = vmpackc.low %vm438_vm14, %vm430_vm7  ;;  %vm414_vm7 = vcmp.lt.f32.partialorder %v7797_v28, %v7835_v41 }
 0x126   : > { %5876 = vmatpush.bf16.msk.msra.mxu0 %vm14758_vm8, %v7629_v61  ;;  %vm8678_vm3 = vmpackc.low %vm437_vm11, %vm429_vm5  ;;  %vm412_vm8 = vcmp.lt.f32.partialorder %v7797_v28, %v7825_v38  ;;  %v14764_v56 = vsel %vm8695_vm0, 4294967295, %v14763_v56  ;;  %vm413_vm11 = vcmp.lt.f32.partialorder %v7797_v28, %v7830_v40  ;;  %vm421_vm5 = vcmp.lt.f32.partialorder %v7795_v27, %v7830_v40 }
 0x127   : > { %v14762_v55 = vsel %vm8678_vm3, 4294967295, %v14761_v55  ;;  %vm422_vm0 = vcmp.lt.f32.partialorder %v7795_v27, %v7835_v41  ;;  %vm8737_vm3 = vmpackc.low %vm421_vm5, %vm413_vm11  ;;  %vm397_vm11 = vcmp.lt.f32.partialorder %v7768_v19, %v7830_v40  ;;  %vm405_vm5 = vcmp.lt.f32.partialorder %v7773_v20, %v7830_v40 }
 0x128   : > { %5908 = vmatpush.bf16.msk.msra.mxu2 %vm8571_vm10, %v7629_v61  ;;  %vm14765_vm10 = vcmp.lt.f32.partialorder %v7795_v27, %v7822_v37 }
 0x129   : > { %5924 = vmatpush.bf16.msk.msra.mxu3 %vm8581_vm6, %v7629_v61  ;;  %vm8715_vm14 = vmpackc.low %vm14765_vm10, %vm411_vm2  ;;  %vm395_vm2 = vcmp.lt.f32.partialorder %v7768_v19, %v7822_v37  ;;  %vm403_vm10 = vcmp.lt.f32.partialorder %v7773_v20, %v7822_v37  ;;  %v9058_v52 = vpop.permute.xlu0 %1576 }
 0x12a   : > { %v14767_v58 = vsel %vm8715_vm14, 4294967295, %v14766_v58  ;;  %5878 = vmatpush.bf16.msk.msra.mxu0 %vm8592_vm1, %v7629_v61  ;;  %vm8726_vm6 = vmpackc.low %vm420_vm4, %vm412_vm8  ;;  %vm14770_vm14 = vnez %v14747_v47  ;;  %vm396_vm1 = vcmp.lt.f32.partialorder %v7768_v19, %v7825_v38  ;;  %vm404_vm4 = vcmp.lt.f32.partialorder %v7773_v20, %v7825_v38  ;;  %v9434_v47 = vld [vmem:[%s7682_s23 + $0x58] sm:$0xff] }
 0x12b   : > { %5894 = vmatpush.bf16.msk.msra.mxu1 %vm14770_vm14, %v7629_v61  ;;  %vm8748_vm8 = vmpackc.low %vm422_vm0, %vm414_vm7  ;;  %vm406_vm0 = vcmp.lt.f32.partialorder %v7773_v20, %v7835_v41 }
 0x12c   : > { %5910 = vmatpush.bf16.msk.msra.mxu2 %vm8620_vm15, %v7629_v61  ;;  %vm8759_vm14 = vmpackc.low %vm403_vm10, %vm395_vm2  ;;  %vm398_vm15 = vcmp.lt.f32.partialorder %v7768_v19, %v7835_v41  ;;  %vm388_vm10 = vcmp.lt.f32.partialorder %v7787_v24, %v7825_v38 }
 0x12d   : > { %5926 = vmatpush.bf16.msk.msra.mxu3 %vm8634_vm12, %v7629_v61  ;;  %vm8770_vm7 = vmpackc.low %vm404_vm4, %vm396_vm1  ;;  %vm387_vm12 = vcmp.lt.f32.partialorder %v7787_v24, %v7822_v37  ;;  %vm379_vm4 = vcmp.lt.f32.partialorder %v14784_v1, %v7822_v37 }
 0x12e   : > { %5880 = vmatpush.bf16.msk.msra.mxu0 %vm8645_vm13, %v7629_v61  ;;  %vm8779_vm2 = vmpackc.low %vm405_vm5, %vm397_vm11  ;;  %vm14781_vm13 = vnez %v14762_v55  ;;  %vm14785_vm11 = vnez %v14764_v56  ;;  %v14968_v55 = vmov 0  ;;  %v15019_v56 = vmov 0 }
 0x12f   : > { %5896 = vmatpush.bf16.msk.msra.mxu1 %vm8657_vm9, %v7629_v61  ;;  %vm8788_vm1 = vmpackc.low %vm406_vm0, %vm398_vm15  ;;  %vm389_vm9 = vcmp.lt.f32.partialorder %v7787_v24, %v7830_v40  ;;  %vm380_vm15 = vcmp.lt.f32.partialorder %v14784_v1, %v7825_v38  ;;  %vm390_vm0 = vcmp.lt.f32.partialorder %v7787_v24, %v7835_v41 }
 0x130   : > { %5912 = vmatpush.bf16.msk.msra.mxu2 %vm14781_vm13, %v7629_v61  ;;  %v14783_v17 = vsel %vm8788_vm1, 4294967295, %v14782_v17  ;;  %vm8803_vm5 = vmpackc.low %vm387_vm12, %vm379_vm4  ;;  %vm14788_vm13 = vnez %v14767_v58  ;;  %vm381_vm12 = vcmp.lt.f32.partialorder %v14784_v1, %v7830_v40  ;;  %vm363_vm4 = vcmp.lt.f32.partialorder %v14791_v23, %v7822_v37  ;;  %v9093_v58 = vpop.permute.xlu2 %1572 }
 0x131   : > { %5928 = vmatpush.bf16.msk.msra.mxu3 %vm14785_vm11, %v7629_v61  ;;  %v14787_v0 = vsel %vm8803_vm5, 4294967295, %v14786_v0  ;;  %vm8814_vm1 = vmpackc.low %vm388_vm10, %vm380_vm15  ;;  %vm371_vm11 = vcmp.lt.f32.partialorder %v14792_v4, %v7822_v37  ;;  %vm382_vm10 = vcmp.lt.f32.partialorder %v14784_v1, %v7835_v41  ;;  %vm364_vm15 = vcmp.lt.f32.partialorder %v14791_v23, %v7825_v38 }
 0x132   : > { %5882 = vmatpush.bf16.msk.msra.mxu0 %vm14788_vm13, %v7629_v61  ;;  %v14790_v39 = vsel %vm8814_vm1, 4294967295, %v14789_v39  ;;  %vm8829_vm13 = vmpackc.low %vm389_vm9, %vm381_vm12  ;;  %vm372_vm1 = vcmp.lt.f32.partialorder %v14792_v4, %v7825_v38  ;;  %vm373_vm9 = vcmp.lt.f32.partialorder %v14792_v4, %v7830_v40  ;;  %vm487_vm12 = vcmp.lt.f32.partialorder %v7837_v42, %v8046_v18 }
 0x133   : > { %5898 = vmatpush.bf16.msk.msra.mxu1 %vm8726_vm6, %v7629_v61  ;;  %v14794_v11 = vsel %vm8829_vm13, 4294967295, %v14793_v11  ;;  %vm8842_vm5 = vmpackc.low %vm390_vm0, %vm382_vm10  ;;  %vm365_vm6 = vcmp.lt.f32.partialorder %v14791_v23, %v7830_v40  ;;  %vm374_vm0 = vcmp.lt.f32.partialorder %v14792_v4, %v7835_v41  ;;  %vm488_vm10 = vcmp.lt.f32.partialorder %v7837_v42, %v8083_v6 }
 0x134   : > { %5914 = vmatpush.bf16.msk.msra.mxu2 %vm8737_vm3, %v7629_v61  ;;  %v14796_v25 = vsel %vm8842_vm5, 4294967295, %v14795_v25  ;;  %vm8855_vm13 = vmpackc.low %vm371_vm11, %vm363_vm4  ;;  %vm366_vm3 = vcmp.lt.f32.partialorder %v14791_v23, %v7835_v41  ;;  %vm489_vm4 = vcmp.lt.f32.partialorder %v7837_v42, %v8126_v62 }
 0x135   : > { %5930 = vmatpush.bf16.msk.msra.mxu3 %vm8748_vm8, %v7629_v61  ;;  %v14798_v9 = vsel %vm8855_vm13, 4294967295, %v14797_v9  ;;  %vm8868_vm5 = vmpackc.low %vm372_vm1, %vm364_vm15  ;;  %vm479_vm8 = vcmp.lt.f32.partialorder %v7800_v29, %v8046_v18  ;;  %vm490_vm1 = vcmp.lt.f32.partialorder %v7837_v42, %v8154_v63  ;;  %v14810_v42 = vmov 0 }
 0x136   : > { %5884 = vmatpush.bf16.msk.msra.mxu0 %vm8759_vm14, %v7629_v61  ;;  %vm8879_vm11 = vmpackc.low %vm373_vm9, %vm365_vm6  ;;  %vm480_vm14 = vcmp.lt.f32.partialorder %v7800_v29, %v8083_v6  ;;  %vm481_vm6 = vcmp.lt.f32.partialorder %v7800_v29, %v8126_v62  ;;  %vm463_vm9 = vcmp.lt.f32.partialorder %v7814_v34, %v8046_v18 }
 0x137   : > { %5900 = vmatpush.bf16.msk.msra.mxu1 %vm8770_vm7, %v7629_v61  ;;  %vm8883_vm13 = vmpackc.low %vm487_vm12, %vm479_vm8  ;;  %vm471_vm12 = vcmp.lt.f32.partialorder %v7809_v33, %v8046_v18  ;;  %vm472_vm8 = vcmp.lt.f32.partialorder %v7809_v33, %v8083_v6 }
 0x138   : > { %5916 = vmatpush.bf16.msk.msra.mxu2 %vm8779_vm2, %v7629_v61  ;;  %vm8894_vm15 = vmpackc.low %vm374_vm0, %vm366_vm3  ;;  %vm14809_vm2 = vnez %v14783_v17  ;;  %vm482_vm0 = vcmp.lt.f32.partialorder %v7800_v29, %v8154_v63  ;;  %v8932_v29 = vpop.permute.xlu1 %1568  ;;  %v9594_v17 = vld [vmem:[%s7682_s23 + $0x30] sm:$0xff] }
 0x139   : > { %v14806_v10 = vsel %vm8894_vm15, 4294967295, %v14805_v10  ;;  %vm8898_vm7 = vmpackc.low %vm488_vm10, %vm480_vm14  ;;  %5932 = vmatpush.bf16.msk.msra.mxu3 %vm14809_vm2, %v7629_v61  ;;  %vm464_vm10 = vcmp.lt.f32.partialorder %v7814_v34, %v8083_v6  ;;  %vm14812_vm14 = vnez %v14787_v0  ;;  %vm14815_vm2 = vnez %v14790_v39  ;;  %v9211_v0 = vpop.permute.xlu0 %1588 }
 0x13a   : > { %vm8911_vm3 = vmpackc.low %vm489_vm4, %vm481_vm6  ;;  %5886 = vmatpush.bf16.msk.msra.mxu0 %vm14812_vm14, %v7629_v61  ;;  %vm465_vm4 = vcmp.lt.f32.partialorder %v7814_v34, %v8126_v62  ;;  %vm473_vm6 = vcmp.lt.f32.partialorder %v7809_v33, %v8126_v62  ;;  %vm14818_vm14 = vnez %v14794_v11  ;;  %v9226_v11 = vld [vmem:[%s7682_s23 + $0x70] sm:$0xff]  ;;  %v14939_v39 = vmov 0 }
 0x13b   : > { %v14811_v42 = vsel %vm8911_vm3, 4294967295, %v14810_v42  ;;  %vm8924_vm15 = vmpackc.low %vm490_vm1, %vm482_vm0  ;;  %5902 = vmatpush.bf16.msk.msra.mxu1 %vm14815_vm2, %v7629_v61  ;;  %vm466_vm1 = vcmp.lt.f32.partialorder %v7814_v34, %v8154_v63  ;;  %vm474_vm0 = vcmp.lt.f32.partialorder %v7809_v33, %v8154_v63  ;;  %v14903_v33 = vmov 0 }
 0x13c   : > { %v14814_v13 = vsel %vm8924_vm15, 4294967295, %v14813_v13  ;;  %vm8939_vm3 = vmpackc.low %vm471_vm12, %vm463_vm9  ;;  %5918 = vmatpush.bf16.msk.msra.mxu2 %vm14818_vm14, %v7629_v61  ;;  %vm447_vm9 = vcmp.lt.f32.partialorder %v7802_v30, %v8046_v18  ;;  %vm14821_vm12 = vnez %v14796_v25  ;;  %vm448_vm14 = vcmp.lt.f32.partialorder %v7802_v30, %v8083_v6  ;;  %v9612_v25 = vld [vmem:[%s7682_s23 + $0x50] sm:$0xff] }
 0x13d   : > { %vm8950_vm15 = vmpackc.low %vm472_vm8, %vm464_vm10  ;;  %5934 = vmatpush.bf16.msk.msra.mxu3 %vm14821_vm12, %v7629_v61  ;;  %vm14824_vm10 = vnez %v14798_v9  ;;  %v9247_v9 = vpop.permute.xlu2 %1584 }
 0x13e   : > { %v14820_v45 = vsel %vm8950_vm15, 4294967295, %v14819_v45  ;;  %vm8961_vm2 = vmpackc.low %vm473_vm6, %vm465_vm4  ;;  %5888 = vmatpush.bf16.msk.msra.mxu0 %vm14824_vm10, %v7629_v61  ;;  %vm455_vm15 = vcmp.lt.f32.partialorder %v7793_v26, %v8046_v18  ;;  %vm449_vm4 = vcmp.lt.f32.partialorder %v7802_v30, %v8126_v62  ;;  %vm14835_vm10 = vnez %v14814_v13 }
 0x13f   : > { %vm8970_vm8 = vmpackc.low %vm474_vm0, %vm466_vm1  ;;  %5904 = vmatpush.bf16.msk.msra.mxu1 %vm8868_vm5, %v7629_v61  ;;  %vm456_vm1 = vcmp.lt.f32.partialorder %v7793_v26, %v8083_v6  ;;  %vm450_vm0 = vcmp.lt.f32.partialorder %v7802_v30, %v8154_v63  ;;  %v14893_v13 = vmov 0  ;;  %v14907_v30 = vmov 0 }
 0x140   : > { %vm8984_vm6 = vmpackc.low %vm455_vm15, %vm447_vm9  ;;  %5920 = vmatpush.bf16.msk.msra.mxu2 %vm8879_vm11, %v7629_v61  ;;  %vm439_vm15 = vcmp.lt.f32.partialorder %v7804_v31, %v8046_v18  ;;  %vm14831_vm9 = vnez %v14806_v10  ;;  %vm14832_vm11 = vnez %v14811_v42  ;;  %v9056_v51 = vpop.permute.xlu1 %1580  ;;  %v14885_v10 = vmov 0 }
 0x141   : > { %vm8998_vm5 = vmpackc.low %vm456_vm1, %vm448_vm14  ;;  %5936 = vmatpush.bf16.msk.msra.mxu3 %vm14831_vm9, %v7629_v61  ;;  %vm440_vm14 = vcmp.lt.f32.partialorder %v7804_v31, %v8083_v6  ;;  %1435 = vmatmul.bf16.vlgmr.msra.gmra.mxu0 %v7631_v44  ;;  %v14889_v42 = vmov 0 }
 0x142   : > { %5938 = vmatpush.bf16.msk.msrb.mxu0 %vm8883_vm13, %v7629_v61  ;;  %vm457_vm13 = vcmp.lt.f32.partialorder %v7793_v26, %v8126_v62  ;;  %1448 = vmatmul.bf16.vlgmr.msra.gmra.mxu1 %v7631_v44 }
 0x143   : > { %5954 = vmatpush.bf16.msk.msrb.mxu1 %vm8898_vm7, %v7629_v61  ;;  %vm9012_vm12 = vmpackc.low %vm457_vm13, %vm449_vm4  ;;  %vm458_vm7 = vcmp.lt.f32.partialorder %v7793_v26, %v8154_v63  ;;  %vm431_vm4 = vcmp.lt.f32.partialorder %v7778_v21, %v8046_v18  ;;  %vm441_vm13 = vcmp.lt.f32.partialorder %v7804_v31, %v8126_v62  ;;  %1461 = vmatmul.bf16.vlgmr.msra.gmra.mxu2 %v7631_v44  ;;  %v14961_v26 = vmov 0 }
 0x144   : > { %5970 = vmatpush.bf16.msk.msrb.mxu2 %vm14832_vm11, %v7629_v61  ;;  %vm9024_vm1 = vmpackc.low %vm458_vm7, %vm450_vm0  ;;  %vm432_vm0 = vcmp.lt.f32.partialorder %v7778_v21, %v8083_v6  ;;  %vm442_vm11 = vcmp.lt.f32.partialorder %v7804_v31, %v8154_v63  ;;  %1474 = vmatmul.bf16.vlgmr.msra.gmra.mxu3 %v7631_v44 }
 0x145   : > { %5986 = vmatpush.bf16.msk.msrb.mxu3 %vm14835_vm10, %v7629_v61  ;;  %vm9034_vm9 = vmpackc.low %vm439_vm15, %vm431_vm4  ;;  %vm433_vm15 = vcmp.lt.f32.partialorder %v7778_v21, %v8126_v62  ;;  %vm415_vm10 = vcmp.lt.f32.partialorder %v7797_v28, %v8046_v18  ;;  %vm416_vm4 = vcmp.lt.f32.partialorder %v7797_v28, %v8083_v6  ;;  %v9403_v34 = vpop.permute.xlu2 %2156 }
 0x146   : > { %5940 = vmatpush.bf16.msk.msrb.mxu0 %vm8939_vm3, %v7629_v61  ;;  %vm9046_vm7 = vmpackc.low %vm440_vm14, %vm432_vm0  ;;  %vm14842_vm3 = vnez %v14820_v45  ;;  %vm434_vm0 = vcmp.lt.f32.partialorder %v7778_v21, %v8154_v63  ;;  %v7632_v21 = vmov 5   ;;  %v14955_v45 = vmov 0 }
 0x147   : > { %5956 = vmatpush.bf16.msk.msrb.mxu1 %vm14842_vm3, %v7629_v61  ;;  %vm9069_vm14 = vmpackc.low %vm441_vm13, %vm433_vm15  ;;  %vm424_vm3 = vcmp.lt.f32.partialorder %v7795_v27, %v8083_v6  ;;  %vm417_vm13 = vcmp.lt.f32.partialorder %v7797_v28, %v8126_v62  ;;  %7575 = vset.pattern.permute.xlu1 %v7632_v21  ;;  %vm426_vm15 = vcmp.lt.f32.partialorder %v7795_v27, %v8154_v63 }
 0x148   : > { %5972 = vmatpush.bf16.msk.msrb.mxu2 %vm8961_vm2, %v7629_v61  ;;  %vm9085_vm2 = vmpackc.low %vm442_vm11, %vm434_vm0  ;;  %3408 = vperm.xlu1 %7575, %v9110_v59   ;;  %vm407_vm0 = vcmp.lt.f32.partialorder %v7773_v20, %v8046_v18 }
 0x149   : > { %5988 = vmatpush.bf16.msk.msrb.mxu3 %vm8970_vm8, %v7629_v61  ;;  %vm14847_vm8 = vcmp.lt.f32.partialorder %v7795_v27, %v8046_v18  ;;  %7574 = vset.pattern.permute.xlu0 %v7632_v21 }
 0x14a   : > { %vm9101_vm11 = vmpackc.low %vm14847_vm8, %vm415_vm10  ;;  %5942 = vmatpush.bf16.msk.msrb.mxu0 %vm8984_vm6, %v7629_v61  ;;  %vm399_vm8 = vcmp.lt.f32.partialorder %v7768_v19, %v8046_v18  ;;  %vm14852_vm6 = vcmp.lt.f32.partialorder %v7795_v27, %v8126_v62  ;;  %3404 = vperm.xlu0 %7574, %v7587_v8   ;;  %v15128_v27 = vmov 0 }
 0x14b   : > { %vm9119_vm10 = vmpackc.low %vm424_vm3, %vm416_vm4  ;;  %5958 = vmatpush.bf16.msk.msrb.mxu1 %vm8998_vm5, %v7629_v61  ;;  %vm400_vm3 = vcmp.lt.f32.partialorder %v7768_v19, %v8083_v6  ;;  %vm408_vm5 = vcmp.lt.f32.partialorder %v7773_v20, %v8083_v6  ;;  %7576 = vset.pattern.permute.xlu2 %v7632_v21 }
 0x14c   : > { %v14851_v60 = vsel %vm9119_vm10, 4294967295, %v14850_v60  ;;  %5974 = vmatpush.bf16.msk.msrb.mxu2 %vm9012_vm12, %v7629_v61  ;;  %vm9139_vm4 = vmpackc.low %vm14852_vm6, %vm417_vm13  ;;  %vm14855_vm12 = vcmp.lt.f32.partialorder %v7797_v28, %v8154_v63  ;;  %vm401_vm13 = vcmp.lt.f32.partialorder %v7768_v19, %v8126_v62  ;;  %vm409_vm6 = vcmp.lt.f32.partialorder %v7773_v20, %v8126_v62  ;;  %3412 = vperm.xlu2 %7576, %v9180_v3   ;;  %v9576_v28 = vld [vmem:[%s7682_s23 + $0x40] sm:$0xff] }
 0x14d   : > { %v14854_v5 = vsel %vm9139_vm4, 4294967295, %v14853_v5  ;;  %5990 = vmatpush.bf16.msk.msrb.mxu3 %vm9024_vm1, %v7629_v61  ;;  %vm9153_vm10 = vmpackc.low %vm426_vm15, %vm14855_vm12  ;;  %vm402_vm1 = vcmp.lt.f32.partialorder %v7768_v19, %v8154_v63  ;;  %vm410_vm15 = vcmp.lt.f32.partialorder %v7773_v20, %v8154_v63  ;;  %v9209_v19 = vpop.permute.xlu1 %1592  ;;  %v9849_v20 = vld [vmem:[%s7682_s23 + $0x18] sm:$0xff] }
 0x14e   : > { %vm9162_vm4 = vmpackc.low %vm407_vm0, %vm399_vm8  ;;  %5944 = vmatpush.bf16.msk.msrb.mxu0 %vm9034_vm9, %v7629_v61  ;;  %vm391_vm0 = vcmp.lt.f32.partialorder %v7787_v24, %v8046_v18  ;;  %vm392_vm8 = vcmp.lt.f32.partialorder %v7787_v24, %v8083_v6 }
 0x14f   : > { %vm9173_vm12 = vmpackc.low %vm408_vm5, %vm400_vm3  ;;  %5960 = vmatpush.bf16.msk.msrb.mxu1 %vm9046_vm7, %v7629_v61  ;;  %vm383_vm7 = vcmp.lt.f32.partialorder %v14784_v1, %v8046_v18 }
 0x150   : > { %5976 = vmatpush.bf16.msk.msrb.mxu2 %vm9069_vm14, %v7629_v61  ;;  %vm9192_vm9 = vmpackc.low %vm409_vm6, %vm401_vm13  ;;  %vm393_vm14 = vcmp.lt.f32.partialorder %v7787_v24, %v8126_v62  ;;  %vm385_vm13 = vcmp.lt.f32.partialorder %v14784_v1, %v8126_v62  ;;  %vm386_vm6 = vcmp.lt.f32.partialorder %v14784_v1, %v8154_v63  ;;  %3460 = vperm.xlu1 %7575, %v9226_v11  }
 0x151   : > { %5992 = vmatpush.bf16.msk.msrb.mxu3 %vm9085_vm2, %v7629_v61  ;;  %vm9201_vm3 = vmpackc.low %vm410_vm15, %vm402_vm1  ;;  %vm384_vm2 = vcmp.lt.f32.partialorder %v14784_v1, %v8083_v6  ;;  %vm377_vm1 = vcmp.lt.f32.partialorder %v14792_v4, %v8126_v62  ;;  %v14882_v1 = vmov 0 }
 0x152   : > { %vm9213_vm5 = vmpackc.low %vm391_vm0, %vm383_vm7  ;;  %5946 = vmatpush.bf16.msk.msrb.mxu0 %vm9101_vm11, %v7629_v61  ;;  %vm367_vm0 = vcmp.lt.f32.partialorder %v14791_v23, %v8046_v18  ;;  %3452 = vperm.xlu0 %7574, %v9288_v7   ;;  %vm1717_vm11 = vcmp.lt.f32.partialorder %v9209_v19, %v7830_v40 }
 0x153   : > { %vm9235_vm15 = vmpackc.low %vm392_vm8, %vm384_vm2  ;;  %vm14870_vm8 = vnez %v14851_v60  ;;  %vm14871_vm2 = vnez %v14854_v5  ;;  %v9532_v60 = vpop.permute.xlu2 %2168  ;;  %v9534_v5 = vpop.permute.xlu0 %2160 }
 0x154   : > { %5962 = vmatpush.bf16.msk.msrb.mxu1 %vm14870_vm8, %v7629_v61  ;;  %5978 = vmatpush.bf16.msk.msrb.mxu2 %vm14871_vm2, %v7629_v61  ;;  %vm9258_vm7 = vmpackc.low %vm393_vm14, %vm385_vm13  ;;  %vm14874_vm14 = vcmp.lt.f32.partialorder %v7787_v24, %v8154_v63  ;;  %v14878_v24 = vmov 0  ;;  %vm14880_vm8 = vcmp.lt.f32.partialorder %v14791_v23, %v8083_v6  ;;  %vm14881_vm2 = vcmp.lt.f32.partialorder %v14792_v4, %v8083_v6 }
 0x155   : > { %5994 = vmatpush.bf16.msk.msrb.mxu3 %vm9153_vm10, %v7629_v61  ;;  %vm9277_vm13 = vmpackc.low %vm14874_vm14, %vm386_vm6  ;;  %vm14877_vm10 = vcmp.lt.f32.partialorder %v14792_v4, %v8046_v18  ;;  %3464 = vperm.xlu2 %7576, %v9330_v12   ;;  %v9556_v8 = vpop.permute.xlu1 %2164 }
 0x156   : > { %vm9297_vm6 = vmpackc.low %vm14877_vm10, %vm367_vm0  ;;  %5948 = vmatpush.bf16.msk.msrb.mxu0 %vm9162_vm4, %v7629_v61  ;;  %vm14884_vm10 = vcmp.lt.f32.partialorder %v14791_v23, %v8126_v62  ;;  %vm1709_vm4 = vcmp.lt.f32.partialorder %v9211_v0, %v7830_v40 }
 0x157   : > { %v14879_v24 = vsel %vm9297_vm6, 4294967295, %v14878_v24  ;;  %vm9314_vm0 = vmpackc.low %vm14881_vm2, %vm14880_vm8  ;;  %vm14888_vm8 = vcmp.lt.f32.partialorder %v14792_v4, %v8154_v63  ;;  %vm1700_vm6 = vcmp.lt.f32.partialorder %v9247_v9, %v7825_v38 }
 0x158   : > { %v14883_v1 = vsel %vm9314_vm0, 4294967295, %v14882_v1  ;;  %vm9321_vm14 = vmpackc.low %vm377_vm1, %vm14884_vm10  ;;  %5964 = vmatpush.bf16.msk.msrb.mxu1 %vm9173_vm12, %v7629_v61  ;;  %5980 = vmatpush.bf16.msk.msrb.mxu2 %vm9192_vm9, %v7629_v61  ;;  %vm14887_vm1 = vcmp.lt.f32.partialorder %v14791_v23, %v8154_v63  ;;  %vm14891_vm10 = vcmp.lt.f32.partialorder %v9211_v0, %v7822_v37  ;;  %vm14892_vm12 = vcmp.lt.f32.partialorder %v9209_v19, %v7822_v37 }
 0x159   : > { %v14886_v10 = vsel %vm9321_vm14, 4294967295, %v14885_v10  ;;  %vm9345_vm2 = vmpackc.low %vm14888_vm8, %vm14887_vm1  ;;  %vm1710_vm9 = vcmp.lt.f32.partialorder %v9211_v0, %v7835_v41  ;;  %vm1718_vm0 = vcmp.lt.f32.partialorder %v9209_v19, %v7835_v41  ;;  %5996 = vmatpush.bf16.msk.msrb.mxu3 %vm9201_vm3, %v7629_v61  ;;  %vm14895_vm1 = vcmp.lt.f32.partialorder %v9211_v0, %v7825_v38  ;;  %3456 = vperm.xlu1 %7575, %v9389_v16  }
 0x15a   : > { %v14890_v42 = vsel %vm9345_vm2, 4294967295, %v14889_v42  ;;  %vm9355_vm14 = vmpackc.low %vm14892_vm12, %vm14891_vm10  ;;  %vm14896_vm8 = vcmp.lt.f32.partialorder %v9209_v19, %v7825_v38  ;;  %vm1691_vm12 = vcmp.lt.f32.partialorder %v9056_v51, %v7822_v37  ;;  %vm1692_vm3 = vcmp.lt.f32.partialorder %v9056_v51, %v7825_v38  ;;  %5950 = vmatpush.bf16.msk.msrb.mxu0 %vm9213_vm5, %v7629_v61  ;;  %3448 = vperm.xlu0 %7574, %v9434_v47  }
 0x15b   : > { %v14894_v13 = vsel %vm9355_vm14, 4294967295, %v14893_v13  ;;  %vm9372_vm10 = vmpackc.low %vm14896_vm8, %vm14895_vm1  ;;  %vm1699_vm14 = vcmp.lt.f32.partialorder %v9247_v9, %v7822_v37  ;;  %v9700_v23 = vpop.permute.xlu2 %2176  ;;  %v9702_v4 = vpop.permute.xlu0 %2180 }
 0x15c   : > { %vm9380_vm2 = vmpackc.low %vm1717_vm11, %vm1709_vm4  ;;  %vm1693_vm11 = vcmp.lt.f32.partialorder %v9056_v51, %v7830_v40  ;;  %vm1701_vm4 = vcmp.lt.f32.partialorder %v9247_v9, %v7830_v40  ;;  %5966 = vmatpush.bf16.msk.msrb.mxu1 %vm9235_vm15, %v7629_v61  ;;  %5982 = vmatpush.bf16.msk.msrb.mxu2 %vm9258_vm7, %v7629_v61  ;;  %vm1675_vm7 = vcmp.lt.f32.partialorder %v9093_v58, %v7822_v37 }
 0x15d   : > { %vm9395_vm1 = vmpackc.low %vm1718_vm0, %vm1710_vm9  ;;  %vm1694_vm0 = vcmp.lt.f32.partialorder %v9056_v51, %v7835_v41  ;;  %vm1702_vm9 = vcmp.lt.f32.partialorder %v9247_v9, %v7835_v41  ;;  %5998 = vmatpush.bf16.msk.msrb.mxu3 %vm9277_vm13, %v7629_v61  ;;  %vm1676_vm13 = vcmp.lt.f32.partialorder %v9093_v58, %v7825_v38  ;;  %3444 = vperm.xlu2 %7576, %v9612_v25  }
 0x15e   : > { %vm9411_vm5 = vmpackc.low %vm1699_vm14, %vm1691_vm12  ;;  %vm1683_vm14 = vcmp.lt.f32.partialorder %v9058_v52, %v7822_v37  ;;  %vm14909_vm12 = vnez %v14879_v24  ;;  %v14990_v24 = vmov 0 }
 0x15f   : > { %v14904_v33 = vsel %vm9411_vm5, 4294967295, %v14903_v33  ;;  %vm9425_vm15 = vmpackc.low %vm1700_vm6, %vm1692_vm3  ;;  %vm1684_vm6 = vcmp.lt.f32.partialorder %v9058_v52, %v7825_v38  ;;  %5952 = vmatpush.bf16.msk.msrb.mxu0 %vm14909_vm12, %v7629_v61  ;;  %vm14916_vm12 = vnez %v14890_v42  ;;  %v14953_v42 = vmov 0 }
 0x160   : > { %v14906_v14 = vsel %vm9425_vm15, 4294967295, %v14905_v14  ;;  %vm9437_vm8 = vmpackc.low %vm1701_vm4, %vm1693_vm11  ;;  %vm1677_vm11 = vcmp.lt.f32.partialorder %v9093_v58, %v7830_v40  ;;  %vm1685_vm4 = vcmp.lt.f32.partialorder %v9058_v52, %v7830_v40  ;;  %vm14913_vm15 = vnez %v14886_v10 }
 0x161   : > { %v14908_v30 = vsel %vm9437_vm8, 4294967295, %v14907_v30  ;;  %vm9448_vm3 = vmpackc.low %vm1702_vm9, %vm1694_vm0  ;;  %vm14912_vm8 = vnez %v14883_v1  ;;  %5984 = vmatpush.bf16.msk.msrb.mxu2 %vm14913_vm15, %v7629_v61  ;;  %vm1678_vm0 = vcmp.lt.f32.partialorder %v9093_v58, %v7835_v41  ;;  %vm1686_vm9 = vcmp.lt.f32.partialorder %v9058_v52, %v7835_v41  ;;  %6000 = vmatpush.bf16.msk.msrb.mxu3 %vm14916_vm12, %v7629_v61 }
 0x162   : > { %v14911_v48 = vsel %vm9448_vm3, 4294967295, %v14910_v48  ;;  %5968 = vmatpush.bf16.msk.msrb.mxu1 %vm14912_vm8, %v7629_v61  ;;  %vm9462_vm5 = vmpackc.low %vm1683_vm14, %vm1675_vm7  ;;  %vm14917_vm8 = vnez %v14894_v13  ;;  %vm1659_vm15 = vcmp.lt.f32.partialorder %v8934_v22, %v7822_v37  ;;  %vm1667_vm7 = vcmp.lt.f32.partialorder %v8932_v29, %v7822_v37  ;;  %1487 = vmatmul.bf16.vlgmr.msrb.gmra.mxu0 %v7631_v44  ;;  %v9697_v13 = vld [vmem:[%s7682_s23 + $0x38] sm:$0xff] }
 0x163   : > { %6130 = vmatpush.bf16.msk.msra.mxu0 %vm14917_vm8, %v7629_v61  ;;  %vm9476_vm3 = vmpackc.low %vm1684_vm6, %vm1676_vm13  ;;  %vm1660_vm13 = vcmp.lt.f32.partialorder %v8934_v22, %v7825_v38  ;;  %vm1668_vm6 = vcmp.lt.f32.partialorder %v8932_v29, %v7825_v38  ;;  %vm1643_vm8 = vcmp.lt.f32.partialorder %v8796_v2, %v7822_v37  ;;  %3436 = vperm.xlu1 %7575, %v9576_v28   ;;  %v14951_v10 = vmov 0  ;;  %v9877_v43 = vpop.permute.xlu0 %2192 }
 0x164   : > { %vm9490_vm14 = vmpackc.low %vm1685_vm4, %vm1677_vm11  ;;  %vm1669_vm11 = vcmp.lt.f32.partialorder %v8932_v29, %v7830_v40  ;;  %1513 = vmatmul.bf16.vlgmr.msrb.gmra.mxu2 %v7631_v44  ;;  %1526 = vmatmul.bf16.vlgmr.msrb.gmra.mxu3 %v7631_v44 }
 0x165   : > { %6162 = vmatpush.bf16.msk.msra.mxu2 %vm9380_vm2, %v7629_v61  ;;  %6178 = vmatpush.bf16.msk.msra.mxu3 %vm9395_vm1, %v7629_v61  ;;  %vm1661_vm2 = vcmp.lt.f32.partialorder %v8934_v22, %v7830_v40  ;;  %vm9512_vm4 = vmpackc.low %vm1667_vm7, %vm1659_vm15  ;;  %vm1662_vm1 = vcmp.lt.f32.partialorder %v8934_v22, %v7835_v41  ;;  %vm1651_vm15 = vcmp.lt.f32.partialorder %v8956_v46, %v7822_v37 }
 0x166   : > { %6146 = vmatpush.bf16.msk.msra.mxu1 %vm9372_vm10, %v7629_v61  ;;  %vm9502_vm10 = vmpackc.low %vm1686_vm9, %vm1678_vm0  ;;  %vm1670_vm0 = vcmp.lt.f32.partialorder %v8932_v29, %v7835_v41  ;;  %vm14926_vm9 = vnez %v14904_v33  ;;  %vm14929_vm7 = vnez %v14906_v14  ;;  %3428 = vperm.xlu0 %7574, %v9594_v17   ;;  %v9716_v33 = vld [vmem:[%s7682_s23 + $0x28] sm:$0xff]  ;;  %v9719_v14 = vpop.permute.xlu1 %2172 }
 0x167   : > { %1500 = vmatmul.bf16.vlgmr.msrb.gmra.mxu1 %v7631_v44  ;;  %6132 = vmatpush.bf16.msk.msra.mxu0 %vm14926_vm9, %v7629_v61  ;;  %vm9524_vm12 = vmpackc.low %vm1668_vm6, %vm1660_vm13  ;;  %vm14930_vm13 = vnez %v14908_v30  ;;  %vm1653_vm9 = vcmp.lt.f32.partialorder %v8956_v46, %v7830_v40  ;;  %v14957_v30 = vmov 0 }
 0x168   : > { %vm9548_vm6 = vmpackc.low %vm1669_vm11, %vm1661_vm2  ;;  %vm1645_vm11 = vcmp.lt.f32.partialorder %v8796_v2, %v7830_v40 }
 0x169   : > { %6164 = vmatpush.bf16.msk.msra.mxu2 %vm14930_vm13, %v7629_v61  ;;  %vm14933_vm13 = vnez %v14911_v48  ;;  %vm9567_vm2 = vmpackc.low %vm1670_vm0, %vm1662_vm1  ;;  %vm1627_vm0 = vcmp.lt.f32.partialorder %v8824_v49, %v7822_v37  ;;  %v9741_v48 = vld [vmem:[%s7682_s23 + $0x48] sm:$0xff] }
 0x16a   : > { %6148 = vmatpush.bf16.msk.msra.mxu1 %vm14929_vm7, %v7629_v61  ;;  %vm1652_vm7 = vcmp.lt.f32.partialorder %v8956_v46, %v7825_v38  ;;  %6180 = vmatpush.bf16.msk.msra.mxu3 %vm14933_vm13, %v7629_v61  ;;  %vm9585_vm1 = vmpackc.low %vm1651_vm15, %vm1643_vm8  ;;  %vm14938_vm8 = vcmp.lt.f32.partialorder %v8796_v2, %v7825_v38  ;;  %vm1635_vm13 = vcmp.lt.f32.partialorder %v8798_v35, %v7822_v37 }
 0x16b   : > { %6134 = vmatpush.bf16.msk.msra.mxu0 %vm9462_vm5, %v7629_v61  ;;  %vm9603_vm15 = vmpackc.low %vm1652_vm7, %vm14938_vm8  ;;  %vm1628_vm7 = vcmp.lt.f32.partialorder %v8824_v49, %v7825_v38  ;;  %vm14944_vm8 = vcmp.lt.f32.partialorder %v8956_v46, %v7835_v41  ;;  %3432 = vperm.xlu1 %7575, %v9697_v13  }
 0x16c   : > { %v14940_v39 = vsel %vm9603_vm15, 4294967295, %v14939_v39  ;;  %vm9627_vm5 = vmpackc.low %vm1653_vm9, %vm1645_vm11  ;;  %vm1629_vm11 = vcmp.lt.f32.partialorder %v8824_v49, %v7830_v40  ;;  %3440 = vperm.xlu2 %7576, %v9741_v48  }
 0x16d   : > { %6166 = vmatpush.bf16.msk.msra.mxu2 %vm9490_vm14, %v7629_v61  ;;  %v14942_v32 = vsel %vm9627_vm5, 4294967295, %v14941_v32  ;;  %vm14943_vm14 = vcmp.lt.f32.partialorder %v8796_v2, %v7835_v41  ;;  %vm1637_vm5 = vcmp.lt.f32.partialorder %v8798_v35, %v7830_v40  ;;  %vm9652_vm15 = vmpackc.low %vm1635_vm13, %vm1627_vm0  ;;  %vm1611_vm0 = vcmp.lt.f32.partialorder %v8704_v57, %v7822_v37 }
 0x16e   : > { %6150 = vmatpush.bf16.msk.msra.mxu1 %vm9476_vm3, %v7629_v61  ;;  %vm1636_vm3 = vcmp.lt.f32.partialorder %v8798_v35, %v7825_v38  ;;  %6182 = vmatpush.bf16.msk.msra.mxu3 %vm9502_vm10, %v7629_v61  ;;  %vm9644_vm9 = vmpackc.low %vm14944_vm8, %vm14943_vm14  ;;  %vm1630_vm10 = vcmp.lt.f32.partialorder %v8824_v49, %v7835_v41  ;;  %vm1638_vm14 = vcmp.lt.f32.partialorder %v8798_v35, %v7835_v41  ;;  %v9899_v1 = vpop.permute.xlu1 %2184 }
 0x16f   : > { %6136 = vmatpush.bf16.msk.msra.mxu0 %vm9512_vm4, %v7629_v61  ;;  %vm9663_vm8 = vmpackc.low %vm1636_vm3, %vm1628_vm7  ;;  %vm1619_vm13 = vcmp.lt.f32.partialorder %v8668_v53, %v7822_v37  ;;  %vm1612_vm7 = vcmp.lt.f32.partialorder %v8704_v57, %v7825_v38  ;;  %vm1620_vm3 = vcmp.lt.f32.partialorder %v8668_v53, %v7825_v38  ;;  %3424 = vperm.xlu0 %7574, %v9716_v33  }
 0x170   : > { %vm9677_vm4 = vmpackc.low %vm1637_vm5, %vm1629_vm11  ;;  %vm1621_vm5 = vcmp.lt.f32.partialorder %v8668_v53, %v7830_v40  ;;  %vm1614_vm11 = vcmp.lt.f32.partialorder %v8704_v57, %v7835_v41 }
 0x171   : > { %6168 = vmatpush.bf16.msk.msra.mxu2 %vm9548_vm6, %v7629_v61  ;;  %v14952_v10 = vsel %vm9677_vm4, 4294967295, %v14951_v10  ;;  %vm1613_vm6 = vcmp.lt.f32.partialorder %v8704_v57, %v7830_v40 }
 0x172   : > { %6152 = vmatpush.bf16.msk.msra.mxu1 %vm9524_vm12, %v7629_v61  ;;  %6184 = vmatpush.bf16.msk.msra.mxu3 %vm9567_vm2, %v7629_v61  ;;  %vm9688_vm12 = vmpackc.low %vm1638_vm14, %vm1630_vm10  ;;  %vm1604_vm10 = vcmp.lt.f32.partialorder %v8546_v15, %v7825_v38 }
 0x173   : > { %v14954_v42 = vsel %vm9688_vm12, 4294967295, %v14953_v42  ;;  %vm9707_vm2 = vmpackc.low %vm1619_vm13, %vm1611_vm0  ;;  %6138 = vmatpush.bf16.msk.msra.mxu0 %vm9585_vm1, %v7629_v61  ;;  %vm14959_vm1 = vnez %v14940_v39  ;;  %vm1605_vm13 = vcmp.lt.f32.partialorder %v8546_v15, %v7830_v40  ;;  %vm1606_vm0 = vcmp.lt.f32.partialorder %v8546_v15, %v7835_v41  ;;  %3416 = vperm.xlu1 %7575, %v9849_v20   ;;  %v9872_v39 = vld [vmem:[%s7682_s23 + $0x20] sm:$0xff] }
 0x174   : > { %v14956_v45 = vsel %vm9707_vm2, 4294967295, %v14955_v45  ;;  %vm9730_vm14 = vmpackc.low %vm1620_vm3, %vm1612_vm7  ;;  %vm14960_vm7 = vnez %v14942_v32  ;;  %vm1720_vm2 = vcmp.lt.f32.partialorder %v9209_v19, %v8083_v6  ;;  %vm14970_vm12 = vcmp.lt.f32.partialorder %v8670_v54, %v7825_v38  ;;  %3420 = vperm.xlu2 %7576, %v9872_v39   ;;  %v9875_v32 = vpop.permute.xlu2 %2188 }
 0x175   : > { %v14958_v30 = vsel %vm9730_vm14, 4294967295, %v14957_v30  ;;  %6170 = vmatpush.bf16.msk.msra.mxu2 %vm14960_vm7, %v7629_v61  ;;  %vm9756_vm3 = vmpackc.low %vm1621_vm5, %vm1613_vm6  ;;  %vm14963_vm6 = vcmp.lt.f32.partialorder %v8668_v53, %v7835_v41  ;;  %vm1598_vm7 = vcmp.lt.f32.partialorder %v8670_v54, %v7835_v41  ;;  %vm14966_vm14 = vcmp.lt.f32.partialorder %v8670_v54, %v7822_v37 }
 0x176   : > { %6154 = vmatpush.bf16.msk.msra.mxu1 %vm14959_vm1, %v7629_v61  ;;  %v14962_v26 = vsel %vm9756_vm3, 4294967295, %v14961_v26  ;;  %vm1597_vm1 = vcmp.lt.f32.partialorder %v8670_v54, %v7830_v40  ;;  %6186 = vmatpush.bf16.msk.msra.mxu3 %vm9644_vm9, %v7629_v61  ;;  %vm9775_vm5 = vmpackc.low %vm14963_vm6, %vm1614_vm11  ;;  %vm1711_vm3 = vcmp.lt.f32.partialorder %v9211_v0, %v8046_v18  ;;  %vm1719_vm9 = vcmp.lt.f32.partialorder %v9209_v19, %v8046_v18  ;;  %v10043_v21 = vpop.permute.xlu1 %2196 }
 0x177   : > { %v14965_v50 = vsel %vm9775_vm5, 4294967295, %v14964_v50  ;;  %vm14967_vm11 = vcmp.lt.f32.partialorder %v8546_v15, %v7822_v37  ;;  %vm1712_vm5 = vcmp.lt.f32.partialorder %v9211_v0, %v8083_v6  ;;  %6140 = vmatpush.bf16.msk.msra.mxu0 %vm9652_vm15, %v7629_v61  ;;  %vm9807_vm4 = vmpackc.low %vm1604_vm10, %vm14970_vm12  ;;  %vm14975_vm15 = vnez %v14952_v10  ;;  %7578 = vset.pattern.permute.xlu0 %v7633_v36 }
 0x178   : > { %vm9793_vm6 = vmpackc.low %vm14967_vm11, %vm14966_vm14  ;;  %vm1713_vm11 = vcmp.lt.f32.partialorder %v9211_v0, %v8126_v62  ;;  %v14993_v10 = vmov 0  ;;  %4088 = vperm.xlu0 %7578, %v9330_v12   ;;  %v15141_v12 = vmov 0 }
 0x179   : > { %v14969_v55 = vsel %vm9793_vm6, 4294967295, %v14968_v55  ;;  %vm9811_vm14 = vmpackc.low %vm1605_vm13, %vm1597_vm1  ;;  %vm1721_vm6 = vcmp.lt.f32.partialorder %v9209_v19, %v8126_v62  ;;  %6172 = vmatpush.bf16.msk.msra.mxu2 %vm14975_vm15, %v7629_v61  ;;  %vm1714_vm13 = vcmp.lt.f32.partialorder %v9211_v0, %v8154_v63  ;;  %vm1722_vm1 = vcmp.lt.f32.partialorder %v9209_v19, %v8154_v63 }
 0x17a   : > { %6156 = vmatpush.bf16.msk.msra.mxu1 %vm9663_vm8, %v7629_v61  ;;  %vm9825_vm12 = vmpackc.low %vm1606_vm0, %vm1598_vm7  ;;  %vm14980_vm8 = vnez %v14954_v42  ;;  %vm1695_vm0 = vcmp.lt.f32.partialorder %v9056_v51, %v8046_v18  ;;  %v14983_v19 = vmov 0  ;;  %v14986_v0 = vmov 0 }
 0x17b   : > { %vm9829_vm10 = vmpackc.low %vm1719_vm9, %vm1711_vm3  ;;  %6188 = vmatpush.bf16.msk.msra.mxu3 %vm14980_vm8, %v7629_v61  ;;  %vm1703_vm3 = vcmp.lt.f32.partialorder %v9247_v9, %v8046_v18  ;;  %vm14985_vm9 = vnez %v14956_v45  ;;  %v14997_v42 = vmov 0  ;;  %7579 = vset.pattern.permute.xlu1 %v7633_v36 }
 0x17c   : > { %vm9840_vm15 = vmpackc.low %vm1720_vm2, %vm1712_vm5  ;;  %vm1696_vm2 = vcmp.lt.f32.partialorder %v9056_v51, %v8083_v6  ;;  %vm1704_vm5 = vcmp.lt.f32.partialorder %v9247_v9, %v8083_v6  ;;  %6142 = vmatpush.bf16.msk.msra.mxu0 %vm14985_vm9, %v7629_v61  ;;  %4076 = vperm.xlu1 %7579, %v9288_v7  }
 0x17d   : > { %vm9852_vm7 = vmpackc.low %vm1721_vm6, %vm1713_vm11  ;;  %vm1698_vm11 = vcmp.lt.f32.partialorder %v9056_v51, %v8154_v63  ;;  %vm1687_vm6 = vcmp.lt.f32.partialorder %v9058_v52, %v8046_v18  ;;  %7577 = vset.pattern.permute.xlu2 %v7633_v36 }
 0x17e   : > { %v14984_v19 = vsel %vm9852_vm7, 4294967295, %v14983_v19  ;;  %vm9863_vm8 = vmpackc.low %vm1722_vm1, %vm1714_vm13  ;;  %vm14988_vm13 = vnez %v14958_v30  ;;  %vm14989_vm1 = vnez %v14962_v26  ;;  %v15012_v30 = vmov 0  ;;  %v10183_v7 = vpop.permute.xlu1 %2208  ;;  %4084 = vperm.xlu2 %7577, %v9226_v11  }
 0x17f   : > { %v14987_v0 = vsel %vm9863_vm8, 4294967295, %v14986_v0  ;;  %6158 = vmatpush.bf16.msk.msra.mxu1 %vm14988_vm13, %v7629_v61  ;;  %6174 = vmatpush.bf16.msk.msra.mxu2 %vm14989_vm1, %v7629_v61  ;;  %vm9891_vm9 = vmpackc.low %vm1703_vm3, %vm1695_vm0  ;;  %vm1706_vm13 = vcmp.lt.f32.partialorder %v9247_v9, %v8154_v63  ;;  %vm14992_vm1 = vnez %v14965_v50  ;;  %vm1679_vm3 = vcmp.lt.f32.partialorder %v9093_v58, %v8046_v18  ;;  %v10019_v50 = vpop.permute.xlu2 %2200 }
 0x180   : > { %v14991_v24 = vsel %vm9891_vm9, 4294967295, %v14990_v24  ;;  %6190 = vmatpush.bf16.msk.msra.mxu3 %vm14992_vm1, %v7629_v61  ;;  %vm9910_vm0 = vmpackc.low %vm1704_vm5, %vm1696_vm2  ;;  %vm14995_vm9 = vcmp.lt.f32.partialorder %v9056_v51, %v8126_v62  ;;  %vm14996_vm1 = vcmp.lt.f32.partialorder %v9247_v9, %v8126_v62  ;;  %vm1680_vm2 = vcmp.lt.f32.partialorder %v9093_v58, %v8083_v6  ;;  %4060 = vperm.xlu0 %7578, %v9576_v28  }
 0x181   : > { %v14994_v10 = vsel %vm9910_vm0, 4294967295, %v14993_v10  ;;  %vm9924_vm8 = vmpackc.low %vm14996_vm1, %vm14995_vm9  ;;  %vm1688_vm5 = vcmp.lt.f32.partialorder %v9058_v52, %v8083_v6  ;;  %vm14999_vm0 = vnez %v14969_v55  ;;  %vm1681_vm9 = vcmp.lt.f32.partialorder %v9093_v58, %v8126_v62  ;;  %v10021_v55 = vpop.permute.xlu0 %2204 }
 0x182   : > { %v14998_v42 = vsel %vm9924_vm8, 4294967295, %v14997_v42  ;;  %6144 = vmatpush.bf16.msk.msra.mxu0 %vm14999_vm0, %v7629_v61  ;;  %vm9935_vm7 = vmpackc.low %vm1706_vm13, %vm1698_vm11  ;;  %vm1689_vm1 = vcmp.lt.f32.partialorder %v9058_v52, %v8126_v62  ;;  %vm1682_vm11 = vcmp.lt.f32.partialorder %v9093_v58, %v8154_v63  ;;  %vm1690_vm13 = vcmp.lt.f32.partialorder %v9058_v52, %v8154_v63 }
 0x183   : > { %6160 = vmatpush.bf16.msk.msra.mxu1 %vm9807_vm4, %v7629_v61  ;;  %6176 = vmatpush.bf16.msk.msra.mxu2 %vm9811_vm14, %v7629_v61  ;;  %vm9949_vm8 = vmpackc.low %vm1687_vm6, %vm1679_vm3  ;;  %vm1663_vm14 = vcmp.lt.f32.partialorder %v8934_v22, %v8046_v18  ;;  %vm1671_vm6 = vcmp.lt.f32.partialorder %v8932_v29, %v8046_v18  ;;  %vm1672_vm3 = vcmp.lt.f32.partialorder %v8932_v29, %v8083_v6  ;;  %v15015_v26 = vmov 0 }
 0x184   : > { %6192 = vmatpush.bf16.msk.msra.mxu3 %vm9825_vm12, %v7629_v61  ;;  %vm9963_vm4 = vmpackc.low %vm1688_vm5, %vm1680_vm2  ;;  %vm15006_vm12 = vnez %v14984_v19  ;;  %vm15009_vm2 = vnez %v14987_v0  ;;  %vm1665_vm5 = vcmp.lt.f32.partialorder %v8934_v22, %v8126_v62  ;;  %v15064_v28 = vmov 0  ;;  %4068 = vperm.xlu1 %7579, %v9612_v25  }
 0x185   : > { %vm9977_vm0 = vmpackc.low %vm1689_vm1, %vm1681_vm9  ;;  %2051 = vmatmul.bf16.vlgmr.msra.gmra.mxu0 %v7631_v44  ;;  %vm1673_vm9 = vcmp.lt.f32.partialorder %v8932_v29, %v8126_v62  ;;  %v15106_v9 = vmov 0 }
 0x186   : > { %6194 = vmatpush.bf16.msk.msrb.mxu0 %vm9829_vm10, %v7629_v61  ;;  %vm1664_vm10 = vcmp.lt.f32.partialorder %v8934_v22, %v8083_v6  ;;  %2064 = vmatmul.bf16.vlgmr.msra.gmra.mxu1 %v7631_v44  ;;  %vm9999_vm1 = vmpackc.low %vm1671_vm6, %vm1663_vm14  ;;  %vm1647_vm14 = vcmp.lt.f32.partialorder %v8796_v2, %v8046_v18  ;;  %vm1655_vm6 = vcmp.lt.f32.partialorder %v8956_v46, %v8046_v18  ;;  %v10201_v51 = vpop.f32.mrf.mxu2  ;;  %v10344_v31 = vpop.permute.xlu1 %2780 }
 0x187   : > { %6210 = vmatpush.bf16.msk.msrb.mxu1 %vm9840_vm15, %v7629_v61  ;;  %6226 = vmatpush.bf16.msk.msrb.mxu2 %vm15006_vm12, %v7629_v61  ;;  %vm9989_vm15 = vmpackc.low %vm1690_vm13, %vm1682_vm11  ;;  %v15013_v30 = vsel %vm9999_vm1, 4294967295, %v15012_v30  ;;  %vm1666_vm11 = vcmp.lt.f32.partialorder %v8934_v22, %v8154_v63  ;;  %vm15014_vm12 = vnez %v14991_v24  ;;  %vm15017_vm13 = vnez %v14994_v10  ;;  %v10095_v22 = vpop.f32.mrf.mxu0  ;;  %v10128_v24 = vpop.f32.mrf.mxu1 }
 0x188   : > { %6242 = vmatpush.bf16.msk.msrb.mxu3 %vm15009_vm2, %v7629_v61  ;;  %2077 = vmatmul.bf16.vlgmr.msra.gmra.mxu2 %v7631_v44  ;;  %vm10011_vm2 = vmpackc.low %vm1672_vm3, %vm1664_vm10  ;;  %vm15018_vm10 = vnez %v14998_v42  ;;  %vm1658_vm1 = vcmp.lt.f32.partialorder %v8956_v46, %v8154_v63  ;;  %v10226_v11 = vpop.f32.mrf.mxu3 }
 0x189   : > { %2090 = vmatmul.bf16.vlgmr.msra.gmra.mxu3 %v7631_v44  ;;  %v15016_v26 = vsel %vm10011_vm2, 4294967295, %v15015_v26  ;;  %vm10035_vm3 = vmpackc.low %vm1673_vm9, %vm1665_vm5  ;;  %vm15021_vm5 = vcmp.lt.f32.partialorder %v8932_v29, %v8154_v63  ;;  %v10167_v42 = vpop.permute.xlu0 %2216  ;;  %4080 = vperm.xlu2 %7577, %v9389_v16   ;;  %v15081_v29 = vmov 0 }
 0x18a   : > { %6196 = vmatpush.bf16.msk.msrb.mxu0 %vm15014_vm12, %v7629_v61  ;;  %v15020_v56 = vsel %vm10035_vm3, 4294967295, %v15019_v56  ;;  %vm1648_vm12 = vcmp.lt.f32.partialorder %v8796_v2, %v8083_v6  ;;  %vm10054_vm9 = vmpackc.low %vm15021_vm5, %vm1666_vm11  ;;  %vm1657_vm3 = vcmp.lt.f32.partialorder %v8956_v46, %v8126_v62  ;;  %4056 = vperm.xlu0 %7578, %v9697_v13   ;;  %v15091_v13 = vmov 0 }
 0x18b   : > { %6212 = vmatpush.bf16.msk.msrb.mxu1 %vm15017_vm13, %v7629_v61  ;;  %6228 = vmatpush.bf16.msk.msrb.mxu2 %vm15018_vm10, %v7629_v61  ;;  %vm1656_vm13 = vcmp.lt.f32.partialorder %v8956_v46, %v8083_v6  ;;  %vm1649_vm10 = vcmp.lt.f32.partialorder %v8796_v2, %v8126_v62  ;;  %vm10062_vm2 = vmpackc.low %vm1655_vm6, %vm1647_vm14  ;;  %vm1631_vm14 = vcmp.lt.f32.partialorder %v8824_v49, %v8046_v18  ;;  %v15136_v46 = vmov 0 }
 0x18c   : > { %6244 = vmatpush.bf16.msk.msrb.mxu3 %vm9935_vm7, %v7629_v61  ;;  %vm1650_vm7 = vcmp.lt.f32.partialorder %v8796_v2, %v8154_v63  ;;  %vm10073_vm11 = vmpackc.low %vm1656_vm13, %vm1648_vm12  ;;  %vm1639_vm6 = vcmp.lt.f32.partialorder %v8798_v35, %v8046_v18  ;;  %vm1640_vm12 = vcmp.lt.f32.partialorder %v8798_v35, %v8083_v6  ;;  %4064 = vperm.xlu1 %7579, %v9741_v48   ;;  %v15134_v2 = vmov 0 }
 0x18d   : > { %vm10087_vm5 = vmpackc.low %vm1657_vm3, %vm1649_vm10  ;;  %vm1641_vm3 = vcmp.lt.f32.partialorder %v8798_v35, %v8126_v62  ;;  %vm15037_vm10 = vnez %v15016_v26  ;;  %v15068_v26 = vmov 0 }
 0x18e   : > { %6198 = vmatpush.bf16.msk.msrb.mxu0 %vm9949_vm8, %v7629_v61  ;;  %vm1632_vm8 = vcmp.lt.f32.partialorder %v8824_v49, %v8083_v6  ;;  %vm10108_vm13 = vmpackc.low %vm1639_vm6, %vm1631_vm14  ;;  %vm1615_vm14 = vcmp.lt.f32.partialorder %v8704_v57, %v8046_v18  ;;  %v1360_v25 = vpop.f32.mrf.mxu2  ;;  %v10484_v45 = vpop.permute.xlu1 %2792 }
 0x18f   : > { %6214 = vmatpush.bf16.msk.msrb.mxu1 %vm9963_vm4, %v7629_v61  ;;  %6230 = vmatpush.bf16.msk.msrb.mxu2 %vm9977_vm0, %v7629_v61  ;;  %vm10100_vm4 = vmpackc.low %vm1658_vm1, %vm1650_vm7  ;;  %vm1633_vm0 = vcmp.lt.f32.partialorder %v8824_v49, %v8126_v62  ;;  %vm15034_vm1 = vnez %v15013_v30  ;;  %v1334_v52 = vpop.f32.mrf.mxu0  ;;  %v1347_v30 = vpop.f32.mrf.mxu1 }
 0x190   : > { %6246 = vmatpush.bf16.msk.msrb.mxu3 %vm9989_vm15, %v7629_v61  ;;  %vm1642_vm15 = vcmp.lt.f32.partialorder %v8798_v35, %v8154_v63  ;;  %vm10120_vm7 = vmpackc.low %vm1640_vm12, %vm1632_vm8  ;;  %vm1616_vm12 = vcmp.lt.f32.partialorder %v8704_v57, %v8083_v6  ;;  %v10165_v35 = vpop.permute.xlu2 %2212  ;;  %v1373_v16 = vpop.f32.mrf.mxu3  ;;  %v15109_v52 = vmov 0 }
 0x191   : > { %vm10142_vm8 = vmpackc.low %vm1641_vm3, %vm1633_vm0  ;;  %vm1617_vm0 = vcmp.lt.f32.partialorder %v8704_v57, %v8126_v62  ;;  %vm1607_vm3 = vcmp.lt.f32.partialorder %v8546_v15, %v8046_v18  ;;  %4072 = vperm.xlu2 %7577, %v9434_v47   ;;  %v7610_v16 = vld [vmem:[%s7682_s23 + $0x20] sm:$0xff] }
 0x192   : > { %6200 = vmatpush.bf16.msk.msrb.mxu0 %vm15034_vm1, %v7629_v61  ;;  %vm15038_vm1 = vnez %v15020_v56  ;;  %v15071_v56 = vmov 0  ;;  %4036 = vperm.xlu0 %7578, %v9180_v3   ;;  %v15165_v3 = vmov 0 }
 0x193   : > { %6216 = vmatpush.bf16.msk.msrb.mxu1 %vm15037_vm10, %v7629_v61  ;;  %6232 = vmatpush.bf16.msk.msrb.mxu2 %vm15038_vm1, %v7629_v61  ;;  %vm1624_vm10 = vcmp.lt.f32.partialorder %v8668_v53, %v8083_v6  ;;  %vm15041_vm1 = vcmp.lt.f32.partialorder %v8824_v49, %v8154_v63  ;;  %v15149_v49 = vmov 0 }
 0x194   : > { %6248 = vmatpush.bf16.msk.msrb.mxu3 %vm10054_vm9, %v7629_v61  ;;  %vm10156_vm6 = vmpackc.low %vm1642_vm15, %vm15041_vm1  ;;  %vm15044_vm9 = vcmp.lt.f32.partialorder %v8668_v53, %v8046_v18  ;;  %4044 = vperm.xlu1 %7579, %v9872_v39  }
 0x195   : > { %vm10175_vm15 = vmpackc.low %vm15044_vm9, %vm1615_vm14  ;;  %vm1599_vm9 = vcmp.lt.f32.partialorder %v8670_v54, %v8046_v18 }
 0x196   : > { %6202 = vmatpush.bf16.msk.msrb.mxu0 %vm10062_vm2, %v7629_v61  ;;  %vm10191_vm14 = vmpackc.low %vm1624_vm10, %vm1616_vm12  ;;  %vm15049_vm2 = vcmp.lt.f32.partialorder %v8668_v53, %v8126_v62  ;;  %vm15058_vm10 = vcmp.lt.f32.partialorder %v8670_v54, %v8083_v6  ;;  %v10632_v25 = vpop.permute.xlu1 %2800 }
 0x197   : > { %6218 = vmatpush.bf16.msk.msrb.mxu1 %vm10073_vm11, %v7629_v61  ;;  %6234 = vmatpush.bf16.msk.msrb.mxu2 %vm10087_vm5, %v7629_v61  ;;  %vm10216_vm12 = vmpackc.low %vm15049_vm2, %vm1617_vm0  ;;  %vm15052_vm5 = vcmp.lt.f32.partialorder %v8704_v57, %v8154_v63  ;;  %vm15053_vm0 = vcmp.lt.f32.partialorder %v8668_v53, %v8154_v63  ;;  %v15056_v53 = vmov 0  ;;  %vm15063_vm11 = vcmp.lt.f32.partialorder %v8546_v15, %v8126_v62 }
 0x198   : > { %6250 = vmatpush.bf16.msk.msrb.mxu3 %vm10100_vm4, %v7629_v61  ;;  %vm10237_vm2 = vmpackc.low %vm15053_vm0, %vm15052_vm5  ;;  %vm2339_vm4 = vcmp.lt.f32.partialorder %v10167_v42, %v7822_v37  ;;  %vm15062_vm0 = vcmp.lt.f32.partialorder %v8670_v54, %v8126_v62  ;;  %v10412_v19 = vpop.permute.xlu2 %2784 }
 0x199   : > { %vm10255_vm5 = vmpackc.low %vm1607_vm3, %vm1599_vm9  ;;  %vm15059_vm3 = vcmp.lt.f32.partialorder %v8546_v15, %v8083_v6  ;;  %4052 = vperm.xlu2 %7577, %v9594_v17  }
 0x19a   : > { %v15057_v53 = vsel %vm10255_vm5, 4294967295, %v15056_v53  ;;  %6204 = vmatpush.bf16.msk.msrb.mxu0 %vm10108_vm13, %v7629_v61  ;;  %vm10273_vm9 = vmpackc.low %vm15059_vm3, %vm15058_vm10  ;;  %vm2333_vm13 = vcmp.lt.f32.partialorder %v10165_v35, %v7830_v40  ;;  %vm2341_vm5 = vcmp.lt.f32.partialorder %v10167_v42, %v7830_v40  ;;  %vm15066_vm10 = vcmp.lt.f32.partialorder %v8670_v54, %v8154_v63  ;;  %v10616_v54 = vpop.permute.xlu0 %2788  ;;  %4032 = vperm.xlu0 %7578, %v9110_v59  }
 0x19b   : > { %vm10283_vm1 = vmpackc.low %vm15063_vm11, %vm15062_vm0  ;;  %6220 = vmatpush.bf16.msk.msrb.mxu1 %vm10120_vm7, %v7629_v61  ;;  %6236 = vmatpush.bf16.msk.msrb.mxu2 %vm10142_vm8, %v7629_v61  ;;  %vm15067_vm11 = vcmp.lt.f32.partialorder %v8546_v15, %v8154_v63  ;;  %vm15070_vm3 = vcmp.lt.f32.partialorder %v10165_v35, %v7822_v37  ;;  %vm2334_vm7 = vcmp.lt.f32.partialorder %v10165_v35, %v7835_v41 }
 0x19c   : > { %v15065_v28 = vsel %vm10283_vm1, 4294967295, %v15064_v28  ;;  %vm10303_vm0 = vmpackc.low %vm15067_vm11, %vm15066_vm10  ;;  %vm2342_vm8 = vcmp.lt.f32.partialorder %v10167_v42, %v7835_v41  ;;  %6252 = vmatpush.bf16.msk.msrb.mxu3 %vm10156_vm6, %v7629_v61  ;;  %vm15073_vm10 = vcmp.lt.f32.partialorder %v10165_v35, %v7825_v38  ;;  %vm15074_vm11 = vcmp.lt.f32.partialorder %v10167_v42, %v7825_v38  ;;  %4040 = vperm.xlu1 %7579, %v9849_v20  }
 0x19d   : > { %v15069_v26 = vsel %vm10303_vm0, 4294967295, %v15068_v26  ;;  %vm10310_vm1 = vmpackc.low %vm2339_vm4, %vm15070_vm3  ;;  %vm2315_vm3 = vcmp.lt.f32.partialorder %v10021_v55, %v7822_v37  ;;  %vm2316_vm6 = vcmp.lt.f32.partialorder %v10021_v55, %v7825_v38  ;;  %v10575_v47 = vpop.f32.mrf.mxu1  ;;  %v15161_v20 = vmov 0 }
 0x19e   : > { %v15072_v56 = vsel %vm10310_vm1, 4294967295, %v15071_v56  ;;  %vm10327_vm4 = vmpackc.low %vm15074_vm11, %vm15073_vm10  ;;  %vm2323_vm1 = vcmp.lt.f32.partialorder %v10183_v7, %v7822_v37  ;;  %vm2324_vm10 = vcmp.lt.f32.partialorder %v10183_v7, %v7825_v38  ;;  %6206 = vmatpush.bf16.msk.msrb.mxu0 %vm10175_vm15, %v7629_v61 }
 0x19f   : > { %vm10336_vm0 = vmpackc.low %vm2341_vm5, %vm2333_vm13  ;;  %vm2317_vm5 = vcmp.lt.f32.partialorder %v10021_v55, %v7830_v40  ;;  %vm2325_vm13 = vcmp.lt.f32.partialorder %v10183_v7, %v7830_v40  ;;  %6222 = vmatpush.bf16.msk.msrb.mxu1 %vm10191_vm14, %v7629_v61  ;;  %6238 = vmatpush.bf16.msk.msrb.mxu2 %vm10216_vm12, %v7629_v61  ;;  %vm2299_vm14 = vcmp.lt.f32.partialorder %v10043_v21, %v7822_v37 }
 0x1a0   : > { %vm10349_vm11 = vmpackc.low %vm2342_vm8, %vm2334_vm7  ;;  %vm2318_vm7 = vcmp.lt.f32.partialorder %v10021_v55, %v7835_v41  ;;  %vm2326_vm8 = vcmp.lt.f32.partialorder %v10183_v7, %v7835_v41  ;;  %6254 = vmatpush.bf16.msk.msrb.mxu3 %vm10237_vm2, %v7629_v61  ;;  %vm2307_vm12 = vcmp.lt.f32.partialorder %v10019_v50, %v7822_v37  ;;  %vm15090_vm2 = vnez %v15065_v28  ;;  %v10550_v28 = vpop.f32.mrf.mxu0  ;;  %v10553_v30 = vpop.permute.xlu2 %2796 }
 0x1a1   : > { %vm10367_vm15 = vmpackc.low %vm2323_vm1, %vm2315_vm3  ;;  %4048 = vperm.xlu2 %7577, %v9716_v33  }
 0x1a2   : > { %v15082_v29 = vsel %vm10367_vm15, 4294967295, %v15081_v29  ;;  %vm10384_vm1 = vmpackc.low %vm2324_vm10, %vm2316_vm6  ;;  %vm2308_vm15 = vcmp.lt.f32.partialorder %v10019_v50, %v7825_v38  ;;  %vm15087_vm6 = vnez %v15057_v53  ;;  %v10802_v53 = vpop.permute.xlu1 %2812 }
 0x1a3   : > { %vm10392_vm3 = vmpackc.low %vm2325_vm13, %vm2317_vm5  ;;  %6208 = vmatpush.bf16.msk.msrb.mxu0 %vm15087_vm6, %v7629_v61  ;;  %vm2309_vm13 = vcmp.lt.f32.partialorder %v10019_v50, %v7830_v40  ;;  %6224 = vmatpush.bf16.msk.msrb.mxu1 %vm10273_vm9, %v7629_v61  ;;  %vm2310_vm6 = vcmp.lt.f32.partialorder %v10019_v50, %v7835_v41  ;;  %vm15093_vm5 = vnez %v15069_v26  ;;  %vm15094_vm9 = vnez %v15072_v56 }
 0x1a4   : > { %vm10404_vm10 = vmpackc.low %vm2326_vm8, %vm2318_vm7  ;;  %6240 = vmatpush.bf16.msk.msrb.mxu2 %vm15090_vm2, %v7629_v61  ;;  %vm2302_vm8 = vcmp.lt.f32.partialorder %v10043_v21, %v7835_v41  ;;  %6256 = vmatpush.bf16.msk.msrb.mxu3 %vm15093_vm5, %v7629_v61  ;;  %vm2283_vm2 = vcmp.lt.f32.partialorder %v9875_v32, %v7822_v37  ;;  %v15120_v26 = vmov 0  ;;  %v15122_v56 = vmov 0 }
 0x1a5   : > { %vm10420_vm7 = vmpackc.low %vm2307_vm12, %vm2299_vm14  ;;  %vm15095_vm14 = vcmp.lt.f32.partialorder %v10043_v21, %v7825_v38  ;;  %v1399_v36 = vpop.f32.mrf.mxu1 }
 0x1a6   : > { %v15092_v13 = vsel %vm10420_vm7, 4294967295, %v15091_v13  ;;  %vm10437_vm12 = vmpackc.low %vm2308_vm15, %vm15095_vm14  ;;  %vm2291_vm7 = vcmp.lt.f32.partialorder %v9877_v43, %v7822_v37  ;;  %vm15098_vm15 = vcmp.lt.f32.partialorder %v10043_v21, %v7830_v40  ;;  %vm2292_vm14 = vcmp.lt.f32.partialorder %v9877_v43, %v7825_v38  ;;  %2103 = vmatmul.bf16.vlgmr.msrb.gmra.mxu0 %v7631_v44  ;;  %2116 = vmatmul.bf16.vlgmr.msrb.gmra.mxu1 %v7631_v44  ;;  %v10668_v39 = vpop.f32.mrf.mxu2 }
 0x1a7   : > { %6386 = vmatpush.bf16.msk.msra.mxu0 %vm15094_vm9, %v7629_v61  ;;  %6402 = vmatpush.bf16.msk.msra.mxu1 %vm10327_vm4, %v7629_v61  ;;  %vm10454_vm5 = vmpackc.low %vm2309_vm13, %vm15098_vm15  ;;  %vm2284_vm9 = vcmp.lt.f32.partialorder %v9875_v32, %v7825_v38  ;;  %vm2293_vm13 = vcmp.lt.f32.partialorder %v9877_v43, %v7830_v40  ;;  %vm2275_vm4 = vcmp.lt.f32.partialorder %v9899_v1, %v7822_v37  ;;  %v10693_v17 = vpop.f32.mrf.mxu3  ;;  %v15236_v36 = vmov 0 }
 0x1a8   : > { %6418 = vmatpush.bf16.msk.msra.mxu2 %vm10336_vm0, %v7629_v61  ;;  %6434 = vmatpush.bf16.msk.msra.mxu3 %vm10349_vm11, %v7629_v61  ;;  %vm10466_vm0 = vmpackc.low %vm2310_vm6, %vm2302_vm8  ;;  %vm2286_vm11 = vcmp.lt.f32.partialorder %v9875_v32, %v7835_v41  ;;  %vm2294_vm8 = vcmp.lt.f32.partialorder %v9877_v43, %v7835_v41  ;;  %vm15105_vm6 = vnez %v15082_v29  ;;  %v1386_v59 = vpop.f32.mrf.mxu0  ;;  %v10716_v0 = vpop.permute.xlu2 %2804 }
 0x1a9   : > { %2129 = vmatmul.bf16.vlgmr.msrb.gmra.mxu2 %v7631_v44  ;;  %vm10476_vm15 = vmpackc.low %vm2291_vm7, %vm2283_vm2  ;;  %2142 = vmatmul.bf16.vlgmr.msrb.gmra.mxu3 %v7631_v44  ;;  %vm2267_vm2 = vcmp.lt.f32.partialorder %v9702_v4, %v7822_v37  ;;  %v15189_v59 = vmov 0 }
 0x1aa   : > { %vm10493_vm7 = vmpackc.low %vm2292_vm14, %vm2284_vm9  ;;  %vm15108_vm9 = vcmp.lt.f32.partialorder %v9875_v32, %v7830_v40 }
 0x1ab   : > { %6388 = vmatpush.bf16.msk.msra.mxu0 %vm15105_vm6, %v7629_v61  ;;  %v15107_v9 = vsel %vm10493_vm7, 4294967295, %v15106_v9  ;;  %6404 = vmatpush.bf16.msk.msra.mxu1 %vm10384_vm1, %v7629_v61  ;;  %vm10510_vm14 = vmpackc.low %vm2293_vm13, %vm15108_vm9  ;;  %vm2268_vm6 = vcmp.lt.f32.partialorder %v9702_v4, %v7825_v38  ;;  %vm2276_vm7 = vcmp.lt.f32.partialorder %v9899_v1, %v7825_v38  ;;  %vm2277_vm13 = vcmp.lt.f32.partialorder %v9899_v1, %v7830_v40 }
 0x1ac   : > { %6420 = vmatpush.bf16.msk.msra.mxu2 %vm10392_vm3, %v7629_v61  ;;  %v15110_v52 = vsel %vm10510_vm14, 4294967295, %v15109_v52  ;;  %6436 = vmatpush.bf16.msk.msra.mxu3 %vm10404_vm10, %v7629_v61  ;;  %vm10521_vm1 = vmpackc.low %vm2294_vm8, %vm2286_vm11  ;;  %vm2269_vm3 = vcmp.lt.f32.partialorder %v9702_v4, %v7830_v40  ;;  %vm2270_vm14 = vcmp.lt.f32.partialorder %v9702_v4, %v7835_v41  ;;  %vm2278_vm10 = vcmp.lt.f32.partialorder %v9899_v1, %v7835_v41 }
 0x1ad   : > { %vm10530_vm9 = vmpackc.low %vm2275_vm4, %vm2267_vm2  ;;  %vm15115_vm11 = vnez %v15092_v13  ;;  %vm2251_vm4 = vcmp.lt.f32.partialorder %v9719_v14, %v7822_v37  ;;  %vm2259_vm2 = vcmp.lt.f32.partialorder %v9700_v23, %v7822_v37  ;;  %v15139_v13 = vmov 0 }
 0x1ae   : > { %vm10542_vm8 = vmpackc.low %vm2276_vm7, %vm2268_vm6  ;;  %vm2252_vm6 = vcmp.lt.f32.partialorder %v9719_v14, %v7825_v38  ;;  %v1412_v57 = vpop.f32.mrf.mxu2 }
 0x1af   : > { %6390 = vmatpush.bf16.msk.msra.mxu0 %vm15115_vm11, %v7629_v61  ;;  %6406 = vmatpush.bf16.msk.msra.mxu1 %vm10437_vm12, %v7629_v61  ;;  %vm10567_vm7 = vmpackc.low %vm2277_vm13, %vm2269_vm3  ;;  %vm2260_vm12 = vcmp.lt.f32.partialorder %v9700_v23, %v7825_v38  ;;  %vm2253_vm3 = vcmp.lt.f32.partialorder %v9719_v14, %v7830_v40  ;;  %vm2261_vm13 = vcmp.lt.f32.partialorder %v9700_v23, %v7830_v40  ;;  %v1425_v33 = vpop.f32.mrf.mxu3 }
 0x1b0   : > { %6422 = vmatpush.bf16.msk.msra.mxu2 %vm10454_vm5, %v7629_v61  ;;  %6438 = vmatpush.bf16.msk.msra.mxu3 %vm10466_vm0, %v7629_v61  ;;  %vm10586_vm5 = vmpackc.low %vm2278_vm10, %vm2270_vm14  ;;  %vm2254_vm11 = vcmp.lt.f32.partialorder %v9719_v14, %v7835_v41  ;;  %vm2262_vm14 = vcmp.lt.f32.partialorder %v9700_v23, %v7835_v41 }
 0x1b1   : > { %v15121_v26 = vsel %vm10586_vm5, 4294967295, %v15120_v26  ;;  %vm10597_vm0 = vmpackc.low %vm2259_vm2, %vm2251_vm4  ;;  %vm2235_vm4 = vcmp.lt.f32.partialorder %v9556_v8, %v7822_v37  ;;  %vm2243_vm2 = vcmp.lt.f32.partialorder %v9532_v60, %v7822_v37  ;;  %vm15127_vm5 = vnez %v15110_v52  ;;  %v11028_v52 = vld [vmem:[%s7682_s23] sm:$0xff] }
 0x1b2   : > { %v15123_v56 = vsel %vm10597_vm0, 4294967295, %v15122_v56  ;;  %vm10608_vm10 = vmpackc.low %vm2260_vm12, %vm2252_vm6  ;;  %vm15126_vm0 = vnez %v15107_v9  ;;  %vm2236_vm6 = vcmp.lt.f32.partialorder %v9556_v8, %v7825_v38  ;;  %vm2244_vm12 = vcmp.lt.f32.partialorder %v9532_v60, %v7825_v38  ;;  %4028 = vperm.xlu2 %7577, %v11028_v52  }
 0x1b3   : > { %6392 = vmatpush.bf16.msk.msra.mxu0 %vm10476_vm15, %v7629_v61  ;;  %6408 = vmatpush.bf16.msk.msra.mxu1 %vm15126_vm0, %v7629_v61  ;;  %vm10624_vm15 = vmpackc.low %vm2261_vm13, %vm2253_vm3  ;;  %vm2245_vm3 = vcmp.lt.f32.partialorder %v9532_v60, %v7830_v40  ;;  %v15254_v9 = vmov 0 }
 0x1b4   : > { %6424 = vmatpush.bf16.msk.msra.mxu2 %vm15127_vm5, %v7629_v61  ;;  %v15129_v27 = vsel %vm10624_vm15, 4294967295, %v15128_v27  ;;  %6440 = vmatpush.bf16.msk.msra.mxu3 %vm10521_vm1, %v7629_v61  ;;  %vm10637_vm0 = vmpackc.low %vm2262_vm14, %vm2254_vm11  ;;  %vm2237_vm5 = vcmp.lt.f32.partialorder %v9556_v8, %v7830_v40  ;;  %vm2238_vm15 = vcmp.lt.f32.partialorder %v9556_v8, %v7835_v41  ;;  %vm2246_vm1 = vcmp.lt.f32.partialorder %v9532_v60, %v7835_v41 }
 0x1b5   : > { %vm10646_vm13 = vmpackc.low %vm2243_vm2, %vm2235_vm4  ;;  %vm2219_vm14 = vcmp.lt.f32.partialorder %v9403_v34, %v7822_v37  ;;  %vm2227_vm4 = vcmp.lt.f32.partialorder %v9534_v5, %v7822_v37  ;;  %vm2220_vm2 = vcmp.lt.f32.partialorder %v9403_v34, %v7825_v38 }
 0x1b6   : > { %vm10658_vm11 = vmpackc.low %vm2244_vm12, %vm2236_vm6  ;;  %vm2230_vm12 = vcmp.lt.f32.partialorder %v9534_v5, %v7835_v41  ;;  %vm15143_vm6 = vnez %v15123_v56  ;;  %v15170_v56 = vmov 0 }
 0x1b7   : > { %6394 = vmatpush.bf16.msk.msra.mxu0 %vm10530_vm9, %v7629_v61  ;;  %v15135_v2 = vsel %vm10658_vm11, 4294967295, %v15134_v2  ;;  %6410 = vmatpush.bf16.msk.msra.mxu1 %vm10542_vm8, %v7629_v61  ;;  %vm10683_vm9 = vmpackc.low %vm2245_vm3, %vm2237_vm5  ;;  %vm2335_vm8 = vcmp.lt.f32.partialorder %v10165_v35, %v8046_v18  ;;  %vm2344_vm3 = vcmp.lt.f32.partialorder %v10167_v42, %v8083_v6  ;;  %vm2345_vm11 = vcmp.lt.f32.partialorder %v10167_v42, %v8126_v62 }
 0x1b8   : > { %6426 = vmatpush.bf16.msk.msra.mxu2 %vm10567_vm7, %v7629_v61  ;;  %v15137_v46 = vsel %vm10683_vm9, 4294967295, %v15136_v46  ;;  %vm15138_vm7 = vnez %v15121_v26  ;;  %vm10704_vm5 = vmpackc.low %vm2246_vm1, %vm2238_vm15  ;;  %vm2336_vm1 = vcmp.lt.f32.partialorder %v10165_v35, %v8083_v6 }
 0x1b9   : > { %6442 = vmatpush.bf16.msk.msra.mxu3 %vm15138_vm7, %v7629_v61  ;;  %v15140_v13 = vsel %vm10704_vm5, 4294967295, %v15139_v13  ;;  %vm2343_vm7 = vcmp.lt.f32.partialorder %v10167_v42, %v8046_v18  ;;  %vm10724_vm15 = vmpackc.low %vm2227_vm4, %vm2219_vm14  ;;  %vm15144_vm5 = vcmp.lt.f32.partialorder %v9534_v5, %v7825_v38  ;;  %vm15147_vm4 = vcmp.lt.f32.partialorder %v9403_v34, %v7830_v40 }
 0x1ba   : > { %v15142_v12 = vsel %vm10724_vm15, 4294967295, %v15141_v12  ;;  %vm10741_vm14 = vmpackc.low %vm15144_vm5, %vm2220_vm2  ;;  %vm15148_vm15 = vcmp.lt.f32.partialorder %v9534_v5, %v7830_v40  ;;  %vm15151_vm2 = vnez %v15129_v27  ;;  %vm15152_vm5 = vcmp.lt.f32.partialorder %v9403_v34, %v7835_v41 }
 0x1bb   : > { %6396 = vmatpush.bf16.msk.msra.mxu0 %vm15143_vm6, %v7629_v61  ;;  %vm10751_vm9 = vmpackc.low %vm15148_vm15, %vm15147_vm4  ;;  %vm2337_vm6 = vcmp.lt.f32.partialorder %v10165_v35, %v8126_v62  ;;  %6412 = vmatpush.bf16.msk.msra.mxu1 %vm10608_vm10, %v7629_v61  ;;  %vm2346_vm10 = vcmp.lt.f32.partialorder %v10167_v42, %v8154_v63  ;;  %v15159_v42 = vmov 0 }
 0x1bc   : > { %v15150_v49 = vsel %vm10751_vm9, 4294967295, %v15149_v49  ;;  %6428 = vmatpush.bf16.msk.msra.mxu2 %vm15151_vm2, %v7629_v61  ;;  %vm10768_vm15 = vmpackc.low %vm2230_vm12, %vm15152_vm5  ;;  %vm2338_vm9 = vcmp.lt.f32.partialorder %v10165_v35, %v8154_v63  ;;  %vm2327_vm12 = vcmp.lt.f32.partialorder %v10183_v7, %v8046_v18  ;;  %v10792_v35 = vpop.permute.xlu0 %2808  ;;  %vm15163_vm5 = vnez %v15135_v2  ;;  %v10946_v2 = vpop.permute.xlu1 %2824 }
 0x1bd   : > { %vm10772_vm4 = vmpackc.low %vm2343_vm7, %vm2335_vm8  ;;  %6444 = vmatpush.bf16.msk.msra.mxu3 %vm10637_vm0, %v7629_v61  ;;  %vm2319_vm8 = vcmp.lt.f32.partialorder %v10021_v55, %v8046_v18  ;;  %vm2320_vm0 = vcmp.lt.f32.partialorder %v10021_v55, %v8083_v6 }
 0x1be   : > { %vm10783_vm2 = vmpackc.low %vm2344_vm3, %vm2336_vm1  ;;  %vm2328_vm3 = vcmp.lt.f32.partialorder %v10183_v7, %v8083_v6 }
 0x1bf   : > { %vm10794_vm7 = vmpackc.low %vm2345_vm11, %vm2337_vm6  ;;  %6398 = vmatpush.bf16.msk.msra.mxu0 %vm10646_vm13, %v7629_v61  ;;  %vm2321_vm11 = vcmp.lt.f32.partialorder %v10021_v55, %v8126_v62  ;;  %vm2329_vm6 = vcmp.lt.f32.partialorder %v10183_v7, %v8126_v62  ;;  %6414 = vmatpush.bf16.msk.msra.mxu1 %vm15163_vm5, %v7629_v61  ;;  %vm15164_vm13 = vnez %v15137_v46  ;;  %vm2330_vm5 = vcmp.lt.f32.partialorder %v10183_v7, %v8154_v63  ;;  %v10872_v7 = vpop.permute.xlu2 %2816 }
 0x1c0   : > { %v15160_v42 = vsel %vm10794_vm7, 4294967295, %v15159_v42  ;;  %vm10807_vm1 = vmpackc.low %vm2346_vm10, %vm2338_vm9  ;;  %6430 = vmatpush.bf16.msk.msra.mxu2 %vm15164_vm13, %v7629_v61  ;;  %vm2322_vm10 = vcmp.lt.f32.partialorder %v10021_v55, %v8154_v63  ;;  %vm15167_vm13 = vnez %v15140_v13  ;;  %vm2312_vm7 = vcmp.lt.f32.partialorder %v10019_v50, %v8083_v6 }
 0x1c1   : > { %v15162_v20 = vsel %vm10807_vm1, 4294967295, %v15161_v20  ;;  %vm10828_vm9 = vmpackc.low %vm2327_vm12, %vm2319_vm8  ;;  %6446 = vmatpush.bf16.msk.msra.mxu3 %vm15167_vm13, %v7629_v61  ;;  %vm2303_vm12 = vcmp.lt.f32.partialorder %v10043_v21, %v8046_v18  ;;  %vm2304_vm13 = vcmp.lt.f32.partialorder %v10043_v21, %v8083_v6  ;;  %v15234_v46 = vmov 0 }
 0x1c2   : > { %v15166_v3 = vsel %vm10828_vm9, 4294967295, %v15165_v3  ;;  %vm10845_vm8 = vmpackc.low %vm2328_vm3, %vm2320_vm0  ;;  %vm2311_vm9 = vcmp.lt.f32.partialorder %v10019_v50, %v8046_v18  ;;  %vm15172_vm0 = vnez %v15142_v12  ;;  %v7602_v12 = vld [vmem:[%s7682_s23 + $0x70] sm:$0xff] }
 0x1c3   : > { %vm10853_vm1 = vmpackc.low %vm2329_vm6, %vm2321_vm11  ;;  %6400 = vmatpush.bf16.msk.msra.mxu0 %vm15172_vm0, %v7629_v61  ;;  %vm2305_vm11 = vcmp.lt.f32.partialorder %v10043_v21, %v8126_v62  ;;  %vm2313_vm6 = vcmp.lt.f32.partialorder %v10019_v50, %v8126_v62  ;;  %6416 = vmatpush.bf16.msk.msra.mxu1 %vm10741_vm14, %v7629_v61  ;;  %vm2314_vm0 = vcmp.lt.f32.partialorder %v10019_v50, %v8154_v63  ;;  %v7609_v50 = vld [vmem:[%s7682_s23 + $0x30] sm:$0xff] }
 0x1c4   : > { %v15171_v56 = vsel %vm10853_vm1, 4294967295, %v15170_v56  ;;  %vm10864_vm3 = vmpackc.low %vm2330_vm5, %vm2322_vm10  ;;  %vm15175_vm1 = vnez %v15150_v49  ;;  %vm2306_vm5 = vcmp.lt.f32.partialorder %v10043_v21, %v8154_v63  ;;  %v10931_v21 = vpop.permute.xlu0 %2820  ;;  %v1449_v49 = vpop.f32.mrf.mxu1 }
 0x1c5   : > { %6432 = vmatpush.bf16.msk.msra.mxu2 %vm15175_vm1, %v7629_v61  ;;  %vm10880_vm10 = vmpackc.low %vm2311_vm9, %vm2303_vm12  ;;  %6448 = vmatpush.bf16.msk.msra.mxu3 %vm10768_vm15, %v7629_v61  ;;  %vm2287_vm1 = vcmp.lt.f32.partialorder %v9875_v32, %v8046_v18  ;;  %vm2295_vm9 = vcmp.lt.f32.partialorder %v9877_v43, %v8046_v18  ;;  %vm15180_vm15 = vnez %v15160_v42  ;;  %vm2296_vm12 = vcmp.lt.f32.partialorder %v9877_v43, %v8083_v6  ;;  %v11119_v33 = vpop.permute.xlu1 %2840 }
 0x1c6   : > { %vm10894_vm14 = vmpackc.low %vm2312_vm7, %vm2304_vm13  ;;  %vm2288_vm7 = vcmp.lt.f32.partialorder %v9875_v32, %v8083_v6  ;;  %2675 = vmatmul.bf16.vlgmr.msra.gmra.mxu0 %v7631_v44  ;;  %2688 = vmatmul.bf16.vlgmr.msra.gmra.mxu1 %v7631_v44  ;;  %v11040_v58 = vadd.f32 %v1449_v49, %v10128_v24  ;;  %v1462_v26 = vpop.f32.mrf.mxu2  ;;  %v15258_v24 = vmov 0 }
 0x1c7   : > { %6450 = vmatpush.bf16.msk.msrb.mxu0 %vm10772_vm4, %v7629_v61  ;;  %6466 = vmatpush.bf16.msk.msrb.mxu1 %vm10783_vm2, %v7629_v61  ;;  %vm10911_vm4 = vmpackc.low %vm2313_vm6, %vm2305_vm11  ;;  %vm15183_vm2 = vnez %v15162_v20  ;;  %vm2289_vm11 = vcmp.lt.f32.partialorder %v9875_v32, %v8126_v62  ;;  %vm2279_vm6 = vcmp.lt.f32.partialorder %v9899_v1, %v8046_v18  ;;  %v11139_v55 = vadd.f32 %v1462_v26, %v10201_v51  ;;  %v1475_v15 = vpop.f32.mrf.mxu3  ;;  %v7605_v51 = vld [vmem:[%s7682_s23 + $0x68] sm:$0xff]  ;;  %v7614_v26 = vld [vmem:[%s7682_s23 + $0x38] sm:$0xff] }
 0x1c8   : > { %vm10923_vm13 = vmpackc.low %vm2314_vm0, %vm2306_vm5  ;;  %2701 = vmatmul.bf16.vlgmr.msra.gmra.mxu2 %v7631_v44  ;;  %vm2290_vm5 = vcmp.lt.f32.partialorder %v9875_v32, %v8154_v63  ;;  %vm2298_vm0 = vcmp.lt.f32.partialorder %v9877_v43, %v8154_v63  ;;  %2714 = vmatmul.bf16.vlgmr.msra.gmra.mxu3 %v7631_v44  ;;  %v7634_v32 = vmov 7   ;;  %v11162_v27 = vadd.f32 %v1475_v15, %v10226_v11 }
 0x1c9   : > { %6482 = vmatpush.bf16.msk.msrb.mxu2 %vm15180_vm15, %v7629_v61  ;;  %6498 = vmatpush.bf16.msk.msrb.mxu3 %vm15183_vm2, %v7629_v61  ;;  %vm10938_vm15 = vmpackc.low %vm2295_vm9, %vm2287_vm1  ;;  %vm15188_vm2 = vnez %v15166_v3  ;;  %vm2271_vm9 = vcmp.lt.f32.partialorder %v9702_v4, %v8046_v18  ;;  %v15264_v20 = vmov 0  ;;  %v15275_v15 = vmov 0 }
 0x1ca   : > { %vm10958_vm1 = vmpackc.low %vm2296_vm12, %vm2288_vm7  ;;  %vm15192_vm7 = vcmp.lt.f32.partialorder %v9877_v43, %v8126_v62  ;;  %7580 = vset.pattern.permute.xlu1 %v7634_v32  ;;  %v1436_v43 = vpop.f32.mrf.mxu0  ;;  %7582 = vset.pattern.permute.xlu0 %v7634_v32  ;;  %v15312_v3 = vmov 0 }
 0x1cb   : > { %6452 = vmatpush.bf16.msk.msrb.mxu0 %vm15188_vm2, %v7629_v61  ;;  %v15190_v59 = vsel %vm10958_vm1, 4294967295, %v15189_v59  ;;  %6468 = vmatpush.bf16.msk.msrb.mxu1 %vm10845_vm8, %v7629_v61  ;;  %vm15191_vm2 = vnez %v15171_v56  ;;  %vm10978_vm12 = vmpackc.low %vm15192_vm7, %vm2289_vm11  ;;  %vm2272_vm1 = vcmp.lt.f32.partialorder %v9702_v4, %v8083_v6  ;;  %vm2273_vm11 = vcmp.lt.f32.partialorder %v9702_v4, %v8126_v62 }
 0x1cc   : > { %vm2281_vm7 = vcmp.lt.f32.partialorder %v9899_v1, %v8126_v62  ;;  %vm10998_vm8 = vmpackc.low %vm2279_vm6, %vm2271_vm9  ;;  %4708 = vperm.xlu1 %7580, %v7602_v12   ;;  %v11011_v10 = vadd.f32 %v1436_v43, %v10095_v22  ;;  %vm15199_vm6 = vcmp.lt.f32.partialorder %v9899_v1, %v8083_v6  ;;  %vm2255_vm9 = vcmp.lt.f32.partialorder %v9719_v14, %v8046_v18  ;;  %v11031_v22 = vpop.permute.xlu2 %2828  ;;  %v11100_v57 = vpop.permute.xlu0 %2836  ;;  %v7607_v12 = vld [vmem:[%s7682_s23 + $0x58] sm:$0xff] }
 0x1cd   : > { %6484 = vmatpush.bf16.msk.msrb.mxu2 %vm15191_vm2, %v7629_v61  ;;  %6500 = vmatpush.bf16.msk.msrb.mxu3 %vm10864_vm3, %v7629_v61  ;;  %vm10989_vm2 = vmpackc.low %vm2298_vm0, %vm2290_vm5  ;;  %vm2274_vm3 = vcmp.lt.f32.partialorder %v9702_v4, %v8154_v63  ;;  %vm2282_vm5 = vcmp.lt.f32.partialorder %v9899_v1, %v8154_v63  ;;  %v7604_v1 = vld [vmem:[%s7682_s23 + $0x60] sm:$0xff]  ;;  %v1451_v11 = vpop.f32.mrf.mxu1  ;;  %v7608_v4 = vld [vmem:[%s7682_s23 + $0x50] sm:$0xff]  ;;  %v11689_v56 = vpop.permute.xlu1 %3408 }
 0x1ce   : > { %vm11019_vm0 = vmpackc.low %vm15199_vm6, %vm2272_vm1  ;;  %vm2264_vm6 = vcmp.lt.f32.partialorder %v9700_v23, %v8083_v6  ;;  %4700 = vperm.xlu0 %7582, %v7604_v1   ;;  %7581 = vset.pattern.permute.xlu2 %v7634_v32  ;;  %v15240_v32 = vmov 0 }
 0x1cf   : > { %6454 = vmatpush.bf16.msk.msrb.mxu0 %vm10880_vm10, %v7629_v61  ;;  %vm2263_vm10 = vcmp.lt.f32.partialorder %v9700_v23, %v8046_v18  ;;  %6470 = vmatpush.bf16.msk.msrb.mxu1 %vm10894_vm14, %v7629_v61  ;;  %vm11048_vm1 = vmpackc.low %vm2281_vm7, %vm2273_vm11  ;;  %vm2256_vm14 = vcmp.lt.f32.partialorder %v9719_v14, %v8083_v6  ;;  %vm2265_vm7 = vcmp.lt.f32.partialorder %v9700_v23, %v8126_v62  ;;  %v1477_v13 = vpop.f32.mrf.mxu3 }
 0x1d0   : > { %vm11092_vm11 = vmpackc.low %vm2264_vm6, %vm2256_vm14  ;;  %vm2240_vm6 = vcmp.lt.f32.partialorder %v9556_v8, %v8083_v6 }
 0x1d1   : > { %6486 = vmatpush.bf16.msk.msrb.mxu2 %vm10911_vm4, %v7629_v61  ;;  %6502 = vmatpush.bf16.msk.msrb.mxu3 %vm10923_vm13, %v7629_v61  ;;  %vm11065_vm4 = vmpackc.low %vm2282_vm5, %vm2274_vm3  ;;  %vm2258_vm3 = vcmp.lt.f32.partialorder %v9719_v14, %v8154_v63  ;;  %vm15210_vm5 = vnez %v15190_v59 }
 0x1d2   : > { %vm11080_vm13 = vmpackc.low %vm2263_vm10, %vm2255_vm9  ;;  %vm2239_vm9 = vcmp.lt.f32.partialorder %v9556_v8, %v8046_v18  ;;  %vm2248_vm10 = vcmp.lt.f32.partialorder %v9532_v60, %v8083_v6 }
 0x1d3   : > { %6456 = vmatpush.bf16.msk.msrb.mxu0 %vm10938_vm15, %v7629_v61  ;;  %6472 = vmatpush.bf16.msk.msrb.mxu1 %vm15210_vm5, %v7629_v61  ;;  %vm15211_vm15 = vcmp.lt.f32.partialorder %v9719_v14, %v8126_v62  ;;  %v1438_v14 = vpop.f32.mrf.mxu0 }
 0x1d4   : > { %vm11111_vm14 = vmpackc.low %vm2265_vm7, %vm15211_vm15  ;;  %vm2250_vm15 = vcmp.lt.f32.partialorder %v9532_v60, %v8154_v63  ;;  %4704 = vperm.xlu1 %7580, %v7605_v51   ;;  %v11222_v59 = vpop.permute.xlu2 %2832  ;;  %v15322_v14 = vmov 0  ;;  %v15393_v51 = vmov 0 }
 0x1d5   : > { %6488 = vmatpush.bf16.msk.msrb.mxu2 %vm10978_vm12, %v7629_v61  ;;  %6504 = vmatpush.bf16.msk.msrb.mxu3 %vm10989_vm2, %v7629_v61  ;;  %vm15214_vm12 = vcmp.lt.f32.partialorder %v9700_v23, %v8154_v63  ;;  %vm15217_vm2 = vcmp.lt.f32.partialorder %v9532_v60, %v8046_v18  ;;  %v15278_v23 = vmov 0 }
 0x1d6   : > { %vm11130_vm7 = vmpackc.low %vm15214_vm12, %vm2258_vm3  ;;  %vm2242_vm12 = vcmp.lt.f32.partialorder %v9556_v8, %v8154_v63  ;;  %4688 = vperm.xlu0 %7582, %v9741_v48   ;;  %v15244_v48 = vmov 0 }
 0x1d7   : > { %vm11147_vm3 = vmpackc.low %vm15217_vm2, %vm2239_vm9  ;;  %6458 = vmatpush.bf16.msk.msrb.mxu0 %vm10998_vm8, %v7629_v61  ;;  %6474 = vmatpush.bf16.msk.msrb.mxu1 %vm11019_vm0, %v7629_v61  ;;  %vm2225_vm8 = vcmp.lt.f32.partialorder %v9403_v34, %v8126_v62  ;;  %vm2233_vm0 = vcmp.lt.f32.partialorder %v9534_v5, %v8126_v62 }
 0x1d8   : > { %vm11170_vm9 = vmpackc.low %vm2248_vm10, %vm2240_vm6  ;;  %vm15222_vm10 = vcmp.lt.f32.partialorder %v9556_v8, %v8126_v62  ;;  %vm15223_vm6 = vcmp.lt.f32.partialorder %v9532_v60, %v8126_v62  ;;  %v7606_v8 = vld [vmem:[%s7682_s23 + $0x78] sm:$0xff] }
 0x1d9   : > { %6490 = vmatpush.bf16.msk.msrb.mxu2 %vm11048_vm1, %v7629_v61  ;;  %vm11192_vm5 = vmpackc.low %vm15223_vm6, %vm15222_vm10  ;;  %6506 = vmatpush.bf16.msk.msrb.mxu3 %vm11065_vm4, %v7629_v61  ;;  %vm15228_vm4 = vcmp.lt.f32.partialorder %v9403_v34, %v8046_v18  ;;  %vm15232_vm10 = vcmp.lt.f32.partialorder %v9403_v34, %v8083_v6  ;;  %vm2965_vm6 = vcmp.lt.f32.partialorder %v11119_v33, %v7830_v40 }
 0x1da   : > { %vm11211_vm1 = vmpackc.low %vm2250_vm15, %vm2242_vm12  ;;  %vm15229_vm15 = vcmp.lt.f32.partialorder %v9534_v5, %v8046_v18  ;;  %4712 = vperm.xlu2 %7581, %v7606_v8  }
 0x1db   : > { %vm11230_vm12 = vmpackc.low %vm15229_vm15, %vm15228_vm4  ;;  %6460 = vmatpush.bf16.msk.msrb.mxu0 %vm11080_vm13, %v7629_v61  ;;  %vm15233_vm4 = vcmp.lt.f32.partialorder %v9534_v5, %v8083_v6  ;;  %vm2957_vm13 = vcmp.lt.f32.partialorder %v11100_v57, %v7830_v40  ;;  %6476 = vmatpush.bf16.msk.msrb.mxu1 %vm11092_vm11, %v7629_v61  ;;  %vm15243_vm11 = vcmp.lt.f32.partialorder %v11119_v33, %v7822_v37 }
 0x1dc   : > { %vm11248_vm15 = vmpackc.low %vm15233_vm4, %vm15232_vm10  ;;  %vm15242_vm4 = vcmp.lt.f32.partialorder %v11100_v57, %v7822_v37  ;;  %4696 = vperm.xlu1 %7580, %v7607_v12   ;;  %v7612_v12 = vld [vmem:[%s7682_s23 + $0x28] sm:$0xff] }
 0x1dd   : > { %v15235_v46 = vsel %vm11248_vm15, 4294967295, %v15234_v46  ;;  %vm11258_vm2 = vmpackc.low %vm2233_vm0, %vm2225_vm8  ;;  %6492 = vmatpush.bf16.msk.msrb.mxu2 %vm11111_vm14, %v7629_v61  ;;  %vm15238_vm8 = vcmp.lt.f32.partialorder %v9403_v34, %v8154_v63  ;;  %vm15239_vm0 = vcmp.lt.f32.partialorder %v9534_v5, %v8154_v63  ;;  %vm2958_vm14 = vcmp.lt.f32.partialorder %v11100_v57, %v7835_v41  ;;  %6508 = vmatpush.bf16.msk.msrb.mxu3 %vm11130_vm7, %v7629_v61  ;;  %v1464_v5 = vpop.f32.mrf.mxu2 }
 0x1de   : > { %v15237_v36 = vsel %vm11258_vm2, 4294967295, %v15236_v36  ;;  %vm11279_vm10 = vmpackc.low %vm15239_vm0, %vm15238_vm8  ;;  %vm2966_vm15 = vcmp.lt.f32.partialorder %v11119_v33, %v7835_v41  ;;  %vm15246_vm8 = vcmp.lt.f32.partialorder %v11100_v57, %v7825_v38  ;;  %vm15247_vm0 = vcmp.lt.f32.partialorder %v11119_v33, %v7825_v38  ;;  %4668 = vperm.xlu0 %7582, %v7610_v16   ;;  %v11774_v16 = vpop.permute.xlu2 %3412 }
 0x1df   : > { %v15241_v32 = vsel %vm11279_vm10, 4294967295, %v15240_v32  ;;  %vm11289_vm2 = vmpackc.low %vm15243_vm11, %vm15242_vm4  ;;  %vm2939_vm11 = vcmp.lt.f32.partialorder %v11031_v22, %v7822_v37  ;;  %vm2940_vm7 = vcmp.lt.f32.partialorder %v11031_v22, %v7825_v38  ;;  %6462 = vmatpush.bf16.msk.msrb.mxu0 %vm11147_vm3, %v7629_v61  ;;  %6478 = vmatpush.bf16.msk.msrb.mxu1 %vm11170_vm9, %v7629_v61  ;;  %vm2923_vm9 = vcmp.lt.f32.partialorder %v10931_v21, %v7822_v37  ;;  %v1488_v11 = vpop.f32.mrf.mxu0 }
 0x1e0   : > { %v15245_v48 = vsel %vm11289_vm2, 4294967295, %v15244_v48  ;;  %vm11306_vm4 = vmpackc.low %vm15247_vm0, %vm15246_vm8  ;;  %vm2947_vm2 = vcmp.lt.f32.partialorder %v11222_v59, %v7822_v37  ;;  %vm2948_vm8 = vcmp.lt.f32.partialorder %v11222_v59, %v7825_v38  ;;  %v11503_v60 = vadd.f32 %v1488_v11, %v10550_v28 }
 0x1e1   : > { %vm11314_vm10 = vmpackc.low %vm2965_vm6, %vm2957_vm13  ;;  %vm2941_vm6 = vcmp.lt.f32.partialorder %v11031_v22, %v7830_v40  ;;  %vm2949_vm13 = vcmp.lt.f32.partialorder %v11222_v59, %v7830_v40  ;;  %6494 = vmatpush.bf16.msk.msrb.mxu2 %vm11192_vm5, %v7629_v61  ;;  %6510 = vmatpush.bf16.msk.msrb.mxu3 %vm11211_vm1, %v7629_v61  ;;  %vm15263_vm1 = vnez %v15237_v36  ;;  %v7611_v36 = vld [vmem:[%s7682_s23 + $0x40] sm:$0xff]  ;;  %v15427_v34 = vmov 0 }
 0x1e2   : > { %vm11326_vm0 = vmpackc.low %vm2966_vm15, %vm2958_vm14  ;;  %vm2942_vm15 = vcmp.lt.f32.partialorder %v11031_v22, %v7835_v41  ;;  %vm2950_vm14 = vcmp.lt.f32.partialorder %v11222_v59, %v7835_v41  ;;  %4692 = vperm.xlu2 %7581, %v7608_v4  }
 0x1e3   : > { %vm11343_vm3 = vmpackc.low %vm2947_vm2, %vm2939_vm11  ;;  %vm2931_vm2 = vcmp.lt.f32.partialorder %v10946_v2, %v7822_v37  ;;  %6464 = vmatpush.bf16.msk.msrb.mxu0 %vm11230_vm12, %v7629_v61  ;;  %vm2926_vm12 = vcmp.lt.f32.partialorder %v10931_v21, %v7835_v41 }
 0x1e4   : > { %v15255_v9 = vsel %vm11343_vm3, 4294967295, %v15254_v9  ;;  %vm11357_vm5 = vmpackc.low %vm2948_vm8, %vm2940_vm7  ;;  %vm2932_vm3 = vcmp.lt.f32.partialorder %v10946_v2, %v7825_v38  ;;  %vm2925_vm8 = vcmp.lt.f32.partialorder %v10931_v21, %v7830_v40  ;;  %4676 = vperm.xlu1 %7580, %v7609_v50   ;;  %v1501_v8 = vpop.f32.mrf.mxu1 }
 0x1e5   : > { %vm11365_vm11 = vmpackc.low %vm2949_vm13, %vm2941_vm6  ;;  %vm2933_vm6 = vcmp.lt.f32.partialorder %v10946_v2, %v7830_v40  ;;  %vm15262_vm13 = vnez %v15235_v46  ;;  %6496 = vmatpush.bf16.msk.msrb.mxu2 %vm15263_vm1, %v7629_v61  ;;  %vm2907_vm1 = vcmp.lt.f32.partialorder %v10802_v53, %v7822_v37  ;;  %v11527_v28 = vadd.f32 %v1501_v8, %v10575_v47 }
 0x1e6   : > { %v15259_v24 = vsel %vm11365_vm11, 4294967295, %v15258_v24  ;;  %vm11377_vm7 = vmpackc.low %vm2950_vm14, %vm2942_vm15  ;;  %6480 = vmatpush.bf16.msk.msrb.mxu1 %vm15262_vm13, %v7629_v61  ;;  %vm2934_vm15 = vcmp.lt.f32.partialorder %v10946_v2, %v7835_v41  ;;  %vm15266_vm14 = vnez %v15241_v32  ;;  %vm15267_vm13 = vnez %v15245_v48  ;;  %2727 = vmatmul.bf16.vlgmr.msrb.gmra.mxu0 %v7631_v44 }
 0x1e7   : > { %vm11391_vm11 = vmpackc.low %vm2931_vm2, %vm2923_vm9  ;;  %6512 = vmatpush.bf16.msk.msrb.mxu3 %vm15266_vm14, %v7629_v61  ;;  %6642 = vmatpush.bf16.msk.msra.mxu0 %vm15267_vm13, %v7629_v61  ;;  %vm15268_vm9 = vcmp.lt.f32.partialorder %v10931_v21, %v7825_v38  ;;  %vm2916_vm13 = vcmp.lt.f32.partialorder %v10872_v7, %v7825_v38  ;;  %v15290_v32 = vmov 0  ;;  %v15292_v47 = vmov 0  ;;  %v1514_v43 = vpop.f32.mrf.mxu2 }
 0x1e8   : > { %v15265_v20 = vsel %vm11391_vm11, 4294967295, %v15264_v20  ;;  %vm11408_vm2 = vmpackc.low %vm2932_vm3, %vm15268_vm9  ;;  %vm2915_vm11 = vcmp.lt.f32.partialorder %v10872_v7, %v7822_v37  ;;  %vm2908_vm3 = vcmp.lt.f32.partialorder %v10802_v53, %v7825_v38  ;;  %2753 = vmatmul.bf16.vlgmr.msrb.gmra.mxu2 %v7631_v44  ;;  %v15294_v48 = vmov 0 }
 0x1e9   : > { %6674 = vmatpush.bf16.msk.msra.mxu2 %vm11314_vm10, %v7629_v61  ;;  %vm11422_vm14 = vmpackc.low %vm2933_vm6, %vm2925_vm8  ;;  %vm2909_vm10 = vcmp.lt.f32.partialorder %v10802_v53, %v7830_v40  ;;  %vm2917_vm8 = vcmp.lt.f32.partialorder %v10872_v7, %v7830_v40  ;;  %2740 = vmatmul.bf16.vlgmr.msrb.gmra.mxu1 %v7631_v44  ;;  %v11606_v49 = vadd.f32 %v1514_v43, %v10668_v39  ;;  %v1490_v39 = vpop.f32.mrf.mxu0  ;;  %v15398_v8 = vmov 0 }
 0x1ea   : > { %6658 = vmatpush.bf16.msk.msra.mxu1 %vm11306_vm4, %v7629_v61  ;;  %vm11434_vm4 = vmpackc.low %vm2934_vm15, %vm2926_vm12  ;;  %vm2918_vm12 = vcmp.lt.f32.partialorder %v10872_v7, %v7835_v41  ;;  %2766 = vmatmul.bf16.vlgmr.msrb.gmra.mxu3 %v7631_v44  ;;  %vm15277_vm15 = vnez %v15255_v9  ;;  %v1527_v9 = vpop.f32.mrf.mxu3  ;;  %v15431_v43 = vmov 0 }
 0x1eb   : > { %6690 = vmatpush.bf16.msk.msra.mxu3 %vm11326_vm0, %v7629_v61  ;;  %vm11444_vm6 = vmpackc.low %vm2915_vm11, %vm2907_vm1  ;;  %vm2910_vm0 = vcmp.lt.f32.partialorder %v10802_v53, %v7835_v41  ;;  %6644 = vmatpush.bf16.msk.msra.mxu0 %vm15277_vm15, %v7629_v61  ;;  %vm2891_vm11 = vcmp.lt.f32.partialorder %v10716_v0, %v7822_v37  ;;  %vm2899_vm1 = vcmp.lt.f32.partialorder %v10792_v35, %v7822_v37 }
 0x1ec   : > { %v15276_v15 = vsel %vm11444_vm6, 4294967295, %v15275_v15  ;;  %vm11456_vm9 = vmpackc.low %vm2916_vm13, %vm2908_vm3  ;;  %vm15280_vm6 = vnez %v15259_v24  ;;  %vm2892_vm3 = vcmp.lt.f32.partialorder %v10716_v0, %v7825_v38  ;;  %vm2900_vm13 = vcmp.lt.f32.partialorder %v10792_v35, %v7825_v38  ;;  %4684 = vperm.xlu2 %7581, %v7611_v36   ;;  %4672 = vperm.xlu1 %7580, %v7612_v12   ;;  %v7613_v24 = vld [vmem:[%s7682_s23 + $0x18] sm:$0xff] }
 0x1ed   : > { %v15279_v23 = vsel %vm11456_vm9, 4294967295, %v15278_v23  ;;  %6676 = vmatpush.bf16.msk.msra.mxu2 %vm15280_vm6, %v7629_v61  ;;  %vm11470_vm15 = vmpackc.low %vm2917_vm8, %vm2909_vm10  ;;  %vm2901_vm10 = vcmp.lt.f32.partialorder %v10792_v35, %v7830_v40  ;;  %vm2902_vm6 = vcmp.lt.f32.partialorder %v10792_v35, %v7835_v41  ;;  %4664 = vperm.xlu0 %7582, %v7613_v24   ;;  %v11629_v4 = vadd.f32 %v1527_v9, %v10693_v17  ;;  %v1503_v17 = vpop.f32.mrf.mxu1 }
 0x1ee   : > { %6660 = vmatpush.bf16.msk.msra.mxu1 %vm11357_vm5, %v7629_v61  ;;  %vm11481_vm9 = vmpackc.low %vm2918_vm12, %vm2910_vm0  ;;  %vm2893_vm5 = vcmp.lt.f32.partialorder %v10716_v0, %v7830_v40  ;;  %vm15287_vm0 = vnez %v15265_v20  ;;  %v15337_v36 = vmov 0   ;;  %v15378_v20 = vmov 0 }
 0x1ef   : > { %6692 = vmatpush.bf16.msk.msra.mxu3 %vm11377_vm7, %v7629_v61  ;;  %vm11490_vm8 = vmpackc.low %vm2899_vm1, %vm2891_vm11  ;;  %vm2894_vm7 = vcmp.lt.f32.partialorder %v10716_v0, %v7835_v41  ;;  %6646 = vmatpush.bf16.msk.msra.mxu0 %vm15287_vm0, %v7629_v61  ;;  %vm2875_vm11 = vcmp.lt.f32.partialorder %v10553_v30, %v7822_v37  ;;  %vm2883_vm1 = vcmp.lt.f32.partialorder %v10632_v25, %v7822_v37  ;;  %v1516_v29 = vpop.f32.mrf.mxu2  ;;  %v15448_v24 = vmov 0 }
 0x1f0   : > { %vm11511_vm12 = vmpackc.low %vm2900_vm13, %vm2892_vm3  ;;  %vm2884_vm13 = vcmp.lt.f32.partialorder %v10632_v25, %v7825_v38  ;;  %v15499_v9 = vmov 0 }
 0x1f1   : > { %6678 = vmatpush.bf16.msk.msra.mxu2 %vm11422_vm14, %v7629_v61  ;;  %vm11535_vm3 = vmpackc.low %vm2901_vm10, %vm2893_vm5  ;;  %vm2877_vm5 = vcmp.lt.f32.partialorder %v10553_v30, %v7830_v40  ;;  %vm2885_vm10 = vcmp.lt.f32.partialorder %v10632_v25, %v7830_v40 }
 0x1f2   : > { %6662 = vmatpush.bf16.msk.msra.mxu1 %vm11408_vm2, %v7629_v61  ;;  %v15291_v32 = vsel %vm11535_vm3, 4294967295, %v15290_v32  ;;  %vm2876_vm2 = vcmp.lt.f32.partialorder %v10553_v30, %v7825_v38  ;;  %vm11552_vm14 = vmpackc.low %vm2902_vm6, %vm2894_vm7  ;;  %vm2886_vm7 = vcmp.lt.f32.partialorder %v10632_v25, %v7835_v41  ;;  %vm15296_vm6 = vnez %v15276_v15  ;;  %v1529_v46 = vpop.f32.mrf.mxu3 }
 0x1f3   : > { %6694 = vmatpush.bf16.msk.msra.mxu3 %vm11434_vm4, %v7629_v61  ;;  %v15293_v47 = vsel %vm11552_vm14, 4294967295, %v15292_v47  ;;  %vm11560_vm0 = vmpackc.low %vm2883_vm1, %vm2875_vm11  ;;  %vm2878_vm4 = vcmp.lt.f32.partialorder %v10553_v30, %v7835_v41  ;;  %6648 = vmatpush.bf16.msk.msra.mxu0 %vm15296_vm6, %v7629_v61  ;;  %vm2859_vm11 = vcmp.lt.f32.partialorder %v10616_v54, %v7822_v37  ;;  %vm2867_vm1 = vcmp.lt.f32.partialorder %v10484_v45, %v7822_v37 }
 0x1f4   : > { %v15295_v48 = vsel %vm11560_vm0, 4294967295, %v15294_v48  ;;  %vm11571_vm14 = vmpackc.low %vm2884_vm13, %vm2876_vm2  ;;  %vm15299_vm0 = vnez %v15279_v23  ;;  %vm2860_vm2 = vcmp.lt.f32.partialorder %v10616_v54, %v7825_v38  ;;  %vm2868_vm13 = vcmp.lt.f32.partialorder %v10484_v45, %v7825_v38  ;;  %4680 = vperm.xlu2 %7581, %v7614_v26   ;;  %4652 = vperm.xlu1 %7580, %v11028_v52   ;;  %v11788_v52 = vpop.permute.xlu0 %3404 }
 0x1f5   : > { %6680 = vmatpush.bf16.msk.msra.mxu2 %vm11470_vm15, %v7629_v61  ;;  %vm11585_vm3 = vmpackc.low %vm2885_vm10, %vm2877_vm5  ;;  %vm2861_vm15 = vcmp.lt.f32.partialorder %v10616_v54, %v7830_v40  ;;  %vm2869_vm5 = vcmp.lt.f32.partialorder %v10484_v45, %v7830_v40  ;;  %vm2862_vm10 = vcmp.lt.f32.partialorder %v10616_v54, %v7835_v41  ;;  %v15314_v15 = vmov 0  ;;  %7583 = vset.pattern.permute.xlu0 %v15337_v36 }
 0x1f6   : > { %6664 = vmatpush.bf16.msk.msra.mxu1 %vm15299_vm0, %v7629_v61  ;;  %vm11596_vm0 = vmpackc.low %vm2886_vm7, %vm2878_vm4  ;;  %vm2870_vm4 = vcmp.lt.f32.partialorder %v10484_v45, %v7835_v41  ;;  %vm2843_vm7 = vcmp.lt.f32.partialorder %v10344_v31, %v7822_v37  ;;  %v15382_v26 = vmov 0  ;;  %v15401_v46 = vmov 0 }
 0x1f7   : > { %6696 = vmatpush.bf16.msk.msra.mxu3 %vm11481_vm9, %v7629_v61  ;;  %vm11614_vm9 = vmpackc.low %vm2867_vm1, %vm2859_vm11  ;;  %6650 = vmatpush.bf16.msk.msra.mxu0 %vm11490_vm8, %v7629_v61  ;;  %vm2851_vm11 = vcmp.lt.f32.partialorder %v10412_v19, %v7822_v37  ;;  %vm2845_vm1 = vcmp.lt.f32.partialorder %v10344_v31, %v7830_v40  ;;  %vm15317_vm8 = vcmp.lt.f32.partialorder %v10344_v31, %v7825_v38 }
 0x1f8   : > { %vm11637_vm6 = vmpackc.low %vm2868_vm13, %vm2860_vm2  ;;  %vm15308_vm2 = vnez %v15291_v32  ;;  %v15339_v32 = vmov 0 }
 0x1f9   : > { %6682 = vmatpush.bf16.msk.msra.mxu2 %vm15308_vm2, %v7629_v61  ;;  %vm11659_vm13 = vmpackc.low %vm2869_vm5, %vm2861_vm15  ;;  %vm15311_vm2 = vnez %v15293_v47  ;;  %vm15318_vm5 = vcmp.lt.f32.partialorder %v10412_v19, %v7825_v38  ;;  %v7615_v47 = vld [vmem:[%s7682_s23 + $0x10] sm:$0xff] }
 0x1fa   : > { %6666 = vmatpush.bf16.msk.msra.mxu1 %vm11511_vm12, %v7629_v61  ;;  %vm11678_vm15 = vmpackc.low %vm2870_vm4, %vm2862_vm10  ;;  %vm2960_vm4 = vcmp.lt.f32.partialorder %v11100_v57, %v8083_v6  ;;  %vm15316_vm12 = vnez %v15295_v48  ;;  %v11861_v48 = vpop.permute.xlu1 %3460 }
 0x1fb   : > { %6698 = vmatpush.bf16.msk.msra.mxu3 %vm15311_vm2, %v7629_v61  ;;  %v15313_v3 = vsel %vm11678_vm15, 4294967295, %v15312_v3  ;;  %vm11697_vm10 = vmpackc.low %vm2851_vm11, %vm2843_vm7  ;;  %vm2968_vm2 = vcmp.lt.f32.partialorder %v11119_v33, %v8083_v6  ;;  %6652 = vmatpush.bf16.msk.msra.mxu0 %vm15316_vm12, %v7629_v61  ;;  %vm15321_vm11 = vcmp.lt.f32.partialorder %v10412_v19, %v7830_v40  ;;  %vm2969_vm15 = vcmp.lt.f32.partialorder %v11119_v33, %v8126_v62 }
 0x1fc   : > { %v15315_v15 = vsel %vm11697_vm10, 4294967295, %v15314_v15  ;;  %vm11714_vm7 = vmpackc.low %vm15318_vm5, %vm15317_vm8  ;;  %vm15324_vm8 = vcmp.lt.f32.partialorder %v10344_v31, %v7835_v41  ;;  %4660 = vperm.xlu2 %7581, %v7615_v47   ;;  %v11935_v12 = vpop.permute.xlu0 %3452  ;;  %7584 = vset.pattern.permute.xlu1 %v15337_v36 }
 0x1fd   : > { %vm11724_vm10 = vmpackc.low %vm15321_vm11, %vm2845_vm1  ;;  %6684 = vmatpush.bf16.msk.msra.mxu2 %vm11585_vm3, %v7629_v61  ;;  %vm15325_vm1 = vcmp.lt.f32.partialorder %v10412_v19, %v7835_v41  ;;  %vm15328_vm11 = vcmp.lt.f32.partialorder %v11100_v57, %v8046_v18  ;;  %vm2962_vm3 = vcmp.lt.f32.partialorder %v11100_v57, %v8154_v63 }
 0x1fe   : > { %v15323_v14 = vsel %vm11724_vm10, 4294967295, %v15322_v14  ;;  %6668 = vmatpush.bf16.msk.msra.mxu1 %vm11571_vm14, %v7629_v61  ;;  %vm11744_vm5 = vmpackc.low %vm15325_vm1, %vm15324_vm8  ;;  %vm15329_vm14 = vcmp.lt.f32.partialorder %v11119_v33, %v8046_v18  ;;  %vm2943_vm1 = vcmp.lt.f32.partialorder %v11031_v22, %v8046_v18 }
 0x1ff   : > { %vm11754_vm12 = vmpackc.low %vm15329_vm14, %vm15328_vm11  ;;  %6700 = vmatpush.bf16.msk.msra.mxu3 %vm11596_vm0, %v7629_v61  ;;  %vm2951_vm11 = vcmp.lt.f32.partialorder %v11222_v59, %v8046_v18  ;;  %vm15334_vm14 = vcmp.lt.f32.partialorder %v11100_v57, %v8126_v62  ;;  %6654 = vmatpush.bf16.msk.msra.mxu0 %vm11614_vm9, %v7629_v61  ;;  %vm2953_vm0 = vcmp.lt.f32.partialorder %v11222_v59, %v8126_v62  ;;  %v15341_v57 = vmov 0 }
 0x200   : > { %vm11765_vm8 = vmpackc.low %vm2968_vm2, %vm2960_vm4  ;;  %vm2952_vm4 = vcmp.lt.f32.partialorder %v11222_v59, %v8083_v6 }
 0x201   : > { %vm11779_vm10 = vmpackc.low %vm2969_vm15, %vm15334_vm14  ;;  %vm15338_vm15 = vcmp.lt.f32.partialorder %v11119_v33, %v8154_v63  ;;  %vm2945_vm14 = vcmp.lt.f32.partialorder %v11031_v22, %v8126_v62  ;;  %6686 = vmatpush.bf16.msk.msra.mxu2 %vm11659_vm13, %v7629_v61  ;;  %vm15344_vm13 = vcmp.lt.f32.partialorder %v11031_v22, %v8083_v6  ;;  %v15345_v33 = vmov 0 }
 0x202   : > { %vm11799_vm2 = vmpackc.low %vm15338_vm15, %vm2962_vm3  ;;  %6670 = vmatpush.bf16.msk.msra.mxu1 %vm11637_vm6, %v7629_v61  ;;  %vm2946_vm3 = vcmp.lt.f32.partialorder %v11031_v22, %v8154_v63  ;;  %vm2954_vm6 = vcmp.lt.f32.partialorder %v11222_v59, %v8154_v63  ;;  %vm15343_vm15 = vnez %v15313_v3  ;;  %v15347_v59 = vmov 0  ;;  %v2052_v39 = vpop.f32.mrf.mxu0  ;;  %v12022_v3 = vpop.permute.xlu1 %3456 }
 0x203   : > { %v15340_v32 = vsel %vm11799_vm2, 4294967295, %v15339_v32  ;;  %vm11819_vm9 = vmpackc.low %vm2951_vm11, %vm2943_vm1  ;;  %6702 = vmatpush.bf16.msk.msra.mxu3 %vm15343_vm15, %v7629_v61  ;;  %vm2927_vm1 = vcmp.lt.f32.partialorder %v10931_v21, %v8046_v18  ;;  %vm2935_vm11 = vcmp.lt.f32.partialorder %v10946_v2, %v8046_v18  ;;  %vm2928_vm15 = vcmp.lt.f32.partialorder %v10931_v21, %v8083_v6  ;;  %v2065_v17 = vpop.f32.mrf.mxu1 }
 0x204   : > { %v15342_v57 = vsel %vm11819_vm9, 4294967295, %v15341_v57  ;;  %vm11833_vm2 = vmpackc.low %vm2952_vm4, %vm15344_vm13  ;;  %vm2936_vm4 = vcmp.lt.f32.partialorder %v10946_v2, %v8083_v6  ;;  %vm15349_vm13 = vnez %v15315_v15  ;;  %v12006_v1 = vadd.f32 %v2052_v39, %v11011_v10  ;;  %v12099_v23 = vpop.permute.xlu0 %3448 }
 0x205   : > { %v15346_v33 = vsel %vm11833_vm2, 4294967295, %v15345_v33  ;;  %vm11842_vm9 = vmpackc.low %vm2953_vm0, %vm2945_vm14  ;;  %6656 = vmatpush.bf16.msk.msra.mxu0 %vm15349_vm13, %v7629_v61  ;;  %vm2929_vm0 = vcmp.lt.f32.partialorder %v10931_v21, %v8126_v62  ;;  %vm2937_vm14 = vcmp.lt.f32.partialorder %v10946_v2, %v8126_v62  ;;  %vm2938_vm13 = vcmp.lt.f32.partialorder %v10946_v2, %v8154_v63 }
 0x206   : > { %v15348_v59 = vsel %vm11842_vm9, 4294967295, %v15347_v59  ;;  %vm11853_vm2 = vmpackc.low %vm2954_vm6, %vm2946_vm3  ;;  %6672 = vmatpush.bf16.msk.msra.mxu1 %vm11714_vm7, %v7629_v61  ;;  %vm15352_vm9 = vnez %v15323_v14  ;;  %vm2930_vm6 = vcmp.lt.f32.partialorder %v10931_v21, %v8154_v63  ;;  %v11920_v21 = vpop.permute.xlu2 %3464  ;;  %v12031_v10 = vadd.f32 %v2065_v17, %v11040_v58 }
 0x207   : > { %6688 = vmatpush.bf16.msk.msra.mxu2 %vm15352_vm9, %v7629_v61  ;;  %vm11869_vm3 = vmpackc.low %vm2935_vm11, %vm2927_vm1  ;;  %6704 = vmatpush.bf16.msk.msra.mxu3 %vm11744_vm5, %v7629_v61  ;;  %vm2911_vm9 = vcmp.lt.f32.partialorder %v10802_v53, %v8046_v18  ;;  %vm2919_vm1 = vcmp.lt.f32.partialorder %v10872_v7, %v8046_v18  ;;  %vm2912_vm5 = vcmp.lt.f32.partialorder %v10802_v53, %v8083_v6  ;;  %v15507_v39 = vmov 0 }
 0x208   : > { %vm11883_vm7 = vmpackc.low %vm2936_vm4, %vm2928_vm15  ;;  %vm2920_vm11 = vcmp.lt.f32.partialorder %v10872_v7, %v8083_v6  ;;  %3299 = vmatmul.bf16.vlgmr.msra.gmra.mxu0 %v7631_v44  ;;  %vm2913_vm15 = vcmp.lt.f32.partialorder %v10802_v53, %v8126_v62  ;;  %vm2921_vm4 = vcmp.lt.f32.partialorder %v10872_v7, %v8126_v62 }
 0x209   : > { %6706 = vmatpush.bf16.msk.msrb.mxu0 %vm11754_vm12, %v7629_v61  ;;  %vm11900_vm12 = vmpackc.low %vm2937_vm14, %vm2929_vm0  ;;  %3312 = vmatmul.bf16.vlgmr.msra.gmra.mxu1 %v7631_v44  ;;  %vm2897_vm14 = vcmp.lt.f32.partialorder %v10716_v0, %v8126_v62 }
 0x20a   : > { %6722 = vmatpush.bf16.msk.msrb.mxu1 %vm11765_vm8, %v7629_v61  ;;  %vm15359_vm8 = vnez %v15340_v32  ;;  %3325 = vmatmul.bf16.vlgmr.msra.gmra.mxu2 %v7631_v44  ;;  %vm11927_vm0 = vmpackc.low %vm2919_vm1, %vm2911_vm9  ;;  %vm2914_vm1 = vcmp.lt.f32.partialorder %v10802_v53, %v8154_v63  ;;  %v15373_v53 = vmov 0  ;;  %v2054_v29 = vpop.f32.mrf.mxu0 }
 0x20b   : > { %6738 = vmatpush.bf16.msk.msrb.mxu2 %vm11779_vm10, %v7629_v61  ;;  %6754 = vmatpush.bf16.msk.msrb.mxu3 %vm15359_vm8, %v7629_v61  ;;  %vm11912_vm10 = vmpackc.low %vm2938_vm13, %vm2930_vm6  ;;  %vm15364_vm13 = vnez %v15342_v57  ;;  %vm2922_vm8 = vcmp.lt.f32.partialorder %v10872_v7, %v8154_v63  ;;  %vm15367_vm6 = vnez %v15346_v33  ;;  %v7616_v7 = vld [vmem:[%s7682_s23 + $0x8] sm:$0xff]  ;;  %v2078_v14 = vpop.f32.mrf.mxu2  ;;  %v15465_v29 = vmov 0 }
 0x20c   : > { %3338 = vmatmul.bf16.vlgmr.msra.gmra.mxu3 %v7631_v44  ;;  %vm11947_vm9 = vmpackc.low %vm2920_vm11, %vm2912_vm5  ;;  %4656 = vperm.xlu2 %7581, %v7616_v7   ;;  %v12117_v50 = vadd.f32 %v2078_v14, %v11139_v55  ;;  %v2091_v11 = vpop.f32.mrf.mxu3  ;;  %v12285_v2 = vpop.permute.xlu0 %3428 }
 0x20d   : > { %6708 = vmatpush.bf16.msk.msrb.mxu0 %vm15364_vm13, %v7629_v61  ;;  %vm15368_vm13 = vnez %v15348_v59  ;;  %vm11967_vm5 = vmpackc.low %vm2921_vm4, %vm2913_vm15  ;;  %vm15371_vm15 = vcmp.lt.f32.partialorder %v10716_v0, %v8154_v63  ;;  %vm15372_vm4 = vcmp.lt.f32.partialorder %v10792_v35, %v8154_v63  ;;  %v12137_v55 = vadd.f32 %v2091_v11, %v11162_v27  ;;  %v2067_v27 = vpop.f32.mrf.mxu1 }
 0x20e   : > { %6724 = vmatpush.bf16.msk.msrb.mxu1 %vm15367_vm6, %v7629_v61  ;;  %vm2903_vm6 = vcmp.lt.f32.partialorder %v10792_v35, %v8046_v18  ;;  %vm11988_vm11 = vmpackc.low %vm15372_vm4, %vm15371_vm15  ;;  %vm2879_vm15 = vcmp.lt.f32.partialorder %v10553_v30, %v8046_v18  ;;  %vm15381_vm4 = vcmp.lt.f32.partialorder %v10792_v35, %v8083_v6  ;;  %v15424_v59 = vmov 0 }
 0x20f   : > { %6740 = vmatpush.bf16.msk.msrb.mxu2 %vm15368_vm13, %v7629_v61  ;;  %6756 = vmatpush.bf16.msk.msrb.mxu3 %vm11853_vm2, %v7629_v61  ;;  %v15374_v53 = vsel %vm11988_vm11, 4294967295, %v15373_v53  ;;  %vm11993_vm2 = vmpackc.low %vm2922_vm8, %vm2914_vm1  ;;  %vm15377_vm1 = vcmp.lt.f32.partialorder %v10716_v0, %v8046_v18  ;;  %vm2888_vm13 = vcmp.lt.f32.partialorder %v10632_v25, %v8083_v6  ;;  %vm2889_vm11 = vcmp.lt.f32.partialorder %v10632_v25, %v8126_v62 }
 0x210   : > { %vm12014_vm8 = vmpackc.low %vm2903_vm6, %vm15377_vm1  ;;  %vm15380_vm6 = vcmp.lt.f32.partialorder %v10716_v0, %v8083_v6  ;;  %v15459_v0 = vmov 0  ;;  %v15468_v27 = vmov 0 }
 0x211   : > { %6710 = vmatpush.bf16.msk.msrb.mxu0 %vm11869_vm3, %v7629_v61  ;;  %v15379_v20 = vsel %vm12014_vm8, 4294967295, %v15378_v20  ;;  %vm2887_vm3 = vcmp.lt.f32.partialorder %v10632_v25, %v8046_v18  ;;  %vm12039_vm1 = vmpackc.low %vm15381_vm4, %vm15380_vm6  ;;  %vm2881_vm4 = vcmp.lt.f32.partialorder %v10553_v30, %v8126_v62  ;;  %vm2890_vm8 = vcmp.lt.f32.partialorder %v10632_v25, %v8154_v63 }
 0x212   : > { %6726 = vmatpush.bf16.msk.msrb.mxu1 %vm11883_vm7, %v7629_v61  ;;  %v15383_v26 = vsel %vm12039_vm1, 4294967295, %v15382_v26  ;;  %vm2880_vm7 = vcmp.lt.f32.partialorder %v10553_v30, %v8083_v6  ;;  %vm12064_vm1 = vmpackc.low %vm2887_vm3, %vm2879_vm15  ;;  %vm2863_vm15 = vcmp.lt.f32.partialorder %v10616_v54, %v8046_v18  ;;  %vm2871_vm3 = vcmp.lt.f32.partialorder %v10484_v45, %v8046_v18 }
 0x213   : > { %6742 = vmatpush.bf16.msk.msrb.mxu2 %vm11900_vm12, %v7629_v61  ;;  %6758 = vmatpush.bf16.msk.msrb.mxu3 %vm11912_vm10, %v7629_v61  ;;  %vm15384_vm12 = vcmp.lt.f32.partialorder %v10792_v35, %v8126_v62  ;;  %vm2882_vm10 = vcmp.lt.f32.partialorder %v10553_v30, %v8154_v63  ;;  %v12083_v35 = vpop.permute.xlu2 %3444  ;;  %v15395_v30 = vmov 0  ;;  %v2080_v47 = vpop.f32.mrf.mxu2  ;;  %v15521_v25 = vmov 0 }
 0x214   : > { %vm12056_vm6 = vmpackc.low %vm15384_vm12, %vm2897_vm14  ;;  %7585 = vset.pattern.permute.xlu2 %v15337_v36  ;;  %vm15400_vm12 = vnez %v15383_v26  ;;  %v15405_v36 = vmov 0  ;;  %v2093_v22 = vpop.f32.mrf.mxu3  ;;  %v12420_v15 = vpop.permute.xlu0 %3424 }
 0x215   : > { %6712 = vmatpush.bf16.msk.msrb.mxu0 %vm11927_vm0, %v7629_v61  ;;  %vm12075_vm14 = vmpackc.low %vm2888_vm13, %vm2880_vm7  ;;  %vm2864_vm13 = vcmp.lt.f32.partialorder %v10616_v54, %v8083_v6  ;;  %vm2872_vm7 = vcmp.lt.f32.partialorder %v10484_v45, %v8083_v6 }
 0x216   : > { %6728 = vmatpush.bf16.msk.msrb.mxu1 %vm11947_vm9, %v7629_v61  ;;  %vm12091_vm0 = vmpackc.low %vm2889_vm11, %vm2881_vm4  ;;  %vm2873_vm11 = vcmp.lt.f32.partialorder %v10484_v45, %v8126_v62  ;;  %vm15397_vm4 = vnez %v15379_v20  ;;  %v15512_v20 = vmov 0 }
 0x217   : > { %6744 = vmatpush.bf16.msk.msrb.mxu2 %vm11967_vm5, %v7629_v61  ;;  %6760 = vmatpush.bf16.msk.msrb.mxu3 %vm11993_vm2, %v7629_v61  ;;  %vm12107_vm9 = vmpackc.low %vm2890_vm8, %vm2882_vm10  ;;  %vm2865_vm5 = vcmp.lt.f32.partialorder %v10616_v54, %v8126_v62  ;;  %vm2866_vm8 = vcmp.lt.f32.partialorder %v10616_v54, %v8154_v63  ;;  %v12198_v54 = vpop.permute.xlu1 %3436 }
 0x218   : > { %v15394_v51 = vsel %vm12107_vm9, 4294967295, %v15393_v51  ;;  %vm12125_vm2 = vmpackc.low %vm2871_vm3, %vm2863_vm15  ;;  %vm2858_vm15 = vcmp.lt.f32.partialorder %v10412_v19, %v8154_v63  ;;  %vm3580_vm3 = vcmp.lt.f32.partialorder %v11861_v48, %v7825_v38 }
 0x219   : > { %v15396_v30 = vsel %vm12125_vm2, 4294967295, %v15395_v30  ;;  %6714 = vmatpush.bf16.msk.msrb.mxu0 %vm15397_vm4, %v7629_v61  ;;  %vm12145_vm10 = vmpackc.low %vm2872_vm7, %vm2864_vm13  ;;  %vm2856_vm7 = vcmp.lt.f32.partialorder %v10412_v19, %v8083_v6  ;;  %vm2857_vm4 = vcmp.lt.f32.partialorder %v10412_v19, %v8126_v62  ;;  %vm15411_vm2 = vcmp.lt.f32.partialorder %v10344_v31, %v8083_v6 }
 0x21a   : > { %v15399_v8 = vsel %vm12145_vm10, 4294967295, %v15398_v8  ;;  %6730 = vmatpush.bf16.msk.msrb.mxu1 %vm15400_vm12, %v7629_v61  ;;  %vm12167_vm13 = vmpackc.low %vm2873_vm11, %vm2865_vm5  ;;  %vm2849_vm12 = vcmp.lt.f32.partialorder %v10344_v31, %v8126_v62  ;;  %vm15404_vm5 = vcmp.lt.f32.partialorder %v10484_v45, %v8154_v63  ;;  %v15409_v45 = vmov 0 }
 0x21b   : > { %6746 = vmatpush.bf16.msk.msrb.mxu2 %vm12056_vm6, %v7629_v61  ;;  %v15402_v46 = vsel %vm12167_vm13, 4294967295, %v15401_v46  ;;  %vm15403_vm6 = vnez %v15374_v53  ;;  %vm12186_vm11 = vmpackc.low %vm15404_vm5, %vm2866_vm8  ;;  %vm3579_vm13 = vcmp.lt.f32.partialorder %v11861_v48, %v7822_v37  ;;  %vm15407_vm8 = vcmp.lt.f32.partialorder %v10344_v31, %v8046_v18  ;;  %v12283_v5 = vpop.permute.xlu2 %3440 }
 0x21c   : > { %6762 = vmatpush.bf16.msk.msrb.mxu3 %vm15403_vm6, %v7629_v61  ;;  %v15406_v36 = vsel %vm12186_vm11, 4294967295, %v15405_v36  ;;  %vm3587_vm6 = vcmp.lt.f32.partialorder %v11920_v21, %v7822_v37  ;;  %vm15408_vm5 = vcmp.lt.f32.partialorder %v10412_v19, %v8046_v18  ;;  %vm3588_vm10 = vcmp.lt.f32.partialorder %v11920_v21, %v7825_v38  ;;  %vm12220_vm9 = vmpackc.low %vm2856_vm7, %vm15411_vm2 }
 0x21d   : > { %vm12206_vm11 = vmpackc.low %vm15408_vm5, %vm15407_vm8  ;;  %6716 = vmatpush.bf16.msk.msrb.mxu0 %vm12064_vm1, %v7629_v61  ;;  %vm3581_vm5 = vcmp.lt.f32.partialorder %v11861_v48, %v7830_v40  ;;  %vm15416_vm1 = vcmp.lt.f32.partialorder %v10344_v31, %v8154_v63  ;;  %vm3582_vm7 = vcmp.lt.f32.partialorder %v11861_v48, %v7835_v41  ;;  %v15422_v31 = vmov 0 }
 0x21e   : > { %v15410_v45 = vsel %vm12206_vm11, 4294967295, %v15409_v45  ;;  %vm12224_vm8 = vmpackc.low %vm2857_vm4, %vm2849_vm12  ;;  %vm3589_vm11 = vcmp.lt.f32.partialorder %v11920_v21, %v7830_v40  ;;  %6732 = vmatpush.bf16.msk.msrb.mxu1 %vm12075_vm14, %v7629_v61  ;;  %vm3590_vm14 = vcmp.lt.f32.partialorder %v11920_v21, %v7835_v41  ;;  %v15479_v19 = vmov 0 }
 0x21f   : > { %6748 = vmatpush.bf16.msk.msrb.mxu2 %vm12091_vm0, %v7629_v61  ;;  %vm12241_vm2 = vmpackc.low %vm2858_vm15, %vm15416_vm1  ;;  %vm15421_vm0 = vnez %v15394_v51  ;;  %vm3563_vm15 = vcmp.lt.f32.partialorder %v11935_v12, %v7822_v37  ;;  %vm15429_vm1 = vnez %v15399_v8  ;;  %v12337_v53 = vpop.permute.xlu1 %3432 }
 0x220   : > { %vm12245_vm4 = vmpackc.low %vm3587_vm6, %vm3579_vm13  ;;  %6764 = vmatpush.bf16.msk.msrb.mxu3 %vm15421_vm0, %v7629_v61  ;;  %vm3571_vm13 = vcmp.lt.f32.partialorder %v12022_v3, %v7822_v37 }
 0x221   : > { %vm12256_vm12 = vmpackc.low %vm3588_vm10, %vm3580_vm3  ;;  %vm3572_vm10 = vcmp.lt.f32.partialorder %v12022_v3, %v7825_v38  ;;  %vm15426_vm3 = vnez %v15396_v30 }
 0x222   : > { %v15423_v31 = vsel %vm12256_vm12, 4294967295, %v15422_v31  ;;  %vm12264_vm6 = vmpackc.low %vm3589_vm11, %vm3581_vm5  ;;  %6718 = vmatpush.bf16.msk.msrb.mxu0 %vm15426_vm3, %v7629_v61  ;;  %vm3565_vm11 = vcmp.lt.f32.partialorder %v11935_v12, %v7830_v40  ;;  %vm3573_vm5 = vcmp.lt.f32.partialorder %v12022_v3, %v7830_v40  ;;  %6734 = vmatpush.bf16.msk.msrb.mxu1 %vm15429_vm1, %v7629_v61  ;;  %vm3566_vm3 = vcmp.lt.f32.partialorder %v11935_v12, %v7835_v41 }
 0x223   : > { %v15425_v59 = vsel %vm12264_vm6, 4294967295, %v15424_v59  ;;  %vm12275_vm0 = vmpackc.low %vm3590_vm14, %vm3582_vm7  ;;  %vm15430_vm7 = vnez %v15402_v46  ;;  %vm15433_vm1 = vnez %v15406_v36  ;;  %vm3556_vm12 = vcmp.lt.f32.partialorder %v12099_v23, %v7825_v38  ;;  %v12418_v58 = vpop.permute.xlu2 %3420  ;;  %v2104_v14 = vpop.f32.mrf.mxu0 }
 0x224   : > { %v15428_v34 = vsel %vm12275_vm0, 4294967295, %v15427_v34  ;;  %6750 = vmatpush.bf16.msk.msrb.mxu2 %vm15430_vm7, %v7629_v61  ;;  %vm12296_vm14 = vmpackc.low %vm3571_vm13, %vm3563_vm15  ;;  %vm3574_vm0 = vcmp.lt.f32.partialorder %v12022_v3, %v7835_v41  ;;  %6766 = vmatpush.bf16.msk.msrb.mxu3 %vm15433_vm1, %v7629_v61  ;;  %vm15434_vm7 = vcmp.lt.f32.partialorder %v11935_v12, %v7825_v38  ;;  %vm3547_vm15 = vcmp.lt.f32.partialorder %v12083_v35, %v7822_v37  ;;  %v2117_v30 = vpop.f32.mrf.mxu1 }
 0x225   : > { %v15432_v43 = vsel %vm12296_vm14, 4294967295, %v15431_v43  ;;  %vm12310_vm6 = vmpackc.low %vm3572_vm10, %vm15434_vm7  ;;  %vm3555_vm13 = vcmp.lt.f32.partialorder %v12099_v23, %v7822_v37  ;;  %vm3548_vm1 = vcmp.lt.f32.partialorder %v12083_v35, %v7825_v38  ;;  %vm15439_vm10 = vnez %v15410_v45 }
 0x226   : > { %vm12318_vm14 = vmpackc.low %vm3573_vm5, %vm3565_vm11  ;;  %6720 = vmatpush.bf16.msk.msrb.mxu0 %vm15439_vm10, %v7629_v61  ;;  %vm3549_vm11 = vcmp.lt.f32.partialorder %v12083_v35, %v7830_v40  ;;  %vm3557_vm5 = vcmp.lt.f32.partialorder %v12099_v23, %v7830_v40  ;;  %6736 = vmatpush.bf16.msk.msrb.mxu1 %vm12220_vm9, %v7629_v61  ;;  %vm3558_vm10 = vcmp.lt.f32.partialorder %v12099_v23, %v7835_v41  ;;  %v15472_v46 = vmov 0 }
 0x227   : > { %vm12329_vm7 = vmpackc.low %vm3574_vm0, %vm3566_vm3  ;;  %vm3550_vm3 = vcmp.lt.f32.partialorder %v12083_v35, %v7835_v41  ;;  %v12468_v11 = vadd.f32 %v2104_v14, %v11503_v60  ;;  %v12478_v8 = vpop.permute.xlu1 %3416  ;;  %v12487_v60 = vadd.f32 %v2117_v30, %v11527_v28  ;;  %v15477_v45 = vmov 0 }
 0x228   : > { %6752 = vmatpush.bf16.msk.msrb.mxu2 %vm12224_vm8, %v7629_v61  ;;  %vm12345_vm0 = vmpackc.low %vm3555_vm13, %vm3547_vm15  ;;  %6768 = vmatpush.bf16.msk.msrb.mxu3 %vm12241_vm2, %v7629_v61  ;;  %vm3531_vm8 = vcmp.lt.f32.partialorder %v12198_v54, %v7822_v37  ;;  %vm3539_vm15 = vcmp.lt.f32.partialorder %v12283_v5, %v7822_v37  ;;  %vm15446_vm13 = vnez %v15423_v31  ;;  %vm15447_vm2 = vnez %v15425_v59 }
 0x229   : > { %vm12359_vm9 = vmpackc.low %vm3556_vm12, %vm3548_vm1  ;;  %vm3532_vm12 = vcmp.lt.f32.partialorder %v12198_v54, %v7825_v38  ;;  %vm3540_vm1 = vcmp.lt.f32.partialorder %v12283_v5, %v7825_v38  ;;  %3351 = vmatmul.bf16.vlgmr.msrb.gmra.mxu0 %v7631_v44  ;;  %3364 = vmatmul.bf16.vlgmr.msrb.gmra.mxu1 %v7631_v44  ;;  %v15481_v31 = vmov 0  ;;  %v15540_v28 = vmov 0 }
 0x22a   : > { %6898 = vmatpush.bf16.msk.msra.mxu0 %vm12245_vm4, %v7629_v61  ;;  %6914 = vmatpush.bf16.msk.msra.mxu1 %vm15446_vm13, %v7629_v61  ;;  %vm12376_vm4 = vmpackc.low %vm3557_vm5, %vm3549_vm11  ;;  %vm15450_vm13 = vnez %v15428_v34  ;;  %vm3533_vm11 = vcmp.lt.f32.partialorder %v12198_v54, %v7830_v40  ;;  %v15489_v34 = vmov 0  ;;  %v15655_v30 = vmov 0 }
 0x22b   : > { %v15449_v24 = vsel %vm12376_vm4, 4294967295, %v15448_v24  ;;  %3377 = vmatmul.bf16.vlgmr.msrb.gmra.mxu2 %v7631_v44  ;;  %vm12398_vm4 = vmpackc.low %vm3539_vm15, %vm3531_vm8  ;;  %3390 = vmatmul.bf16.vlgmr.msrb.gmra.mxu3 %v7631_v44  ;;  %vm3515_vm8 = vcmp.lt.f32.partialorder %v12285_v2, %v7822_v37  ;;  %vm3523_vm15 = vcmp.lt.f32.partialorder %v12337_v53, %v7822_v37  ;;  %v2106_v47 = vpop.f32.mrf.mxu0  ;;  %v12698_v17 = vpop.permute.xlu2 %4084 }
 0x22c   : > { %6930 = vmatpush.bf16.msk.msra.mxu2 %vm15447_vm2, %v7629_v61  ;;  %6946 = vmatpush.bf16.msk.msra.mxu3 %vm15450_vm13, %v7629_v61  ;;  %vm12388_vm2 = vmpackc.low %vm3558_vm10, %vm3550_vm3  ;;  %vm3534_vm3 = vcmp.lt.f32.partialorder %v12198_v54, %v7835_v41  ;;  %vm3542_vm10 = vcmp.lt.f32.partialorder %v12283_v5, %v7835_v41  ;;  %vm15455_vm13 = vnez %v15432_v43  ;;  %v2130_v32 = vpop.f32.mrf.mxu2  ;;  %v2143_v33 = vpop.f32.mrf.mxu3  ;;  %v15493_v43 = vmov 0 }
 0x22d   : > { %vm12410_vm5 = vmpackc.low %vm3540_vm1, %vm3532_vm12  ;;  %vm15458_vm12 = vcmp.lt.f32.partialorder %v12283_v5, %v7830_v40  ;;  %v12565_v57 = vadd.f32 %v2130_v32, %v11606_v49  ;;  %v12579_v59 = vadd.f32 %v2143_v33, %v11629_v4  ;;  %v15483_v49 = vmov 0  ;;  %v2119_v22 = vpop.f32.mrf.mxu1 }
 0x22e   : > { %6900 = vmatpush.bf16.msk.msra.mxu0 %vm15455_vm13, %v7629_v61  ;;  %6916 = vmatpush.bf16.msk.msra.mxu1 %vm12310_vm6, %v7629_v61  ;;  %vm12434_vm1 = vmpackc.low %vm15458_vm12, %vm3533_vm11  ;;  %vm3516_vm13 = vcmp.lt.f32.partialorder %v12285_v2, %v7825_v38  ;;  %vm3524_vm6 = vcmp.lt.f32.partialorder %v12337_v53, %v7825_v38  ;;  %vm3517_vm11 = vcmp.lt.f32.partialorder %v12285_v2, %v7830_v40  ;;  %v15487_v4 = vmov 0 }
 0x22f   : > { %v15460_v0 = vsel %vm12434_vm1, 4294967295, %v15459_v0  ;;  %vm3525_vm12 = vcmp.lt.f32.partialorder %v12337_v53, %v7830_v40  ;;  %vm12456_vm1 = vmpackc.low %vm3523_vm15, %vm3515_vm8  ;;  %vm3499_vm8 = vcmp.lt.f32.partialorder %v12418_v58, %v7822_v37  ;;  %vm3507_vm15 = vcmp.lt.f32.partialorder %v12420_v15, %v7822_v37  ;;  %v12791_v51 = vpop.permute.xlu1 %4076 }
 0x230   : > { %6932 = vmatpush.bf16.msk.msra.mxu2 %vm12318_vm14, %v7629_v61  ;;  %6948 = vmatpush.bf16.msk.msra.mxu3 %vm12329_vm7, %v7629_v61  ;;  %vm12448_vm14 = vmpackc.low %vm3542_vm10, %vm3534_vm3  ;;  %vm3518_vm7 = vcmp.lt.f32.partialorder %v12285_v2, %v7835_v41  ;;  %vm3526_vm3 = vcmp.lt.f32.partialorder %v12337_v53, %v7835_v41 }
 0x231   : > { %vm12470_vm10 = vmpackc.low %vm3524_vm6, %vm3516_vm13  ;;  %vm3508_vm6 = vcmp.lt.f32.partialorder %v12420_v15, %v7825_v38 }
 0x232   : > { %6902 = vmatpush.bf16.msk.msra.mxu0 %vm12345_vm0, %v7629_v61  ;;  %v15466_v29 = vsel %vm12470_vm10, 4294967295, %v15465_v29  ;;  %6918 = vmatpush.bf16.msk.msra.mxu1 %vm12359_vm9, %v7629_v61  ;;  %vm15467_vm0 = vnez %v15449_v24  ;;  %vm12495_vm13 = vmpackc.low %vm3525_vm12, %vm3517_vm11  ;;  %vm3500_vm9 = vcmp.lt.f32.partialorder %v12418_v58, %v7825_v38  ;;  %vm3501_vm12 = vcmp.lt.f32.partialorder %v12418_v58, %v7830_v40 }
 0x233   : > { %v15469_v27 = vsel %vm12495_vm13, 4294967295, %v15468_v27  ;;  %vm12512_vm11 = vmpackc.low %vm3526_vm3, %vm3518_vm7  ;;  %vm3510_vm10 = vcmp.lt.f32.partialorder %v12420_v15, %v7835_v41  ;;  %vm3483_vm3 = vcmp.lt.f32.partialorder %v11774_v16, %v7822_v37 }
 0x234   : > { %6934 = vmatpush.bf16.msk.msra.mxu2 %vm15467_vm0, %v7629_v61  ;;  %6950 = vmatpush.bf16.msk.msra.mxu3 %vm12388_vm2, %v7629_v61  ;;  %vm3509_vm0 = vcmp.lt.f32.partialorder %v12420_v15, %v7830_v40  ;;  %vm12520_vm13 = vmpackc.low %vm3507_vm15, %vm3499_vm8  ;;  %vm3502_vm2 = vcmp.lt.f32.partialorder %v12418_v58, %v7835_v41  ;;  %vm3491_vm8 = vcmp.lt.f32.partialorder %v12478_v8, %v7822_v37  ;;  %v2132_v24 = vpop.f32.mrf.mxu2 }
 0x235   : > { %v15473_v46 = vsel %vm12520_vm13, 4294967295, %v15472_v46  ;;  %vm12531_vm7 = vmpackc.low %vm3508_vm6, %vm3500_vm9  ;;  %vm15476_vm15 = vnez %v15460_v0  ;;  %vm3492_vm9 = vcmp.lt.f32.partialorder %v12478_v8, %v7825_v38  ;;  %vm3485_vm6 = vcmp.lt.f32.partialorder %v11774_v16, %v7830_v40 }
 0x236   : > { %6904 = vmatpush.bf16.msk.msra.mxu0 %vm12398_vm4, %v7629_v61  ;;  %6920 = vmatpush.bf16.msk.msra.mxu1 %vm12410_vm5, %v7629_v61  ;;  %vm12545_vm13 = vmpackc.low %vm3509_vm0, %vm3501_vm12  ;;  %vm3484_vm4 = vcmp.lt.f32.partialorder %v11774_v16, %v7825_v38  ;;  %vm3493_vm12 = vcmp.lt.f32.partialorder %v12478_v8, %v7830_v40  ;;  %v15519_v0 = vmov 0 }
 0x237   : > { %v15478_v45 = vsel %vm12545_vm13, 4294967295, %v15477_v45  ;;  %vm12556_vm5 = vmpackc.low %vm3510_vm10, %vm3502_vm2  ;;  %vm3494_vm10 = vcmp.lt.f32.partialorder %v12478_v8, %v7835_v41  ;;  %v12950_v33 = vpop.permute.xlu1 %4068 }
 0x238   : > { %6936 = vmatpush.bf16.msk.msra.mxu2 %vm15476_vm15, %v7629_v61  ;;  %6952 = vmatpush.bf16.msk.msra.mxu3 %vm12448_vm14, %v7629_v61  ;;  %v15480_v19 = vsel %vm12556_vm5, 4294967295, %v15479_v19  ;;  %vm12567_vm0 = vmpackc.low %vm3491_vm8, %vm3483_vm3  ;;  %vm3486_vm14 = vcmp.lt.f32.partialorder %v11774_v16, %v7835_v41  ;;  %vm3476_vm15 = vcmp.lt.f32.partialorder %v11689_v56, %v7825_v38  ;;  %vm3477_vm8 = vcmp.lt.f32.partialorder %v11689_v56, %v7830_v40 }
 0x239   : > { %v15482_v31 = vsel %vm12567_vm0, 4294967295, %v15481_v31  ;;  %vm12584_vm2 = vmpackc.low %vm3492_vm9, %vm3484_vm4  ;;  %vm15486_vm4 = vnez %v15469_v27  ;;  %vm3583_vm3 = vcmp.lt.f32.partialorder %v11861_v48, %v8046_v18  ;;  %vm15495_vm0 = vnez %v15473_v46  ;;  %v12843_v27 = vpop.permute.xlu0 %4088 }
 0x23a   : > { %6906 = vmatpush.bf16.msk.msra.mxu0 %vm12456_vm1, %v7629_v61  ;;  %v15484_v49 = vsel %vm12584_vm2, 4294967295, %v15483_v49  ;;  %vm15485_vm1 = vnez %v15466_v29  ;;  %vm12606_vm9 = vmpackc.low %vm3493_vm12, %vm3485_vm6  ;;  %vm3470_vm12 = vcmp.lt.f32.partialorder %v11788_v52, %v7835_v41  ;;  %vm3592_vm2 = vcmp.lt.f32.partialorder %v11920_v21, %v8083_v6  ;;  %v12825_v29 = vpop.permute.xlu2 %4080 }
 0x23b   : > { %6922 = vmatpush.bf16.msk.msra.mxu1 %vm15485_vm1, %v7629_v61  ;;  %v15488_v4 = vsel %vm12606_vm9, 4294967295, %v15487_v4  ;;  %vm3469_vm1 = vcmp.lt.f32.partialorder %v11788_v52, %v7830_v40  ;;  %vm12625_vm6 = vmpackc.low %vm3494_vm10, %vm3486_vm14  ;;  %vm15491_vm9 = vcmp.lt.f32.partialorder %v11788_v52, %v7822_v37  ;;  %vm15492_vm14 = vcmp.lt.f32.partialorder %v11689_v56, %v7822_v37 }
 0x23c   : > { %6938 = vmatpush.bf16.msk.msra.mxu2 %vm15486_vm4, %v7629_v61  ;;  %6954 = vmatpush.bf16.msk.msra.mxu3 %vm12512_vm11, %v7629_v61  ;;  %v15490_v34 = vsel %vm12625_vm6, 4294967295, %v15489_v34  ;;  %vm3478_vm4 = vcmp.lt.f32.partialorder %v11689_v56, %v7835_v41  ;;  %vm3591_vm11 = vcmp.lt.f32.partialorder %v11920_v21, %v8046_v18  ;;  %vm12643_vm10 = vmpackc.low %vm15492_vm14, %vm15491_vm9  ;;  %vm3584_vm6 = vcmp.lt.f32.partialorder %v11861_v48, %v8083_v6 }
 0x23d   : > { %v15494_v43 = vsel %vm12643_vm10, 4294967295, %v15493_v43  ;;  %vm15496_vm5 = vcmp.lt.f32.partialorder %v11788_v52, %v7825_v38  ;;  %vm12661_vm9 = vmpackc.low %vm3477_vm8, %vm3469_vm1  ;;  %vm3585_vm14 = vcmp.lt.f32.partialorder %v11861_v48, %v8126_v62  ;;  %vm3593_vm10 = vcmp.lt.f32.partialorder %v11920_v21, %v8126_v62 }
 0x23e   : > { %6908 = vmatpush.bf16.msk.msra.mxu0 %vm15495_vm0, %v7629_v61  ;;  %vm12657_vm13 = vmpackc.low %vm3476_vm15, %vm15496_vm5  ;;  %v15500_v9 = vsel %vm12661_vm9, 4294967295, %v15499_v9  ;;  %vm15501_vm5 = vnez %v15478_v45  ;;  %vm3586_vm15 = vcmp.lt.f32.partialorder %v11861_v48, %v8154_v63  ;;  %vm3594_vm1 = vcmp.lt.f32.partialorder %v11920_v21, %v8154_v63  ;;  %v2145_v21 = vpop.f32.mrf.mxu3 }
 0x23f   : > { %6924 = vmatpush.bf16.msk.msra.mxu1 %vm12531_vm7, %v7629_v61  ;;  %vm12675_vm0 = vmpackc.low %vm3478_vm4, %vm3470_vm12  ;;  %vm15506_vm7 = vnez %v15480_v19  ;;  %vm3575_vm12 = vcmp.lt.f32.partialorder %v12022_v3, %v8046_v18  ;;  %v15509_v48 = vmov 0  ;;  %v15545_v46 = vmov 0 }
 0x240   : > { %6940 = vmatpush.bf16.msk.msra.mxu2 %vm15501_vm5, %v7629_v61  ;;  %vm12679_vm8 = vmpackc.low %vm3591_vm11, %vm3583_vm3  ;;  %6956 = vmatpush.bf16.msk.msra.mxu3 %vm15506_vm7, %v7629_v61  ;;  %vm3567_vm3 = vcmp.lt.f32.partialorder %v11935_v12, %v8046_v18  ;;  %vm3568_vm11 = vcmp.lt.f32.partialorder %v11935_v12, %v8083_v6  ;;  %vm15514_vm7 = vnez %v15484_v49  ;;  %v15618_v19 = vmov 0 }
 0x241   : > { %vm12690_vm9 = vmpackc.low %vm3592_vm2, %vm3584_vm6  ;;  %vm3576_vm2 = vcmp.lt.f32.partialorder %v12022_v3, %v8083_v6  ;;  %vm15511_vm6 = vnez %v15482_v31  ;;  %v15557_v31 = vmov 0  ;;  %v12987_v49 = vpop.permute.xlu0 %4060 }
 0x242   : > { %v15508_v39 = vsel %vm12690_vm9, 4294967295, %v15507_v39  ;;  %vm12700_vm4 = vmpackc.low %vm3593_vm10, %vm3585_vm14  ;;  %6910 = vmatpush.bf16.msk.msra.mxu0 %vm15511_vm6, %v7629_v61  ;;  %vm3569_vm10 = vcmp.lt.f32.partialorder %v11935_v12, %v8126_v62  ;;  %vm3577_vm14 = vcmp.lt.f32.partialorder %v12022_v3, %v8126_v62  ;;  %vm15518_vm6 = vnez %v15490_v34  ;;  %v12971_v47 = vpop.permute.xlu2 %4072 }
 0x243   : > { %v15510_v48 = vsel %vm12700_vm4, 4294967295, %v15509_v48  ;;  %vm12711_vm5 = vmpackc.low %vm3594_vm1, %vm3586_vm15  ;;  %6926 = vmatpush.bf16.msk.msra.mxu1 %vm15514_vm7, %v7629_v61  ;;  %vm15515_vm4 = vnez %v15488_v4  ;;  %vm3570_vm15 = vcmp.lt.f32.partialorder %v11935_v12, %v8154_v63  ;;  %vm3578_vm1 = vcmp.lt.f32.partialorder %v12022_v3, %v8154_v63  ;;  %v2689_v32 = vpop.f32.mrf.mxu1 }
 0x244   : > { %v15513_v20 = vsel %vm12711_vm5, 4294967295, %v15512_v20  ;;  %6942 = vmatpush.bf16.msk.msra.mxu2 %vm15515_vm4, %v7629_v61  ;;  %vm12725_vm9 = vmpackc.low %vm3575_vm12, %vm3567_vm3  ;;  %6958 = vmatpush.bf16.msk.msra.mxu3 %vm15518_vm6, %v7629_v61  ;;  %vm3551_vm3 = vcmp.lt.f32.partialorder %v12083_v35, %v8046_v18  ;;  %vm3559_vm12 = vcmp.lt.f32.partialorder %v12099_v23, %v8046_v18  ;;  %vm3552_vm7 = vcmp.lt.f32.partialorder %v12083_v35, %v8083_v6 }
 0x245   : > { %vm12736_vm5 = vmpackc.low %vm3576_vm2, %vm3568_vm11  ;;  %vm3560_vm6 = vcmp.lt.f32.partialorder %v12099_v23, %v8083_v6  ;;  %vm15523_vm11 = vnez %v15494_v43  ;;  %v15598_v3 = vmov 0 }
 0x246   : > { %v15520_v0 = vsel %vm12736_vm5, 4294967295, %v15519_v0  ;;  %vm12744_vm4 = vmpackc.low %vm3577_vm14, %vm3569_vm10  ;;  %6912 = vmatpush.bf16.msk.msra.mxu0 %vm15523_vm11, %v7629_v61  ;;  %vm3553_vm10 = vcmp.lt.f32.partialorder %v12083_v35, %v8126_v62  ;;  %vm3561_vm14 = vcmp.lt.f32.partialorder %v12099_v23, %v8126_v62  ;;  %vm15535_vm11 = vnez %v15513_v20 }
 0x247   : > { %v15522_v25 = vsel %vm12744_vm4, 4294967295, %v15521_v25  ;;  %vm12755_vm2 = vmpackc.low %vm3578_vm1, %vm3570_vm15  ;;  %6928 = vmatpush.bf16.msk.msra.mxu1 %vm12657_vm13, %v7629_v61  ;;  %vm15526_vm4 = vnez %v15500_v9  ;;  %vm3554_vm15 = vcmp.lt.f32.partialorder %v12083_v35, %v8154_v63  ;;  %vm3562_vm1 = vcmp.lt.f32.partialorder %v12099_v23, %v8154_v63 }
 0x248   : > { %6944 = vmatpush.bf16.msk.msra.mxu2 %vm15526_vm4, %v7629_v61  ;;  %vm12769_vm5 = vmpackc.low %vm3559_vm12, %vm3551_vm3  ;;  %6960 = vmatpush.bf16.msk.msra.mxu3 %vm12675_vm0, %v7629_v61  ;;  %vm3535_vm3 = vcmp.lt.f32.partialorder %v12198_v54, %v8046_v18  ;;  %vm3543_vm12 = vcmp.lt.f32.partialorder %v12283_v5, %v8046_v18  ;;  %vm15531_vm4 = vnez %v15508_v39  ;;  %vm15532_vm0 = vnez %v15510_v48  ;;  %v13093_v39 = vpop.permute.xlu1 %4064 }
 0x249   : > { %vm12783_vm13 = vmpackc.low %vm3560_vm6, %vm3552_vm7  ;;  %vm3536_vm7 = vcmp.lt.f32.partialorder %v12198_v54, %v8083_v6  ;;  %vm3544_vm6 = vcmp.lt.f32.partialorder %v12283_v5, %v8083_v6  ;;  %3923 = vmatmul.bf16.vlgmr.msra.gmra.mxu0 %v7631_v44  ;;  %v15538_v35 = vmov 0  ;;  %v15571_v9 = vmov 0  ;;  %v13130_v26 = vpop.permute.xlu0 %4056 }
 0x24a   : > { %6962 = vmatpush.bf16.msk.msrb.mxu0 %vm12679_vm8, %v7629_v61  ;;  %vm12802_vm8 = vmpackc.low %vm3561_vm14, %vm3553_vm10  ;;  %vm3537_vm10 = vcmp.lt.f32.partialorder %v12198_v54, %v8126_v62  ;;  %3936 = vmatmul.bf16.vlgmr.msra.gmra.mxu1 %v7631_v44  ;;  %vm15542_vm14 = vnez %v15520_v0  ;;  %v13120_v48 = vpop.permute.xlu2 %4052  ;;  %v15589_v0 = vmov 0 }
 0x24b   : > { %6978 = vmatpush.bf16.msk.msrb.mxu1 %vm15531_vm4, %v7629_v61  ;;  %vm12817_vm4 = vmpackc.low %vm3562_vm1, %vm3554_vm15  ;;  %3949 = vmatmul.bf16.vlgmr.msra.gmra.mxu2 %v7631_v44  ;;  %vm3538_vm1 = vcmp.lt.f32.partialorder %v12198_v54, %v8154_v63  ;;  %v2676_v54 = vpop.f32.mrf.mxu0  ;;  %v2702_v22 = vpop.f32.mrf.mxu2 }
 0x24c   : > { %6994 = vmatpush.bf16.msk.msrb.mxu2 %vm15532_vm0, %v7629_v61  ;;  %7010 = vmatpush.bf16.msk.msrb.mxu3 %vm15535_vm11, %v7629_v61  ;;  %vm12835_vm15 = vmpackc.low %vm3543_vm12, %vm3535_vm3  ;;  %vm3546_vm0 = vcmp.lt.f32.partialorder %v12283_v5, %v8154_v63  ;;  %vm3519_vm12 = vcmp.lt.f32.partialorder %v12285_v2, %v8046_v18  ;;  %vm3527_vm11 = vcmp.lt.f32.partialorder %v12337_v53, %v8046_v18  ;;  %v2715_v43 = vpop.f32.mrf.mxu3  ;;  %v2691_v42 = vpop.f32.mrf.mxu1 }
 0x24d   : > { %v15539_v35 = vsel %vm12835_vm15, 4294967295, %v15538_v35  ;;  %3962 = vmatmul.bf16.vlgmr.msra.gmra.mxu3 %v7631_v44  ;;  %vm12855_vm3 = vmpackc.low %vm3544_vm6, %vm3536_vm7  ;;  %vm15544_vm7 = vcmp.lt.f32.partialorder %v12283_v5, %v8126_v62  ;;  %vm3522_vm15 = vcmp.lt.f32.partialorder %v12285_v2, %v8154_v63  ;;  %v12906_v45 = vadd.f32 %v2676_v54, %v12006_v1 }
 0x24e   : > { %6964 = vmatpush.bf16.msk.msrb.mxu0 %vm12725_vm9, %v7629_v61  ;;  %v15541_v28 = vsel %vm12855_vm3, 4294967295, %v15540_v28  ;;  %vm15543_vm9 = vnez %v15522_v25  ;;  %vm12875_vm6 = vmpackc.low %vm15544_vm7, %vm3537_vm10  ;;  %vm3520_vm3 = vcmp.lt.f32.partialorder %v12285_v2, %v8083_v6  ;;  %vm3521_vm10 = vcmp.lt.f32.partialorder %v12285_v2, %v8126_v62 }
 0x24f   : > { %6980 = vmatpush.bf16.msk.msrb.mxu1 %vm15542_vm14, %v7629_v61  ;;  %v15546_v46 = vsel %vm12875_vm6, 4294967295, %v15545_v46  ;;  %vm3528_vm14 = vcmp.lt.f32.partialorder %v12337_v53, %v8083_v6  ;;  %vm3529_vm7 = vcmp.lt.f32.partialorder %v12337_v53, %v8126_v62  ;;  %vm12894_vm6 = vmpackc.low %vm3527_vm11, %vm3519_vm12  ;;  %vm3511_vm12 = vcmp.lt.f32.partialorder %v12420_v15, %v8046_v18 }
 0x250   : > { %6996 = vmatpush.bf16.msk.msrb.mxu2 %vm15543_vm9, %v7629_v61  ;;  %7012 = vmatpush.bf16.msk.msrb.mxu3 %vm12755_vm2, %v7629_v61  ;;  %vm12886_vm9 = vmpackc.low %vm3546_vm0, %vm3538_vm1  ;;  %vm3530_vm2 = vcmp.lt.f32.partialorder %v12337_v53, %v8154_v63  ;;  %vm3503_vm0 = vcmp.lt.f32.partialorder %v12418_v58, %v8046_v18  ;;  %v12923_v1 = vadd.f32 %v2689_v32, %v12031_v10  ;;  %v15594_v25 = vmov 0 }
 0x251   : > { %vm12908_vm1 = vmpackc.low %vm3528_vm14, %vm3520_vm3  ;;  %vm3504_vm3 = vcmp.lt.f32.partialorder %v12418_v58, %v8083_v6  ;;  %vm3505_vm11 = vcmp.lt.f32.partialorder %v12418_v58, %v8126_v62  ;;  %vm3513_vm14 = vcmp.lt.f32.partialorder %v12420_v15, %v8126_v62  ;;  %v13004_v34 = vadd.f32 %v2702_v22, %v12117_v50  ;;  %v13270_v5 = vpop.permute.xlu0 %4036 }
 0x252   : > { %6966 = vmatpush.bf16.msk.msrb.mxu0 %vm12769_vm5, %v7629_v61  ;;  %vm12928_vm5 = vmpackc.low %vm3529_vm7, %vm3521_vm10  ;;  %vm15559_vm7 = vnez %v15539_v35  ;;  %v13024_v50 = vadd.f32 %v2715_v43, %v12137_v55  ;;  %v15573_v55 = vmov 0  ;;  %v13218_v35 = vpop.permute.xlu1 %4044  ;;  %v13252_v36 = vpop.permute.xlu2 %4048 }
 0x253   : > { %6982 = vmatpush.bf16.msk.msrb.mxu1 %vm12783_vm13, %v7629_v61  ;;  %vm3512_vm13 = vcmp.lt.f32.partialorder %v12420_v15, %v8083_v6  ;;  %vm12952_vm10 = vmpackc.low %vm3511_vm12, %vm3503_vm0  ;;  %vm3487_vm0 = vcmp.lt.f32.partialorder %v11774_v16, %v8046_v18  ;;  %vm3495_vm12 = vcmp.lt.f32.partialorder %v12478_v8, %v8046_v18  ;;  %v2678_v13 = vpop.f32.mrf.mxu0  ;;  %v2704_v24 = vpop.f32.mrf.mxu2 }
 0x254   : > { %6998 = vmatpush.bf16.msk.msrb.mxu2 %vm12802_vm8, %v7629_v61  ;;  %7014 = vmatpush.bf16.msk.msrb.mxu3 %vm12817_vm4, %v7629_v61  ;;  %vm12942_vm8 = vmpackc.low %vm3530_vm2, %vm3522_vm15  ;;  %v15558_v31 = vsel %vm12952_vm10, 4294967295, %v15557_v31  ;;  %vm3514_vm15 = vcmp.lt.f32.partialorder %v12420_v15, %v8154_v63  ;;  %vm15562_vm4 = vnez %v15541_v28  ;;  %vm15563_vm10 = vnez %v15546_v46  ;;  %v2717_v20 = vpop.f32.mrf.mxu3 }
 0x255   : > { %vm12963_vm2 = vmpackc.low %vm3512_vm13, %vm3504_vm3  ;;  %vm3488_vm13 = vcmp.lt.f32.partialorder %v11774_v16, %v8083_v6 }
 0x256   : > { %6968 = vmatpush.bf16.msk.msrb.mxu0 %vm15559_vm7, %v7629_v61  ;;  %vm12979_vm3 = vmpackc.low %vm3513_vm14, %vm3505_vm11  ;;  %vm3496_vm7 = vcmp.lt.f32.partialorder %v12478_v8, %v8083_v6  ;;  %vm3489_vm14 = vcmp.lt.f32.partialorder %v11774_v16, %v8126_v62 }
 0x257   : > { %6984 = vmatpush.bf16.msk.msrb.mxu1 %vm15562_vm4, %v7629_v61  ;;  %vm3497_vm4 = vcmp.lt.f32.partialorder %v12478_v8, %v8126_v62 }
 0x258   : > { %7000 = vmatpush.bf16.msk.msrb.mxu2 %vm15563_vm10, %v7629_v61  ;;  %7016 = vmatpush.bf16.msk.msrb.mxu3 %vm12886_vm9, %v7629_v61  ;;  %vm15566_vm10 = vcmp.lt.f32.partialorder %v12418_v58, %v8154_v63  ;;  %vm13012_vm9 = vmpackc.low %vm3495_vm12, %vm3487_vm0  ;;  %vm3471_vm12 = vcmp.lt.f32.partialorder %v11788_v52, %v8046_v18 }
 0x259   : > { %vm12995_vm11 = vmpackc.low %vm3514_vm15, %vm15566_vm10  ;;  %vm3498_vm10 = vcmp.lt.f32.partialorder %v12478_v8, %v8154_v63  ;;  %vm3479_vm15 = vcmp.lt.f32.partialorder %v11689_v56, %v8046_v18 }
 0x25a   : > { %6970 = vmatpush.bf16.msk.msrb.mxu0 %vm12894_vm6, %v7629_v61  ;;  %vm13032_vm0 = vmpackc.low %vm3496_vm7, %vm3488_vm13  ;;  %vm3472_vm13 = vcmp.lt.f32.partialorder %v11788_v52, %v8083_v6  ;;  %v13377_v43 = vpop.permute.xlu1 %4040 }
 0x25b   : > { %v15572_v9 = vsel %vm13032_vm0, 4294967295, %v15571_v9  ;;  %6986 = vmatpush.bf16.msk.msrb.mxu1 %vm12908_vm1, %v7629_v61  ;;  %vm13052_vm6 = vmpackc.low %vm3497_vm4, %vm3489_vm14  ;;  %vm3480_vm1 = vcmp.lt.f32.partialorder %v11689_v56, %v8083_v6  ;;  %vm3473_vm14 = vcmp.lt.f32.partialorder %v11788_v52, %v8126_v62  ;;  %vm3481_vm4 = vcmp.lt.f32.partialorder %v11689_v56, %v8126_v62 }
 0x25c   : > { %7002 = vmatpush.bf16.msk.msrb.mxu2 %vm12928_vm5, %v7629_v61  ;;  %v15574_v55 = vsel %vm13052_vm6, 4294967295, %v15573_v55  ;;  %7018 = vmatpush.bf16.msk.msrb.mxu3 %vm12942_vm8, %v7629_v61  ;;  %vm15575_vm5 = vcmp.lt.f32.partialorder %v11774_v16, %v8154_v63  ;;  %vm13074_vm6 = vmpackc.low %vm3479_vm15, %vm3471_vm12  ;;  %vm3474_vm8 = vcmp.lt.f32.partialorder %v11788_v52, %v8154_v63  ;;  %vm3482_vm0 = vcmp.lt.f32.partialorder %v11689_v56, %v8154_v63 }
 0x25d   : > { %vm13066_vm7 = vmpackc.low %vm3498_vm10, %vm15575_vm5  ;;  %vm15580_vm10 = vnez %v15558_v31  ;;  %v15581_v16 = vmov 0  ;;  %vm4203_vm15 = vcmp.lt.f32.partialorder %v12698_v17, %v7822_v37  ;;  %vm4211_vm12 = vcmp.lt.f32.partialorder %v12843_v27, %v7822_v37 }
 0x25e   : > { %6972 = vmatpush.bf16.msk.msrb.mxu0 %vm15580_vm10, %v7629_v61  ;;  %vm13085_vm5 = vmpackc.low %vm3480_vm1, %vm3472_vm13  ;;  %vm4204_vm1 = vcmp.lt.f32.partialorder %v12698_v17, %v7825_v38  ;;  %vm4212_vm10 = vcmp.lt.f32.partialorder %v12843_v27, %v7825_v38 }
 0x25f   : > { %v15582_v16 = vsel %vm13085_vm5, 4294967295, %v15581_v16  ;;  %6988 = vmatpush.bf16.msk.msrb.mxu1 %vm12963_vm2, %v7629_v61  ;;  %vm13101_vm13 = vmpackc.low %vm3481_vm4, %vm3473_vm14  ;;  %vm15592_vm2 = vnez %v15574_v55  ;;  %v13414_v55 = vpop.permute.xlu0 %4032 }
 0x260   : > { %7004 = vmatpush.bf16.msk.msrb.mxu2 %vm12979_vm3, %v7629_v61  ;;  %7020 = vmatpush.bf16.msk.msrb.mxu3 %vm12995_vm11, %v7629_v61  ;;  %vm13112_vm5 = vmpackc.low %vm3482_vm0, %vm3474_vm8  ;;  %vm4213_vm3 = vcmp.lt.f32.partialorder %v12843_v27, %v7830_v40  ;;  %vm4206_vm11 = vcmp.lt.f32.partialorder %v12698_v17, %v7835_v41  ;;  %vm4214_vm0 = vcmp.lt.f32.partialorder %v12843_v27, %v7835_v41 }
 0x261   : > { %vm13122_vm14 = vmpackc.low %vm4211_vm12, %vm4203_vm15  ;;  %vm4187_vm8 = vcmp.lt.f32.partialorder %v12791_v51, %v7822_v37  ;;  %vm4195_vm15 = vcmp.lt.f32.partialorder %v12825_v29, %v7822_v37  ;;  %vm15591_vm12 = vnez %v15572_v9  ;;  %v13398_v9 = vpop.permute.xlu2 %4028 }
 0x262   : > { %6974 = vmatpush.bf16.msk.msrb.mxu0 %vm13012_vm9, %v7629_v61  ;;  %vm13135_vm4 = vmpackc.low %vm4212_vm10, %vm4204_vm1  ;;  %vm15593_vm9 = vcmp.lt.f32.partialorder %v12698_v17, %v7830_v40  ;;  %vm4188_vm10 = vcmp.lt.f32.partialorder %v12791_v51, %v7825_v38  ;;  %v13610_v53 = vpop.permute.xlu1 %4708 }
 0x263   : > { %v15590_v0 = vsel %vm13135_vm4, 4294967295, %v15589_v0  ;;  %6990 = vmatpush.bf16.msk.msrb.mxu1 %vm15591_vm12, %v7629_v61  ;;  %vm13152_vm1 = vmpackc.low %vm4213_vm3, %vm15593_vm9  ;;  %vm4196_vm4 = vcmp.lt.f32.partialorder %v12825_v29, %v7825_v38  ;;  %vm4197_vm3 = vcmp.lt.f32.partialorder %v12825_v29, %v7830_v40  ;;  %v2728_v10 = vpop.f32.mrf.mxu0 }
 0x264   : > { %7006 = vmatpush.bf16.msk.msrb.mxu2 %vm15592_vm2, %v7629_v61  ;;  %v15595_v25 = vsel %vm13152_vm1, 4294967295, %v15594_v25  ;;  %7022 = vmatpush.bf16.msk.msrb.mxu3 %vm13066_vm7, %v7629_v61  ;;  %vm13163_vm12 = vmpackc.low %vm4214_vm0, %vm4206_vm11  ;;  %vm4189_vm2 = vcmp.lt.f32.partialorder %v12791_v51, %v7830_v40  ;;  %vm4190_vm1 = vcmp.lt.f32.partialorder %v12791_v51, %v7835_v41  ;;  %vm4198_vm7 = vcmp.lt.f32.partialorder %v12825_v29, %v7835_v41 }
 0x265   : > { %vm13171_vm9 = vmpackc.low %vm4195_vm15, %vm4187_vm8  ;;  %vm4171_vm0 = vcmp.lt.f32.partialorder %v12950_v33, %v7822_v37  ;;  %vm4179_vm8 = vcmp.lt.f32.partialorder %v12971_v47, %v7822_v37  ;;  %vm15602_vm15 = vnez %v15582_v16  ;;  %v13333_v2 = vadd.f32 %v2728_v10, %v12468_v11 }
 0x266   : > { %v15599_v3 = vsel %vm13171_vm9, 4294967295, %v15598_v3  ;;  %6976 = vmatpush.bf16.msk.msrb.mxu0 %vm13074_vm6, %v7629_v61  ;;  %vm13182_vm11 = vmpackc.low %vm4196_vm4, %vm4188_vm10  ;;  %vm4172_vm6 = vcmp.lt.f32.partialorder %v12950_v33, %v7825_v38  ;;  %vm4180_vm4 = vcmp.lt.f32.partialorder %v12971_v47, %v7825_v38  ;;  %v2741_v15 = vpop.f32.mrf.mxu1 }
 0x267   : > { %6992 = vmatpush.bf16.msk.msrb.mxu1 %vm15602_vm15, %v7629_v61  ;;  %vm13196_vm9 = vmpackc.low %vm4197_vm3, %vm4189_vm2  ;;  %vm4181_vm2 = vcmp.lt.f32.partialorder %v12971_v47, %v7830_v40  ;;  %vm15607_vm3 = vnez %v15590_v0  ;;  %v13350_v11 = vadd.f32 %v2741_v15, %v12487_v60 }
 0x268   : > { %7008 = vmatpush.bf16.msk.msrb.mxu2 %vm13101_vm13, %v7629_v61  ;;  %7024 = vmatpush.bf16.msk.msrb.mxu3 %vm13112_vm5, %v7629_v61  ;;  %vm13210_vm10 = vmpackc.low %vm4198_vm7, %vm4190_vm1  ;;  %vm4173_vm13 = vcmp.lt.f32.partialorder %v12950_v33, %v7830_v40  ;;  %vm15608_vm5 = vnez %v15595_v25  ;;  %vm4174_vm1 = vcmp.lt.f32.partialorder %v12950_v33, %v7835_v41  ;;  %vm4182_vm7 = vcmp.lt.f32.partialorder %v12971_v47, %v7835_v41 }
 0x269   : > { %3975 = vmatmul.bf16.vlgmr.msrb.gmra.mxu0 %v7631_v44  ;;  %vm13244_vm15 = vmpackc.low %vm4180_vm4, %vm4172_vm6  ;;  %vm4156_vm6 = vcmp.lt.f32.partialorder %v12987_v49, %v7825_v38  ;;  %vm4164_vm4 = vcmp.lt.f32.partialorder %v13093_v39, %v7825_v38 }
 0x26a   : > { %7154 = vmatpush.bf16.msk.msra.mxu0 %vm13122_vm14, %v7629_v61  ;;  %vm13229_vm14 = vmpackc.low %vm4179_vm8, %vm4171_vm0  ;;  %vm4155_vm0 = vcmp.lt.f32.partialorder %v12987_v49, %v7822_v37  ;;  %vm4163_vm8 = vcmp.lt.f32.partialorder %v13093_v39, %v7822_v37  ;;  %3988 = vmatmul.bf16.vlgmr.msrb.gmra.mxu1 %v7631_v44  ;;  %v13746_v8 = vpop.permute.xlu1 %4704 }
 0x26b   : > { %7170 = vmatpush.bf16.msk.msra.mxu1 %vm15607_vm3, %v7629_v61  ;;  %4001 = vmatmul.bf16.vlgmr.msrb.gmra.mxu2 %v7631_v44  ;;  %vm15615_vm3 = vnez %v15599_v3  ;;  %v2754_v7 = vpop.f32.mrf.mxu2  ;;  %v2730_v24 = vpop.f32.mrf.mxu0 }
 0x26c   : > { %7186 = vmatpush.bf16.msk.msra.mxu2 %vm15608_vm5, %v7629_v61  ;;  %7202 = vmatpush.bf16.msk.msra.mxu3 %vm13163_vm12, %v7629_v61  ;;  %vm13262_vm12 = vmpackc.low %vm4181_vm2, %vm4173_vm13  ;;  %vm4157_vm2 = vcmp.lt.f32.partialorder %v12987_v49, %v7830_v40  ;;  %vm4165_vm5 = vcmp.lt.f32.partialorder %v13093_v39, %v7830_v40  ;;  %v13431_v16 = vadd.f32 %v2754_v7, %v12565_v57 }
 0x26d   : > { %4014 = vmatmul.bf16.vlgmr.msrb.gmra.mxu3 %v7631_v44  ;;  %vm13282_vm13 = vmpackc.low %vm4182_vm7, %vm4174_vm1  ;;  %vm4158_vm7 = vcmp.lt.f32.partialorder %v12987_v49, %v7835_v41  ;;  %v2767_v56 = vpop.f32.mrf.mxu3 }
 0x26e   : > { %7156 = vmatpush.bf16.msk.msra.mxu0 %vm15615_vm3, %v7629_v61  ;;  %vm13302_vm1 = vmpackc.low %vm4163_vm8, %vm4155_vm0  ;;  %vm4139_vm0 = vcmp.lt.f32.partialorder %v13120_v48, %v7822_v37  ;;  %vm4147_vm8 = vcmp.lt.f32.partialorder %v13130_v26, %v7822_v37  ;;  %v13451_v57 = vadd.f32 %v2767_v56, %v12579_v59  ;;  %v2743_v20 = vpop.f32.mrf.mxu1  ;;  %v15643_v59 = vmov 0  ;;  %v243_v56 = vld [vmem:[%s14612_s2] sm:$0xff] }
 0x26f   : > { %7172 = vmatpush.bf16.msk.msra.mxu1 %vm13182_vm11, %v7629_v61  ;;  %v15619_v19 = vsel %vm13302_vm1, 4294967295, %v15618_v19  ;;  %vm4166_vm11 = vcmp.lt.f32.partialorder %v13093_v39, %v7835_v41  ;;  %vm13321_vm3 = vmpackc.low %vm4165_vm5, %vm4157_vm2  ;;  %vm4140_vm1 = vcmp.lt.f32.partialorder %v13120_v48, %v7825_v38  ;;  %vm4149_vm2 = vcmp.lt.f32.partialorder %v13130_v26, %v7830_v40  ;;  %5285 = vperm.xlu0 %7583, %v243_v56  }
 0x270   : > { %7188 = vmatpush.bf16.msk.msra.mxu2 %vm13196_vm9, %v7629_v61  ;;  %7204 = vmatpush.bf16.msk.msra.mxu3 %vm13210_vm10, %v7629_v61  ;;  %vm13313_vm9 = vmpackc.low %vm4164_vm4, %vm4156_vm6  ;;  %vm4148_vm10 = vcmp.lt.f32.partialorder %v13130_v26, %v7825_v38  ;;  %vm4141_vm4 = vcmp.lt.f32.partialorder %v13120_v48, %v7830_v40  ;;  %vm4142_vm5 = vcmp.lt.f32.partialorder %v13120_v48, %v7835_v41 }
 0x271   : > { %vm13335_vm6 = vmpackc.low %vm4166_vm11, %vm4158_vm7  ;;  %vm4123_vm7 = vcmp.lt.f32.partialorder %v13218_v35, %v7822_v37  ;;  %vm4131_vm11 = vcmp.lt.f32.partialorder %v13252_v36, %v7822_v37 }
 0x272   : > { %7158 = vmatpush.bf16.msk.msra.mxu0 %vm13229_vm14, %v7629_v61  ;;  %vm13355_vm14 = vmpackc.low %vm4147_vm8, %vm4139_vm0  ;;  %vm15632_vm8 = vnez %v15619_v19  ;;  %v13898_v3 = vpop.permute.xlu1 %4696 }
 0x273   : > { %7174 = vmatpush.bf16.msk.msra.mxu1 %vm13244_vm15, %v7629_v61  ;;  %vm4150_vm15 = vcmp.lt.f32.partialorder %v13130_v26, %v7835_v41  ;;  %vm13379_vm0 = vmpackc.low %vm4149_vm2, %vm4141_vm4  ;;  %vm4125_vm4 = vcmp.lt.f32.partialorder %v13218_v35, %v7830_v40  ;;  %vm4133_vm2 = vcmp.lt.f32.partialorder %v13252_v36, %v7830_v40  ;;  %v2756_v23 = vpop.f32.mrf.mxu2 }
 0x274   : > { %7190 = vmatpush.bf16.msk.msra.mxu2 %vm13262_vm12, %v7629_v61  ;;  %7206 = vmatpush.bf16.msk.msra.mxu3 %vm13282_vm13, %v7629_v61  ;;  %vm13369_vm12 = vmpackc.low %vm4148_vm10, %vm4140_vm1  ;;  %vm4124_vm13 = vcmp.lt.f32.partialorder %v13218_v35, %v7825_v38  ;;  %vm4132_vm1 = vcmp.lt.f32.partialorder %v13252_v36, %v7825_v38 }
 0x275   : > { %vm13390_vm10 = vmpackc.low %vm4150_vm15, %vm4142_vm5  ;;  %vm4126_vm15 = vcmp.lt.f32.partialorder %v13218_v35, %v7835_v41  ;;  %v2769_v28 = vpop.f32.mrf.mxu3 }
 0x276   : > { %7160 = vmatpush.bf16.msk.msra.mxu0 %vm15632_vm8, %v7629_v61  ;;  %vm13406_vm5 = vmpackc.low %vm4131_vm11, %vm4123_vm7  ;;  %vm4134_vm8 = vcmp.lt.f32.partialorder %v13252_v36, %v7835_v41  ;;  %vm4115_vm7 = vcmp.lt.f32.partialorder %v13377_v43, %v7822_v37  ;;  %vm4108_vm11 = vcmp.lt.f32.partialorder %v13270_v5, %v7825_v38 }
 0x277   : > { %7176 = vmatpush.bf16.msk.msra.mxu1 %vm13313_vm9, %v7629_v61  ;;  %vm13422_vm9 = vmpackc.low %vm4132_vm1, %vm4124_vm13  ;;  %vm4116_vm13 = vcmp.lt.f32.partialorder %v13377_v43, %v7825_v38 }
 0x278   : > { %7192 = vmatpush.bf16.msk.msra.mxu2 %vm13321_vm3, %v7629_v61  ;;  %7208 = vmatpush.bf16.msk.msra.mxu3 %vm13335_vm6, %v7629_v61  ;;  %vm4107_vm3 = vcmp.lt.f32.partialorder %v13270_v5, %v7822_v37  ;;  %vm13439_vm6 = vmpackc.low %vm4133_vm2, %vm4125_vm4  ;;  %vm4109_vm4 = vcmp.lt.f32.partialorder %v13270_v5, %v7830_v40  ;;  %vm4117_vm2 = vcmp.lt.f32.partialorder %v13377_v43, %v7830_v40 }
 0x279   : > { %vm13459_vm1 = vmpackc.low %vm4134_vm8, %vm4126_vm15  ;;  %vm4110_vm15 = vcmp.lt.f32.partialorder %v13270_v5, %v7835_v41  ;;  %vm4091_vm8 = vcmp.lt.f32.partialorder %v13398_v9, %v7822_v37 }
 0x27a   : > { %7162 = vmatpush.bf16.msk.msra.mxu0 %vm13355_vm14, %v7629_v61  ;;  %vm13479_vm14 = vmpackc.low %vm4115_vm7, %vm4107_vm3  ;;  %vm4099_vm3 = vcmp.lt.f32.partialorder %v13414_v55, %v7822_v37  ;;  %v14003_v19 = vpop.permute.xlu1 %4676 }
 0x27b   : > { %7178 = vmatpush.bf16.msk.msra.mxu1 %vm13369_vm12, %v7629_v61  ;;  %v15644_v59 = vsel %vm13479_vm14, 4294967295, %v15643_v59  ;;  %vm4118_vm12 = vcmp.lt.f32.partialorder %v13377_v43, %v7835_v41  ;;  %vm13501_vm7 = vmpackc.low %vm4117_vm2, %vm4109_vm4  ;;  %vm4100_vm14 = vcmp.lt.f32.partialorder %v13414_v55, %v7825_v38  ;;  %vm4101_vm4 = vcmp.lt.f32.partialorder %v13414_v55, %v7830_v40 }
 0x27c   : > { %7194 = vmatpush.bf16.msk.msra.mxu2 %vm13379_vm0, %v7629_v61  ;;  %7210 = vmatpush.bf16.msk.msra.mxu3 %vm13390_vm10, %v7629_v61  ;;  %vm13493_vm0 = vmpackc.low %vm4116_vm13, %vm4108_vm11  ;;  %vm4092_vm10 = vcmp.lt.f32.partialorder %v13398_v9, %v7825_v38  ;;  %vm4093_vm13 = vcmp.lt.f32.partialorder %v13398_v9, %v7830_v40 }
 0x27d   : > { %vm13512_vm11 = vmpackc.low %vm4118_vm12, %vm4110_vm15  ;;  %vm4102_vm15 = vcmp.lt.f32.partialorder %v13414_v55, %v7835_v41 }
 0x27e   : > { %7164 = vmatpush.bf16.msk.msra.mxu0 %vm13406_vm5, %v7629_v61  ;;  %vm13526_vm2 = vmpackc.low %vm4099_vm3, %vm4091_vm8  ;;  %vm4094_vm5 = vcmp.lt.f32.partialorder %v13398_v9, %v7835_v41  ;;  %vm4208_vm3 = vcmp.lt.f32.partialorder %v12698_v17, %v8083_v6 }
 0x27f   : > { %7180 = vmatpush.bf16.msk.msra.mxu1 %vm13422_vm9, %v7629_v61  ;;  %vm13537_vm12 = vmpackc.low %vm4100_vm14, %vm4092_vm10  ;;  %vm4207_vm9 = vcmp.lt.f32.partialorder %v12698_v17, %v8046_v18  ;;  %vm15657_vm14 = vnez %v15644_v59 }
 0x280   : > { %7196 = vmatpush.bf16.msk.msra.mxu2 %vm13439_vm6, %v7629_v61  ;;  %7212 = vmatpush.bf16.msk.msra.mxu3 %vm13459_vm1, %v7629_v61  ;;  %vm4215_vm6 = vcmp.lt.f32.partialorder %v12843_v27, %v8046_v18  ;;  %vm13545_vm8 = vmpackc.low %vm4101_vm4, %vm4093_vm13  ;;  %vm4216_vm1 = vcmp.lt.f32.partialorder %v12843_v27, %v8083_v6  ;;  %vm4209_vm13 = vcmp.lt.f32.partialorder %v12698_v17, %v8126_v62 }
 0x281   : > { %v15656_v30 = vsel %vm13545_vm8, 4294967295, %v15655_v30  ;;  %vm13556_vm10 = vmpackc.low %vm4102_vm15, %vm4094_vm5  ;;  %vm4217_vm4 = vcmp.lt.f32.partialorder %v12843_v27, %v8126_v62  ;;  %vm4210_vm5 = vcmp.lt.f32.partialorder %v12698_v17, %v8154_v63  ;;  %vm4218_vm15 = vcmp.lt.f32.partialorder %v12843_v27, %v8154_v63  ;;  %v13608_v27 = vpop.permute.xlu2 %4712 }
 0x282   : > { %7166 = vmatpush.bf16.msk.msra.mxu0 %vm15657_vm14, %v7629_v61  ;;  %vm13570_vm8 = vmpackc.low %vm4215_vm6, %vm4207_vm9  ;;  %vm4192_vm6 = vcmp.lt.f32.partialorder %v12791_v51, %v8083_v6 }
 0x283   : > { %7182 = vmatpush.bf16.msk.msra.mxu1 %vm13493_vm0, %v7629_v61  ;;  %vm13581_vm14 = vmpackc.low %vm4216_vm1, %vm4208_vm3  ;;  %vm4191_vm0 = vcmp.lt.f32.partialorder %v12791_v51, %v8046_v18  ;;  %vm4193_vm1 = vcmp.lt.f32.partialorder %v12791_v51, %v8126_v62 }
 0x284   : > { %7198 = vmatpush.bf16.msk.msra.mxu2 %vm13501_vm7, %v7629_v61  ;;  %7214 = vmatpush.bf16.msk.msra.mxu3 %vm13512_vm11, %v7629_v61  ;;  %vm4199_vm7 = vcmp.lt.f32.partialorder %v12825_v29, %v8046_v18  ;;  %vm13589_vm9 = vmpackc.low %vm4217_vm4, %vm4209_vm13  ;;  %vm4200_vm11 = vcmp.lt.f32.partialorder %v12825_v29, %v8083_v6  ;;  %vm4201_vm13 = vcmp.lt.f32.partialorder %v12825_v29, %v8126_v62 }
 0x285   : > { %vm13600_vm3 = vmpackc.low %vm4218_vm15, %vm4210_vm5  ;;  %vm4194_vm5 = vcmp.lt.f32.partialorder %v12791_v51, %v8154_v63  ;;  %vm4202_vm15 = vcmp.lt.f32.partialorder %v12825_v29, %v8154_v63  ;;  %v3300_v4 = vpop.f32.mrf.mxu0  ;;  %v14089_v29 = vpop.permute.xlu1 %4672 }
 0x286   : > { %7168 = vmatpush.bf16.msk.msra.mxu0 %vm13526_vm2, %v7629_v61  ;;  %vm15668_vm2 = vnez %v15656_v30  ;;  %vm13618_vm4 = vmpackc.low %vm4199_vm7, %vm4191_vm0  ;;  %vm4175_vm0 = vcmp.lt.f32.partialorder %v12950_v33, %v8046_v18  ;;  %vm4183_vm7 = vcmp.lt.f32.partialorder %v12971_v47, %v8046_v18  ;;  %v13734_v58 = vadd.f32 %v3300_v4, %v12906_v45  ;;  %v3313_v13 = vpop.f32.mrf.mxu1 }
 0x287   : > { %7184 = vmatpush.bf16.msk.msra.mxu1 %vm13537_vm12, %v7629_v61  ;;  %vm13635_vm12 = vmpackc.low %vm4200_vm11, %vm4192_vm6  ;;  %vm4177_vm6 = vcmp.lt.f32.partialorder %v12950_v33, %v8126_v62  ;;  %vm4185_vm11 = vcmp.lt.f32.partialorder %v12971_v47, %v8126_v62  ;;  %v13755_v45 = vadd.f32 %v3313_v13, %v12923_v1  ;;  %v246_v1 = vld [vmem:[%s14613_s3 + $0x8] sm:$0xff] }
 0x288   : > { %7200 = vmatpush.bf16.msk.msra.mxu2 %vm15668_vm2, %v7629_v61  ;;  %7216 = vmatpush.bf16.msk.msra.mxu3 %vm13556_vm10, %v7629_v61  ;;  %vm4176_vm10 = vcmp.lt.f32.partialorder %v12950_v33, %v8083_v6 }
 0x289   : > { %4547 = vmatmul.bf16.vlgmr.msra.gmra.mxu0 %v7631_v44  ;;  %v13744_v7 = vpop.permute.xlu2 %4692 }
 0x28a   : > { %7218 = vmatpush.bf16.msk.msrb.mxu0 %vm13570_vm8, %v7629_v61  ;;  %vm13655_vm8 = vmpackc.low %vm4201_vm13, %vm4193_vm1  ;;  %4560 = vmatmul.bf16.vlgmr.msra.gmra.mxu1 %v7631_v44  ;;  %vm4186_vm13 = vcmp.lt.f32.partialorder %v12971_v47, %v8154_v63 }
 0x28b   : > { %7234 = vmatpush.bf16.msk.msrb.mxu1 %vm13581_vm14, %v7629_v61  ;;  %vm4184_vm14 = vcmp.lt.f32.partialorder %v12971_v47, %v8083_v6  ;;  %4573 = vmatmul.bf16.vlgmr.msra.gmra.mxu2 %v7631_v44  ;;  %vm13677_vm1 = vmpackc.low %vm4183_vm7, %vm4175_vm0  ;;  %vm4168_vm7 = vcmp.lt.f32.partialorder %v13093_v39, %v8083_v6 }
 0x28c   : > { %7250 = vmatpush.bf16.msk.msrb.mxu2 %vm13589_vm9, %v7629_v61  ;;  %7266 = vmatpush.bf16.msk.msrb.mxu3 %vm13600_vm3, %v7629_v61  ;;  %vm13667_vm9 = vmpackc.low %vm4202_vm15, %vm4194_vm5  ;;  %vm4178_vm3 = vcmp.lt.f32.partialorder %v12950_v33, %v8154_v63  ;;  %vm4159_vm5 = vcmp.lt.f32.partialorder %v12987_v49, %v8046_v18  ;;  %vm4167_vm15 = vcmp.lt.f32.partialorder %v13093_v39, %v8046_v18 }
 0x28d   : > { %4586 = vmatmul.bf16.vlgmr.msra.gmra.mxu3 %v7631_v44  ;;  %vm13689_vm2 = vmpackc.low %vm4184_vm14, %vm4176_vm10  ;;  %v3326_v52 = vpop.f32.mrf.mxu2  ;;  %v3302_v59 = vpop.f32.mrf.mxu0 }
 0x28e   : > { %7220 = vmatpush.bf16.msk.msrb.mxu0 %vm13618_vm4, %v7629_v61  ;;  %vm13703_vm0 = vmpackc.low %vm4185_vm11, %vm4177_vm6  ;;  %vm4160_vm4 = vcmp.lt.f32.partialorder %v12987_v49, %v8083_v6  ;;  %vm4162_vm6 = vcmp.lt.f32.partialorder %v12987_v49, %v8154_v63  ;;  %v13829_v24 = vadd.f32 %v3326_v52, %v13004_v34  ;;  %v3315_v25 = vpop.f32.mrf.mxu1 }
 0x28f   : > { %7236 = vmatpush.bf16.msk.msrb.mxu1 %vm13635_vm12, %v7629_v61  ;;  %vm13714_vm10 = vmpackc.low %vm4186_vm13, %vm4178_vm3  ;;  %vm4161_vm12 = vcmp.lt.f32.partialorder %v12987_v49, %v8126_v62  ;;  %vm4143_vm3 = vcmp.lt.f32.partialorder %v13120_v48, %v8046_v18  ;;  %vm4151_vm13 = vcmp.lt.f32.partialorder %v13130_v26, %v8046_v18  ;;  %v3339_v21 = vpop.f32.mrf.mxu3 }
 0x290   : > { %7252 = vmatpush.bf16.msk.msrb.mxu2 %vm13655_vm8, %v7629_v61  ;;  %7268 = vmatpush.bf16.msk.msrb.mxu3 %vm13667_vm9, %v7629_v61  ;;  %vm4169_vm8 = vcmp.lt.f32.partialorder %v13093_v39, %v8126_v62  ;;  %vm13722_vm14 = vmpackc.low %vm4167_vm15, %vm4159_vm5  ;;  %vm4170_vm9 = vcmp.lt.f32.partialorder %v13093_v39, %v8154_v63  ;;  %vm4144_vm5 = vcmp.lt.f32.partialorder %v13120_v48, %v8083_v6  ;;  %v14207_v39 = vpop.permute.xlu1 %4652 }
 0x291   : > { %vm13736_vm11 = vmpackc.low %vm4168_vm7, %vm4160_vm4  ;;  %vm4153_vm4 = vcmp.lt.f32.partialorder %v13130_v26, %v8126_v62  ;;  %v13846_v34 = vadd.f32 %v3339_v21, %v13024_v50 }
 0x292   : > { %7222 = vmatpush.bf16.msk.msrb.mxu0 %vm13677_vm1, %v7629_v61  ;;  %vm7255_vm1 = vmpackc.low %vm4169_vm8, %vm4161_vm12  ;;  %vm4154_vm12 = vcmp.lt.f32.partialorder %v13130_v26, %v8154_v63 }
 0x293   : > { %7238 = vmatpush.bf16.msk.msrb.mxu1 %vm13689_vm2, %v7629_v61  ;;  %vm4152_vm2 = vcmp.lt.f32.partialorder %v13130_v26, %v8083_v6  ;;  %vm13776_vm15 = vmpackc.low %vm4170_vm9, %vm4162_vm6  ;;  %vm4127_vm6 = vcmp.lt.f32.partialorder %v13218_v35, %v8046_v18  ;;  %vm4135_vm9 = vcmp.lt.f32.partialorder %v13252_v36, %v8046_v18 }
 0x294   : > { %7254 = vmatpush.bf16.msk.msrb.mxu2 %vm13703_vm0, %v7629_v61  ;;  %7270 = vmatpush.bf16.msk.msrb.mxu3 %vm13714_vm10, %v7629_v61  ;;  %vm4145_vm0 = vcmp.lt.f32.partialorder %v13120_v48, %v8126_v62  ;;  %vm13784_vm7 = vmpackc.low %vm4151_vm13, %vm4143_vm3  ;;  %vm4146_vm10 = vcmp.lt.f32.partialorder %v13120_v48, %v8154_v63  ;;  %vm4136_vm13 = vcmp.lt.f32.partialorder %v13252_v36, %v8083_v6  ;;  %v13815_v48 = vpop.permute.xlu0 %4700 }
 0x295   : > { %vm13795_vm8 = vmpackc.low %vm4152_vm2, %vm4144_vm5  ;;  %v3328_v23 = vpop.f32.mrf.mxu2 }
 0x296   : > { %7224 = vmatpush.bf16.msk.msrb.mxu0 %vm13722_vm14, %v7629_v61  ;;  %vm13807_vm3 = vmpackc.low %vm4153_vm4, %vm4145_vm0  ;;  %vm4128_vm14 = vcmp.lt.f32.partialorder %v13218_v35, %v8083_v6  ;;  %vm4138_vm0 = vcmp.lt.f32.partialorder %v13252_v36, %v8154_v63 }
 0x297   : > { %7240 = vmatpush.bf16.msk.msrb.mxu1 %vm13736_vm11, %v7629_v61  ;;  %vm13820_vm5 = vmpackc.low %vm4154_vm12, %vm4146_vm10  ;;  %vm4129_vm11 = vcmp.lt.f32.partialorder %v13218_v35, %v8126_v62  ;;  %vm4111_vm10 = vcmp.lt.f32.partialorder %v13270_v5, %v8046_v18  ;;  %vm4119_vm12 = vcmp.lt.f32.partialorder %v13377_v43, %v8046_v18  ;;  %v3341_v28 = vpop.f32.mrf.mxu3 }
 0x298   : > { %7256 = vmatpush.bf16.msk.msrb.mxu2 %vm7255_vm1, %v7629_v61  ;;  %7272 = vmatpush.bf16.msk.msrb.mxu3 %vm13776_vm15, %v7629_v61  ;;  %vm4137_vm1 = vcmp.lt.f32.partialorder %v13252_v36, %v8126_v62  ;;  %vm13834_vm2 = vmpackc.low %vm4135_vm9, %vm4127_vm6  ;;  %vm4130_vm15 = vcmp.lt.f32.partialorder %v13218_v35, %v8154_v63  ;;  %vm4112_vm6 = vcmp.lt.f32.partialorder %v13270_v5, %v8083_v6  ;;  %v13896_v36 = vpop.permute.xlu2 %4684 }
 0x299   : > { %vm13854_vm4 = vmpackc.low %vm4136_vm13, %vm4128_vm14  ;;  %vm4121_vm14 = vcmp.lt.f32.partialorder %v13377_v43, %v8126_v62 }
 0x29a   : > { %7226 = vmatpush.bf16.msk.msrb.mxu0 %vm13784_vm7, %v7629_v61  ;;  %vm13874_vm7 = vmpackc.low %vm4137_vm1, %vm4129_vm11  ;;  %vm4122_vm11 = vcmp.lt.f32.partialorder %v13377_v43, %v8154_v63 }
 0x29b   : > { %7242 = vmatpush.bf16.msk.msrb.mxu1 %vm13795_vm8, %v7629_v61  ;;  %vm4120_vm8 = vcmp.lt.f32.partialorder %v13377_v43, %v8083_v6  ;;  %vm13888_vm9 = vmpackc.low %vm4138_vm0, %vm4130_vm15  ;;  %vm4095_vm15 = vcmp.lt.f32.partialorder %v13398_v9, %v8046_v18  ;;  %vm4103_vm0 = vcmp.lt.f32.partialorder %v13414_v55, %v8046_v18 }
 0x29c   : > { %7258 = vmatpush.bf16.msk.msrb.mxu2 %vm13807_vm3, %v7629_v61  ;;  %7274 = vmatpush.bf16.msk.msrb.mxu3 %vm13820_vm5, %v7629_v61  ;;  %vm4113_vm3 = vcmp.lt.f32.partialorder %v13270_v5, %v8126_v62  ;;  %vm13900_vm13 = vmpackc.low %vm4119_vm12, %vm4111_vm10  ;;  %vm4114_vm5 = vcmp.lt.f32.partialorder %v13270_v5, %v8154_v63  ;;  %vm4104_vm12 = vcmp.lt.f32.partialorder %v13414_v55, %v8083_v6  ;;  %v13952_v46 = vpop.permute.xlu0 %4688 }
 0x29d   : > { %vm13911_vm1 = vmpackc.low %vm4120_vm8, %vm4112_vm6 }
 0x29e   : > { %7228 = vmatpush.bf16.msk.msrb.mxu0 %vm13834_vm2, %v7629_v61  ;;  %vm13925_vm10 = vmpackc.low %vm4121_vm14, %vm4113_vm3  ;;  %vm4096_vm2 = vcmp.lt.f32.partialorder %v13398_v9, %v8083_v6  ;;  %vm4098_vm3 = vcmp.lt.f32.partialorder %v13398_v9, %v8154_v63 }
 0x29f   : > { %7244 = vmatpush.bf16.msk.msrb.mxu1 %vm13854_vm4, %v7629_v61  ;;  %vm13936_vm6 = vmpackc.low %vm4122_vm11, %vm4114_vm5  ;;  %vm4097_vm4 = vcmp.lt.f32.partialorder %v13398_v9, %v8126_v62  ;;  %vm4827_vm5 = vcmp.lt.f32.partialorder %v13610_v53, %v7822_v37  ;;  %vm4835_vm11 = vcmp.lt.f32.partialorder %v13608_v27, %v7822_v37 }
 0x2a0   : > { %7260 = vmatpush.bf16.msk.msrb.mxu2 %vm13874_vm7, %v7629_v61  ;;  %7276 = vmatpush.bf16.msk.msrb.mxu3 %vm13888_vm9, %v7629_v61  ;;  %vm4105_vm7 = vcmp.lt.f32.partialorder %v13414_v55, %v8126_v62  ;;  %vm13944_vm8 = vmpackc.low %vm4103_vm0, %vm4095_vm15  ;;  %vm4106_vm9 = vcmp.lt.f32.partialorder %v13414_v55, %v8154_v63  ;;  %vm4836_vm0 = vcmp.lt.f32.partialorder %v13608_v27, %v7825_v38  ;;  %v14001_v32 = vpop.permute.xlu2 %4680 }
 0x2a1   : > { %vm13957_vm14 = vmpackc.low %vm4104_vm12, %vm4096_vm2 }
 0x2a2   : > { %7230 = vmatpush.bf16.msk.msrb.mxu0 %vm13900_vm13, %v7629_v61  ;;  %vm13971_vm15 = vmpackc.low %vm4105_vm7, %vm4097_vm4  ;;  %vm4828_vm13 = vcmp.lt.f32.partialorder %v13610_v53, %v7825_v38  ;;  %vm4830_vm4 = vcmp.lt.f32.partialorder %v13610_v53, %v7835_v41  ;;  %vm4838_vm7 = vcmp.lt.f32.partialorder %v13608_v27, %v7835_v41 }
 0x2a3   : > { %7246 = vmatpush.bf16.msk.msrb.mxu1 %vm13911_vm1, %v7629_v61  ;;  %vm13982_vm2 = vmpackc.low %vm4106_vm9, %vm4098_vm3  ;;  %vm4829_vm1 = vcmp.lt.f32.partialorder %v13610_v53, %v7830_v40  ;;  %vm4811_vm3 = vcmp.lt.f32.partialorder %v13815_v48, %v7822_v37  ;;  %vm4819_vm9 = vcmp.lt.f32.partialorder %v13746_v8, %v7822_v37 }
 0x2a4   : > { %7262 = vmatpush.bf16.msk.msrb.mxu2 %vm13925_vm10, %v7629_v61  ;;  %7278 = vmatpush.bf16.msk.msrb.mxu3 %vm13936_vm6, %v7629_v61  ;;  %vm4837_vm10 = vcmp.lt.f32.partialorder %v13608_v27, %v7830_v40  ;;  %vm7409_vm12 = vmpackc.low %vm4835_vm11, %vm4827_vm5  ;;  %vm4812_vm5 = vcmp.lt.f32.partialorder %v13815_v48, %v7825_v38  ;;  %vm4820_vm11 = vcmp.lt.f32.partialorder %v13746_v8, %v7825_v38  ;;  %v14050_v17 = vpop.permute.xlu0 %4668 }
 0x2a5   : > { %vm7425_vm6 = vmpackc.low %vm4836_vm0, %vm4828_vm13  ;;  %vm4821_vm13 = vcmp.lt.f32.partialorder %v13746_v8, %v7830_v40 }
 0x2a6   : > { %7232 = vmatpush.bf16.msk.msrb.mxu0 %vm13944_vm8, %v7629_v61  ;;  %vm7441_vm8 = vmpackc.low %vm4837_vm10, %vm4829_vm1  ;;  %vm4822_vm1 = vcmp.lt.f32.partialorder %v13746_v8, %v7835_v41  ;;  %v3352_v10 = vpop.f32.mrf.mxu0  ;;  %v3365_v15 = vpop.f32.mrf.mxu1 }
 0x2a7   : > { %7248 = vmatpush.bf16.msk.msrb.mxu1 %vm13957_vm14, %v7629_v61  ;;  %vm7457_vm14 = vmpackc.low %vm4838_vm7, %vm4830_vm4  ;;  %vm4803_vm4 = vcmp.lt.f32.partialorder %v13898_v3, %v7822_v37  ;;  %v14081_v31 = vadd.f32 %v3352_v10, %v13333_v2  ;;  %v14094_v22 = vadd.f32 %v3365_v15, %v13350_v11  ;;  %v244_v2 = vld [vmem:[%s14612_s2 + $0x8] sm:$0xff] }
 0x2a8   : > { %7264 = vmatpush.bf16.msk.msrb.mxu2 %vm13971_vm15, %v7629_v61  ;;  %7280 = vmatpush.bf16.msk.msrb.mxu3 %vm13982_vm2, %v7629_v61  ;;  %vm4813_vm15 = vcmp.lt.f32.partialorder %v13815_v48, %v7830_v40  ;;  %vm7411_vm0 = vmpackc.low %vm4819_vm9, %vm4811_vm3  ;;  %vm4814_vm2 = vcmp.lt.f32.partialorder %v13815_v48, %v7835_v41  ;;  %vm4804_vm3 = vcmp.lt.f32.partialorder %v13898_v3, %v7825_v38  ;;  %v14087_v51 = vpop.permute.xlu2 %4660 }
 0x2a9   : > { %4599 = vmatmul.bf16.vlgmr.msrb.gmra.mxu0 %v7631_v44  ;;  %vm7427_vm10 = vmpackc.low %vm4820_vm11, %vm4812_vm5  ;;  %vm4805_vm5 = vcmp.lt.f32.partialorder %v13898_v3, %v7830_v40  ;;  %5290 = vperm.xlu1 %7584, %v244_v2  }
 0x2aa   : > { %7410 = vmatpush.bf16.msk.msra.mxu0 %vm7409_vm12, %v7629_v61  ;;  %vm4795_vm12 = vcmp.lt.f32.partialorder %v13744_v7, %v7822_v37  ;;  %4612 = vmatmul.bf16.vlgmr.msrb.gmra.mxu1 %v7631_v44  ;;  %vm7443_vm7 = vmpackc.low %vm4821_vm13, %vm4813_vm15  ;;  %vm4806_vm15 = vcmp.lt.f32.partialorder %v13898_v3, %v7835_v41 }
 0x2ab   : > { %7426 = vmatpush.bf16.msk.msra.mxu1 %vm7425_vm6, %v7629_v61  ;;  %4625 = vmatmul.bf16.vlgmr.msrb.gmra.mxu2 %v7631_v44  ;;  %vm4796_vm6 = vcmp.lt.f32.partialorder %v13744_v7, %v7825_v38  ;;  %vm7459_vm9 = vmpackc.low %vm4822_vm1, %vm4814_vm2  ;;  %vm4787_vm2 = vcmp.lt.f32.partialorder %v13952_v46, %v7822_v37 }
 0x2ac   : > { %7442 = vmatpush.bf16.msk.msra.mxu2 %vm7441_vm8, %v7629_v61  ;;  %7458 = vmatpush.bf16.msk.msra.mxu3 %vm7457_vm14, %v7629_v61  ;;  %vm4797_vm8 = vcmp.lt.f32.partialorder %v13744_v7, %v7830_v40  ;;  %vm7413_vm11 = vmpackc.low %vm4803_vm4, %vm4795_vm12  ;;  %vm4798_vm14 = vcmp.lt.f32.partialorder %v13744_v7, %v7835_v41  ;;  %vm4788_vm12 = vcmp.lt.f32.partialorder %v13952_v46, %v7825_v38  ;;  %v14141_v11 = vpop.permute.xlu0 %4664 }
 0x2ad   : > { %4638 = vmatmul.bf16.vlgmr.msrb.gmra.mxu3 %v7631_v44  ;;  %vm7429_vm13 = vmpackc.low %vm4804_vm3, %vm4796_vm6  ;;  %vm4789_vm6 = vcmp.lt.f32.partialorder %v13952_v46, %v7830_v40 }
 0x2ae   : > { %7412 = vmatpush.bf16.msk.msra.mxu0 %vm7411_vm0, %v7629_v61  ;;  %vm4779_vm0 = vcmp.lt.f32.partialorder %v13896_v36, %v7822_v37  ;;  %vm7445_vm1 = vmpackc.low %vm4805_vm5, %vm4797_vm8  ;;  %vm4790_vm8 = vcmp.lt.f32.partialorder %v13952_v46, %v7835_v41  ;;  %v3378_v47 = vpop.f32.mrf.mxu2  ;;  %v3391_v60 = vpop.f32.mrf.mxu3 }
 0x2af   : > { %7428 = vmatpush.bf16.msk.msra.mxu1 %vm7427_vm10, %v7629_v61  ;;  %vm4780_vm10 = vcmp.lt.f32.partialorder %v13896_v36, %v7825_v38  ;;  %vm7461_vm4 = vmpackc.low %vm4806_vm15, %vm4798_vm14  ;;  %vm4771_vm14 = vcmp.lt.f32.partialorder %v14001_v32, %v7822_v37  ;;  %v14153_v4 = vadd.f32 %v3378_v47, %v13431_v16  ;;  %v3354_v13 = vpop.f32.mrf.mxu0  ;;  %v14164_v42 = vadd.f32 %v3391_v60, %v13451_v57  ;;  %v3367_v16 = vpop.f32.mrf.mxu1 }
 0x2b0   : > { %7444 = vmatpush.bf16.msk.msra.mxu2 %vm7443_vm7, %v7629_v61  ;;  %7460 = vmatpush.bf16.msk.msra.mxu3 %vm7459_vm9, %v7629_v61  ;;  %vm4781_vm7 = vcmp.lt.f32.partialorder %v13896_v36, %v7830_v40  ;;  %vm7415_vm3 = vmpackc.low %vm4787_vm2, %vm4779_vm0  ;;  %vm4782_vm9 = vcmp.lt.f32.partialorder %v13896_v36, %v7835_v41  ;;  %vm4772_vm0 = vcmp.lt.f32.partialorder %v14001_v32, %v7825_v38  ;;  %v14205_v49 = vpop.permute.xlu2 %4656 }
 0x2b1   : > { %vm7431_vm5 = vmpackc.low %vm4788_vm12, %vm4780_vm10  ;;  %vm4773_vm10 = vcmp.lt.f32.partialorder %v14001_v32, %v7830_v40  ;;  %5350 = vperm.xlu1 %7584, %v246_v1  }
 0x2b2   : > { %7414 = vmatpush.bf16.msk.msra.mxu0 %vm7413_vm11, %v7629_v61  ;;  %vm4763_vm11 = vcmp.lt.f32.partialorder %v14003_v19, %v7822_v37  ;;  %vm7447_vm15 = vmpackc.low %vm4789_vm6, %vm4781_vm7  ;;  %vm4774_vm7 = vcmp.lt.f32.partialorder %v14001_v32, %v7835_v41 }
 0x2b3   : > { %7430 = vmatpush.bf16.msk.msra.mxu1 %vm7429_vm13, %v7629_v61  ;;  %vm4764_vm13 = vcmp.lt.f32.partialorder %v14003_v19, %v7825_v38  ;;  %vm7463_vm2 = vmpackc.low %vm4790_vm8, %vm4782_vm9  ;;  %vm4755_vm9 = vcmp.lt.f32.partialorder %v14089_v29, %v7822_v37 }
 0x2b4   : > { %7446 = vmatpush.bf16.msk.msra.mxu2 %vm7445_vm1, %v7629_v61  ;;  %7462 = vmatpush.bf16.msk.msra.mxu3 %vm7461_vm4, %v7629_v61  ;;  %vm4765_vm1 = vcmp.lt.f32.partialorder %v14003_v19, %v7830_v40  ;;  %vm7417_vm12 = vmpackc.low %vm4771_vm14, %vm4763_vm11  ;;  %vm4766_vm4 = vcmp.lt.f32.partialorder %v14003_v19, %v7835_v41  ;;  %vm4756_vm11 = vcmp.lt.f32.partialorder %v14089_v29, %v7825_v38 }
 0x2b5   : > { %vm14144_vm6 = vmpackc.low %vm4772_vm0, %vm4764_vm13  ;;  %vm4757_vm13 = vcmp.lt.f32.partialorder %v14089_v29, %v7830_v40 }
 0x2b6   : > { %7416 = vmatpush.bf16.msk.msra.mxu0 %vm7415_vm3, %v7629_v61  ;;  %vm4747_vm3 = vcmp.lt.f32.partialorder %v14050_v17, %v7822_v37  ;;  %vm7449_vm8 = vmpackc.low %vm4773_vm10, %vm4765_vm1  ;;  %vm4758_vm1 = vcmp.lt.f32.partialorder %v14089_v29, %v7835_v41  ;;  %v3380_v26 = vpop.f32.mrf.mxu2  ;;  %v3393_v52 = vpop.f32.mrf.mxu3 }
 0x2b7   : > { %7432 = vmatpush.bf16.msk.msra.mxu1 %vm7431_vm5, %v7629_v61  ;;  %vm4748_vm5 = vcmp.lt.f32.partialorder %v14050_v17, %v7825_v38  ;;  %vm7465_vm14 = vmpackc.low %vm4774_vm7, %vm4766_vm4  ;;  %vm4739_vm4 = vcmp.lt.f32.partialorder %v14141_v11, %v7822_v37 }
 0x2b8   : > { %7448 = vmatpush.bf16.msk.msra.mxu2 %vm7447_vm15, %v7629_v61  ;;  %7464 = vmatpush.bf16.msk.msra.mxu3 %vm7463_vm2, %v7629_v61  ;;  %vm4749_vm15 = vcmp.lt.f32.partialorder %v14050_v17, %v7830_v40  ;;  %vm14180_vm0 = vmpackc.low %vm4755_vm9, %vm4747_vm3  ;;  %vm4750_vm2 = vcmp.lt.f32.partialorder %v14050_v17, %v7835_v41  ;;  %vm4740_vm3 = vcmp.lt.f32.partialorder %v14141_v11, %v7825_v38 }
 0x2b9   : > { %vm7435_vm10 = vmpackc.low %vm4756_vm11, %vm4748_vm5  ;;  %vm4741_vm5 = vcmp.lt.f32.partialorder %v14141_v11, %v7830_v40 }
 0x2ba   : > { %7418 = vmatpush.bf16.msk.msra.mxu0 %vm7417_vm12, %v7629_v61  ;;  %vm4731_vm12 = vcmp.lt.f32.partialorder %v14087_v51, %v7822_v37  ;;  %vm7451_vm7 = vmpackc.low %vm4757_vm13, %vm4749_vm15  ;;  %vm4742_vm15 = vcmp.lt.f32.partialorder %v14141_v11, %v7835_v41 }
 0x2bb   : > { %7434 = vmatpush.bf16.msk.msra.mxu1 %vm14144_vm6, %v7629_v61  ;;  %vm4732_vm6 = vcmp.lt.f32.partialorder %v14087_v51, %v7825_v38  ;;  %vm7467_vm9 = vmpackc.low %vm4758_vm1, %vm4750_vm2  ;;  %vm4723_vm2 = vcmp.lt.f32.partialorder %v14205_v49, %v7822_v37 }
 0x2bc   : > { %7450 = vmatpush.bf16.msk.msra.mxu2 %vm7449_vm8, %v7629_v61  ;;  %7466 = vmatpush.bf16.msk.msra.mxu3 %vm7465_vm14, %v7629_v61  ;;  %vm4733_vm8 = vcmp.lt.f32.partialorder %v14087_v51, %v7830_v40  ;;  %vm7421_vm11 = vmpackc.low %vm4739_vm4, %vm4731_vm12  ;;  %vm4734_vm14 = vcmp.lt.f32.partialorder %v14087_v51, %v7835_v41  ;;  %vm4724_vm12 = vcmp.lt.f32.partialorder %v14205_v49, %v7825_v38 }
 0x2bd   : > { %vm7437_vm13 = vmpackc.low %vm4740_vm3, %vm4732_vm6  ;;  %vm4725_vm6 = vcmp.lt.f32.partialorder %v14205_v49, %v7830_v40 }
 0x2be   : > { %7420 = vmatpush.bf16.msk.msra.mxu0 %vm14180_vm0, %v7629_v61  ;;  %vm4715_vm0 = vcmp.lt.f32.partialorder %v14207_v39, %v7822_v37  ;;  %vm7453_vm1 = vmpackc.low %vm4741_vm5, %vm4733_vm8  ;;  %vm4726_vm8 = vcmp.lt.f32.partialorder %v14205_v49, %v7835_v41 }
 0x2bf   : > { %7436 = vmatpush.bf16.msk.msra.mxu1 %vm7435_vm10, %v7629_v61  ;;  %vm4716_vm10 = vcmp.lt.f32.partialorder %v14207_v39, %v7825_v38  ;;  %vm7469_vm4 = vmpackc.low %vm4742_vm15, %vm4734_vm14  ;;  %vm4839_vm14 = vcmp.lt.f32.partialorder %v13608_v27, %v8046_v18 }
 0x2c0   : > { %7452 = vmatpush.bf16.msk.msra.mxu2 %vm7451_vm7, %v7629_v61  ;;  %7468 = vmatpush.bf16.msk.msra.mxu3 %vm7467_vm9, %v7629_v61  ;;  %vm4717_vm7 = vcmp.lt.f32.partialorder %v14207_v39, %v7830_v40  ;;  %vm7423_vm3 = vmpackc.low %vm4723_vm2, %vm4715_vm0  ;;  %vm4718_vm9 = vcmp.lt.f32.partialorder %v14207_v39, %v7835_v41  ;;  %vm4840_vm0 = vcmp.lt.f32.partialorder %v13608_v27, %v8083_v6 }
 0x2c1   : > { %vm7439_vm5 = vmpackc.low %vm4724_vm12, %vm4716_vm10  ;;  %vm4841_vm10 = vcmp.lt.f32.partialorder %v13608_v27, %v8126_v62 }
 0x2c2   : > { %7422 = vmatpush.bf16.msk.msra.mxu0 %vm7421_vm11, %v7629_v61  ;;  %vm4831_vm11 = vcmp.lt.f32.partialorder %v13610_v53, %v8046_v18  ;;  %vm7455_vm15 = vmpackc.low %vm4725_vm6, %vm4717_vm7  ;;  %vm4842_vm7 = vcmp.lt.f32.partialorder %v13608_v27, %v8154_v63 }
 0x2c3   : > { %7438 = vmatpush.bf16.msk.msra.mxu1 %vm7437_vm13, %v7629_v61  ;;  %vm4832_vm13 = vcmp.lt.f32.partialorder %v13610_v53, %v8083_v6  ;;  %vm7471_vm2 = vmpackc.low %vm4726_vm8, %vm4718_vm9  ;;  %vm4823_vm9 = vcmp.lt.f32.partialorder %v13746_v8, %v8046_v18 }
 0x2c4   : > { %7454 = vmatpush.bf16.msk.msra.mxu2 %vm7453_vm1, %v7629_v61  ;;  %7470 = vmatpush.bf16.msk.msra.mxu3 %vm7469_vm4, %v7629_v61  ;;  %vm4833_vm1 = vcmp.lt.f32.partialorder %v13610_v53, %v8126_v62  ;;  %vm7473_vm12 = vmpackc.low %vm4839_vm14, %vm4831_vm11  ;;  %vm4834_vm4 = vcmp.lt.f32.partialorder %v13610_v53, %v8154_v63  ;;  %vm4824_vm11 = vcmp.lt.f32.partialorder %v13746_v8, %v8083_v6  ;;  %v245_v53 = vld [vmem:[%s14613_s3] sm:$0xff] }
 0x2c5   : > { %vm7489_vm6 = vmpackc.low %vm4840_vm0, %vm4832_vm13  ;;  %vm4825_vm13 = vcmp.lt.f32.partialorder %v13746_v8, %v8126_v62  ;;  %5345 = vperm.xlu2 %7585, %v245_v53  }
 0x2c6   : > { %7424 = vmatpush.bf16.msk.msra.mxu0 %vm7423_vm3, %v7629_v61  ;;  %vm4815_vm3 = vcmp.lt.f32.partialorder %v13815_v48, %v8046_v18  ;;  %vm7505_vm8 = vmpackc.low %vm4841_vm10, %vm4833_vm1  ;;  %vm4826_vm1 = vcmp.lt.f32.partialorder %v13746_v8, %v8154_v63  ;;  %v3924_v27 = vpop.f32.mrf.mxu0 }
 0x2c7   : > { %7440 = vmatpush.bf16.msk.msra.mxu1 %vm7439_vm5, %v7629_v61  ;;  %vm4816_vm5 = vcmp.lt.f32.partialorder %v13815_v48, %v8083_v6  ;;  %vm7521_vm14 = vmpackc.low %vm4842_vm7, %vm4834_vm4  ;;  %vm4807_vm4 = vcmp.lt.f32.partialorder %v13898_v3, %v8046_v18  ;;  %v14331_v8 = vadd.f32 %v3924_v27, %v13734_v58 }
 0x2c8   : > { %7456 = vmatpush.bf16.msk.msra.mxu2 %vm7455_vm15, %v7629_v61  ;;  %7472 = vmatpush.bf16.msk.msra.mxu3 %vm7471_vm2, %v7629_v61  ;;  %vm4817_vm15 = vcmp.lt.f32.partialorder %v13815_v48, %v8126_v62  ;;  %vm7475_vm0 = vmpackc.low %vm4823_vm9, %vm4815_vm3  ;;  %vm4818_vm2 = vcmp.lt.f32.partialorder %v13815_v48, %v8154_v63  ;;  %vm4808_vm3 = vcmp.lt.f32.partialorder %v13898_v3, %v8083_v6  ;;  %v3937_v48 = vpop.f32.mrf.mxu1 }
 0x2c9   : > { %5171 = vmatmul.bf16.vlgmr.msra.gmra.mxu0 %v7631_v44  ;;  %vm7491_vm10 = vmpackc.low %vm4824_vm11, %vm4816_vm5  ;;  %vm4809_vm5 = vcmp.lt.f32.partialorder %v13898_v3, %v8126_v62  ;;  %v14345_v58 = vadd.f32 %v3937_v48, %v13755_v45 }
 0x2ca   : > { %7474 = vmatpush.bf16.msk.msrb.mxu0 %vm7473_vm12, %v7629_v61  ;;  %5184 = vmatmul.bf16.vlgmr.msra.gmra.mxu1 %v7631_v44  ;;  %vm4799_vm12 = vcmp.lt.f32.partialorder %v13744_v7, %v8046_v18  ;;  %vm7507_vm7 = vmpackc.low %vm4825_vm13, %vm4817_vm15  ;;  %vm4810_vm15 = vcmp.lt.f32.partialorder %v13898_v3, %v8154_v63 }
 0x2cb   : > { %7490 = vmatpush.bf16.msk.msrb.mxu1 %vm7489_vm6, %v7629_v61  ;;  %5197 = vmatmul.bf16.vlgmr.msra.gmra.mxu2 %v7631_v44  ;;  %vm4800_vm6 = vcmp.lt.f32.partialorder %v13744_v7, %v8083_v6  ;;  %vm7523_vm9 = vmpackc.low %vm4826_vm1, %vm4818_vm2  ;;  %vm4791_vm2 = vcmp.lt.f32.partialorder %v13952_v46, %v8046_v18 }
 0x2cc   : > { %7506 = vmatpush.bf16.msk.msrb.mxu2 %vm7505_vm8, %v7629_v61  ;;  %7522 = vmatpush.bf16.msk.msrb.mxu3 %vm7521_vm14, %v7629_v61  ;;  %vm4801_vm8 = vcmp.lt.f32.partialorder %v13744_v7, %v8126_v62  ;;  %vm7477_vm11 = vmpackc.low %vm4807_vm4, %vm4799_vm12  ;;  %vm4802_vm14 = vcmp.lt.f32.partialorder %v13744_v7, %v8154_v63  ;;  %vm4792_vm12 = vcmp.lt.f32.partialorder %v13952_v46, %v8083_v6 }
 0x2cd   : > { %5210 = vmatmul.bf16.vlgmr.msra.gmra.mxu3 %v7631_v44  ;;  %vm7493_vm13 = vmpackc.low %vm4808_vm3, %vm4800_vm6  ;;  %vm4793_vm6 = vcmp.lt.f32.partialorder %v13952_v46, %v8126_v62 }
 0x2ce   : > { %7476 = vmatpush.bf16.msk.msrb.mxu0 %vm7475_vm0, %v7629_v61  ;;  %vm4783_vm0 = vcmp.lt.f32.partialorder %v13896_v36, %v8046_v18  ;;  %vm7509_vm1 = vmpackc.low %vm4809_vm5, %vm4801_vm8  ;;  %vm4794_vm8 = vcmp.lt.f32.partialorder %v13952_v46, %v8154_v63  ;;  %v3950_v7 = vpop.f32.mrf.mxu2  ;;  %v3926_v20 = vpop.f32.mrf.mxu0 }
 0x2cf   : > { %7492 = vmatpush.bf16.msk.msrb.mxu1 %vm7491_vm10, %v7629_v61  ;;  %vm4784_vm10 = vcmp.lt.f32.partialorder %v13896_v36, %v8083_v6  ;;  %vm7525_vm4 = vmpackc.low %vm4810_vm15, %vm4802_vm14  ;;  %vm4775_vm14 = vcmp.lt.f32.partialorder %v14001_v32, %v8046_v18  ;;  %v14388_v45 = vadd.f32 %v3950_v7, %v13829_v24 }
 0x2d0   : > { %7508 = vmatpush.bf16.msk.msrb.mxu2 %vm7507_vm7, %v7629_v61  ;;  %7524 = vmatpush.bf16.msk.msrb.mxu3 %vm7523_vm9, %v7629_v61  ;;  %vm4785_vm7 = vcmp.lt.f32.partialorder %v13896_v36, %v8126_v62  ;;  %vm7479_vm3 = vmpackc.low %vm4791_vm2, %vm4783_vm0  ;;  %vm4786_vm9 = vcmp.lt.f32.partialorder %v13896_v36, %v8154_v63  ;;  %vm4776_vm0 = vcmp.lt.f32.partialorder %v14001_v32, %v8083_v6  ;;  %v3963_v21 = vpop.f32.mrf.mxu3  ;;  %v3939_v0 = vpop.f32.mrf.mxu1 }
 0x2d1   : > { %vm7495_vm5 = vmpackc.low %vm4792_vm12, %vm4784_vm10  ;;  %vm4777_vm10 = vcmp.lt.f32.partialorder %v14001_v32, %v8126_v62  ;;  %v14395_v59 = vadd.f32 %v3963_v21, %v13846_v34 }
 0x2d2   : > { %7478 = vmatpush.bf16.msk.msrb.mxu0 %vm7477_vm11, %v7629_v61  ;;  %vm4767_vm11 = vcmp.lt.f32.partialorder %v14003_v19, %v8046_v18  ;;  %vm7511_vm15 = vmpackc.low %vm4793_vm6, %vm4785_vm7  ;;  %vm4778_vm7 = vcmp.lt.f32.partialorder %v14001_v32, %v8154_v63 }
 0x2d3   : > { %7494 = vmatpush.bf16.msk.msrb.mxu1 %vm7493_vm13, %v7629_v61  ;;  %vm4768_vm13 = vcmp.lt.f32.partialorder %v14003_v19, %v8083_v6  ;;  %vm7527_vm2 = vmpackc.low %vm4794_vm8, %vm4786_vm9  ;;  %vm4759_vm9 = vcmp.lt.f32.partialorder %v14089_v29, %v8046_v18 }
 0x2d4   : > { %7510 = vmatpush.bf16.msk.msrb.mxu2 %vm7509_vm1, %v7629_v61  ;;  %7526 = vmatpush.bf16.msk.msrb.mxu3 %vm7525_vm4, %v7629_v61  ;;  %vm4769_vm1 = vcmp.lt.f32.partialorder %v14003_v19, %v8126_v62  ;;  %vm7481_vm12 = vmpackc.low %vm4775_vm14, %vm4767_vm11  ;;  %vm4770_vm4 = vcmp.lt.f32.partialorder %v14003_v19, %v8154_v63  ;;  %vm4760_vm11 = vcmp.lt.f32.partialorder %v14089_v29, %v8083_v6 }
 0x2d5   : > { %vm7497_vm6 = vmpackc.low %vm4776_vm0, %vm4768_vm13  ;;  %vm4761_vm13 = vcmp.lt.f32.partialorder %v14089_v29, %v8126_v62 }
 0x2d6   : > { %7480 = vmatpush.bf16.msk.msrb.mxu0 %vm7479_vm3, %v7629_v61  ;;  %vm4751_vm3 = vcmp.lt.f32.partialorder %v14050_v17, %v8046_v18  ;;  %vm7513_vm8 = vmpackc.low %vm4777_vm10, %vm4769_vm1  ;;  %vm4762_vm1 = vcmp.lt.f32.partialorder %v14089_v29, %v8154_v63  ;;  %v3952_v24 = vpop.f32.mrf.mxu2 }
 0x2d7   : > { %7496 = vmatpush.bf16.msk.msrb.mxu1 %vm7495_vm5, %v7629_v61  ;;  %vm4752_vm5 = vcmp.lt.f32.partialorder %v14050_v17, %v8083_v6  ;;  %vm7529_vm14 = vmpackc.low %vm4778_vm7, %vm4770_vm4  ;;  %vm4743_vm4 = vcmp.lt.f32.partialorder %v14141_v11, %v8046_v18 }
 0x2d8   : > { %7512 = vmatpush.bf16.msk.msrb.mxu2 %vm7511_vm15, %v7629_v61  ;;  %7528 = vmatpush.bf16.msk.msrb.mxu3 %vm7527_vm2, %v7629_v61  ;;  %vm4753_vm15 = vcmp.lt.f32.partialorder %v14050_v17, %v8126_v62  ;;  %vm7483_vm0 = vmpackc.low %vm4759_vm9, %vm4751_vm3  ;;  %vm4754_vm2 = vcmp.lt.f32.partialorder %v14050_v17, %v8154_v63  ;;  %vm4744_vm3 = vcmp.lt.f32.partialorder %v14141_v11, %v8083_v6  ;;  %v3965_v34 = vpop.f32.mrf.mxu3 }
 0x2d9   : > { %vm7499_vm10 = vmpackc.low %vm4760_vm11, %vm4752_vm5  ;;  %vm4745_vm5 = vcmp.lt.f32.partialorder %v14141_v11, %v8126_v62 }
 0x2da   : > { %7482 = vmatpush.bf16.msk.msrb.mxu0 %vm7481_vm12, %v7629_v61  ;;  %vm4735_vm12 = vcmp.lt.f32.partialorder %v14087_v51, %v8046_v18  ;;  %vm7515_vm7 = vmpackc.low %vm4761_vm13, %vm4753_vm15  ;;  %vm4746_vm15 = vcmp.lt.f32.partialorder %v14141_v11, %v8154_v63 }
 0x2db   : > { %7498 = vmatpush.bf16.msk.msrb.mxu1 %vm7497_vm6, %v7629_v61  ;;  %vm4736_vm6 = vcmp.lt.f32.partialorder %v14087_v51, %v8083_v6  ;;  %vm7531_vm9 = vmpackc.low %vm4762_vm1, %vm4754_vm2  ;;  %vm4727_vm2 = vcmp.lt.f32.partialorder %v14205_v49, %v8046_v18 }
 0x2dc   : > { %7514 = vmatpush.bf16.msk.msrb.mxu2 %vm7513_vm8, %v7629_v61  ;;  %7530 = vmatpush.bf16.msk.msrb.mxu3 %vm7529_vm14, %v7629_v61  ;;  %vm4737_vm8 = vcmp.lt.f32.partialorder %v14087_v51, %v8126_v62  ;;  %vm7485_vm11 = vmpackc.low %vm4743_vm4, %vm4735_vm12  ;;  %vm4738_vm14 = vcmp.lt.f32.partialorder %v14087_v51, %v8154_v63  ;;  %vm4728_vm12 = vcmp.lt.f32.partialorder %v14205_v49, %v8083_v6 }
 0x2dd   : > { %vm7501_vm13 = vmpackc.low %vm4744_vm3, %vm4736_vm6  ;;  %vm4729_vm6 = vcmp.lt.f32.partialorder %v14205_v49, %v8126_v62 }
 0x2de   : > { %7484 = vmatpush.bf16.msk.msrb.mxu0 %vm7483_vm0, %v7629_v61  ;;  %vm4719_vm0 = vcmp.lt.f32.partialorder %v14207_v39, %v8046_v18  ;;  %vm7517_vm1 = vmpackc.low %vm4745_vm5, %vm4737_vm8  ;;  %vm4730_vm8 = vcmp.lt.f32.partialorder %v14205_v49, %v8154_v63 }
 0x2df   : > { %7500 = vmatpush.bf16.msk.msrb.mxu1 %vm7499_vm10, %v7629_v61  ;;  %vm4720_vm10 = vcmp.lt.f32.partialorder %v14207_v39, %v8083_v6  ;;  %vm7533_vm4 = vmpackc.low %vm4746_vm15, %vm4738_vm14 }
 0x2e0   : > { %7516 = vmatpush.bf16.msk.msrb.mxu2 %vm7515_vm7, %v7629_v61  ;;  %7532 = vmatpush.bf16.msk.msrb.mxu3 %vm7531_vm9, %v7629_v61  ;;  %vm4721_vm7 = vcmp.lt.f32.partialorder %v14207_v39, %v8126_v62  ;;  %vm7487_vm3 = vmpackc.low %vm4727_vm2, %vm4719_vm0  ;;  %vm4722_vm9 = vcmp.lt.f32.partialorder %v14207_v39, %v8154_v63 }
 0x2e1   : > { %vm7503_vm5 = vmpackc.low %vm4728_vm12, %vm4720_vm10  ;;  %v14510_v21 = vpop.permute.xlu0 %5285 }
 0x2e2   : > { %7486 = vmatpush.bf16.msk.msrb.mxu0 %vm7485_vm11, %v7629_v61  ;;  %vm7519_vm11 = vmpackc.low %vm4729_vm6, %vm4721_vm7 }
 0x2e3   : > { %7502 = vmatpush.bf16.msk.msrb.mxu1 %vm7501_vm13, %v7629_v61  ;;  %vm7535_vm14 = vmpackc.low %vm4730_vm8, %vm4722_vm9 }
 0x2e4   : > { %7518 = vmatpush.bf16.msk.msrb.mxu2 %vm7517_vm1, %v7629_v61  ;;  %7534 = vmatpush.bf16.msk.msrb.mxu3 %vm7533_vm4, %v7629_v61 }
 0x2e6   : > { %7488 = vmatpush.bf16.msk.msrb.mxu0 %vm7487_vm3, %v7629_v61  ;;  %v3976_v25 = vpop.f32.mrf.mxu0 }
 0x2e7   : > { %7504 = vmatpush.bf16.msk.msrb.mxu1 %vm7503_vm5, %v7629_v61  ;;  %v4023_v50 = vadd.f32 %v3976_v25, %v14081_v31  ;;  %v3989_v12 = vpop.f32.mrf.mxu1 }
 0x2e8   : > { %7520 = vmatpush.bf16.msk.msrb.mxu2 %vm7519_vm11, %v7629_v61  ;;  %7536 = vmatpush.bf16.msk.msrb.mxu3 %vm7535_vm14, %v7629_v61  ;;  %v14478_v36 = vadd.f32 %v3989_v12, %v14094_v22 }
 0x2e9   : > { %5223 = vmatmul.bf16.vlgmr.msrb.gmra.mxu0 %v7631_v44 }
 0x2ea   : > { %5236 = vmatmul.bf16.vlgmr.msrb.gmra.mxu1 %v7631_v44 }
 0x2eb   : > { %5249 = vmatmul.bf16.vlgmr.msrb.gmra.mxu2 %v7631_v44  ;;  %5262 = vmatmul.bf16.vlgmr.msrb.gmra.mxu3 %v7631_v44 }
 0x2ee   : > { %v4002_v3 = vpop.f32.mrf.mxu2  ;;  %v3978_v35 = vpop.f32.mrf.mxu0 }
 0x2ef   : > { %v14481_v14 = vadd.f32 %v4002_v3, %v14153_v4  ;;  %v3991_v43 = vpop.f32.mrf.mxu1 }
 0x2f0   : > { %v4015_v61 = vpop.f32.mrf.mxu3 }
 0x2f1   : > { %v14484_v5 = vadd.f32 %v4015_v61, %v14164_v42 }
 0x2f6   : > { %v4004_v23 = vpop.f32.mrf.mxu2 }
 0x2f8   : > { %v4017_v30 = vpop.f32.mrf.mxu3 }
 0x306   : > { %v4548_v44 = vpop.f32.mrf.mxu0 }
 0x307   : > { %v4643_v28 = vadd.f32 %v4548_v44, %v14331_v8  ;;  %v4561_v46 = vpop.f32.mrf.mxu1 }
 0x308   : > { %v4644_v54 = vadd.f32 %v4561_v46, %v14345_v58 }
 0x30e   : > { %v4574_v9 = vpop.f32.mrf.mxu2  ;;  %v4550_v19 = vpop.f32.mrf.mxu0 }
 0x30f   : > { %v4645_v55 = vadd.f32 %v4574_v9, %v14388_v45  ;;  %v4563_v10 = vpop.f32.mrf.mxu1 }
 0x310   : > { %v4587_v32 = vpop.f32.mrf.mxu3 }
 0x311   : > { %v4646_v17 = vadd.f32 %v4587_v32, %v14395_v59 }
 0x316   : > { %v4576_v31 = vpop.f32.mrf.mxu2 }
 0x318   : > { %v4589_v15 = vpop.f32.mrf.mxu3 }
 0x31b   : > { %v14498_v16 = vpop.permute.xlu1 %5290 }
 0x31f   : > { %v14500_v58 = vpop.permute.xlu2 %5345 }
 0x323   : > { %v14508_v45 = vpop.permute.xlu1 %5350 }
 0x326   : > { %v4600_v51 = vpop.f32.mrf.mxu0 }
 0x327   : > { %v14490_v29 = vadd.f32 %v4600_v51, %v4023_v50  ;;  %v14492_v22 = vpop.f32.mrf.mxu1 }
 0x328   : > { %v4648_v51 = vadd.f32 %v14492_v22, %v14478_v36 }
 0x32e   : > { %v14494_v2 = vpop.f32.mrf.mxu2  ;;  %v4602_v33 = vpop.f32.mrf.mxu0 }
 0x32f   : > { %v4615_v47 = vpop.f32.mrf.mxu1 }
 0x330   : > { %v14496_v11 = vpop.f32.mrf.mxu3 }
 0x336   : > { %v4628_v4 = vpop.f32.mrf.mxu2 }
 0x338   : > { %v4641_v60 = vpop.f32.mrf.mxu3 }
 0x346   : > { %v5172_v13 = vpop.f32.mrf.mxu0 }
 0x347   : > { %v5185_v42 = vpop.f32.mrf.mxu1  ;;  %v5267_v57 = vadd.f32 %v5172_v13, %v4643_v28 }
 0x348   : > { %v5268_v1 = vadd.f32 %v5185_v42, %v4644_v54 }
 0x349   : > { %v5275_v39 = vperm.slane %v5267_v57, 0 }
 0x34a   : > { %v5276_v53 = vperm.slane %v5268_v1, 0 }
 0x34b   : > { %vm5301_vm15 = vcmp.le.f32.partialorder %v5275_v39, %v14498_v16  ;;  %vm5353_vm12 = vcmp.le.f32.partialorder %v5275_v39, %v14500_v58  ;;  %vm5293_vm8 = vcmp.le.f32.partialorder %v5275_v39, %v14510_v21  ;;  %vm5361_vm11 = vcmp.le.f32.partialorder %v5275_v39, %v14508_v45 }
 0x34c   : > { %vm5302_vm0 = vcmp.le.f32.partialorder %v5276_v53, %v14498_v16  ;;  %vm5354_vm4 = vcmp.le.f32.partialorder %v5276_v53, %v14500_v58  ;;  %v5369_v24 = vsel %vm5353_vm12, %v7822_v37, -inf  ;;  %v5317_v3 = vsel %vm5301_vm15, %v7822_v37, -inf }
 0x34d   : > { %v5370_v34 = vsel %vm5354_vm4, %v7825_v38, -inf  ;;  %v5318_v61 = vsel %vm5302_vm0, %v7825_v38, -inf  ;;  %vm5294_vm5 = vcmp.le.f32.partialorder %v5276_v53, %v14510_v21  ;;  %v5309_v44 = vsel %vm5293_vm8, %v7822_v37, -inf }
 0x34e   : > { %v5198_v56 = vpop.f32.mrf.mxu2  ;;  %v5174_v49 = vpop.f32.mrf.mxu0  ;;  %v5310_v28 = vsel %vm5294_vm5, %v7825_v38, -inf  ;;  %vm5362_vm14 = vcmp.le.f32.partialorder %v5276_v53, %v14508_v45  ;;  %v5377_v32 = vsel %vm5361_vm11, %v7822_v37, -inf }
 0x34f   : > { %v5269_v26 = vadd.f32 %v5198_v56, %v4645_v55  ;;  %v5187_v27 = vpop.f32.mrf.mxu1  ;;  %v5378_v19 = vsel %vm5362_vm14, %v7825_v38, -inf  ;;  %v4649_v38 = vadd.f32 %v14494_v2, %v14481_v14 }
 0x350   : > { %v5211_v52 = vpop.f32.mrf.mxu3 }
 0x351   : > { %v5270_v8 = vadd.f32 %v5211_v52, %v4646_v17  ;;  %v5277_v48 = vperm.slane %v5269_v26, 0 }
 0x353   : > { %v5278_v7 = vperm.slane %v5270_v8, 0  ;;  %vm5355_vm13 = vcmp.le.f32.partialorder %v5277_v48, %v14500_v58  ;;  %vm5303_vm2 = vcmp.le.f32.partialorder %v5277_v48, %v14498_v16  ;;  %vm5295_vm7 = vcmp.le.f32.partialorder %v5277_v48, %v14510_v21 }
 0x354   : > { %v5371_v20 = vsel %vm5355_vm13, %v7830_v40, -inf  ;;  %vm5363_vm6 = vcmp.le.f32.partialorder %v5277_v48, %v14508_v45  ;;  %v5319_v35 = vsel %vm5303_vm2, %v7830_v40, -inf  ;;  %v5311_v46 = vsel %vm5295_vm7, %v7830_v40, -inf }
 0x355   : > { %vm5304_vm1 = vcmp.le.f32.partialorder %v5278_v7, %v14498_v16  ;;  %vm5356_vm10 = vcmp.le.f32.partialorder %v5278_v7, %v14500_v58  ;;  %vm5296_vm3 = vcmp.le.f32.partialorder %v5278_v7, %v14510_v21  ;;  %vm5364_vm9 = vcmp.le.f32.partialorder %v5278_v7, %v14508_v45 }
 0x356   : > { %v5372_v59 = vsel %vm5356_vm10, %v7835_v41, -inf  ;;  %v5200_v0 = vpop.f32.mrf.mxu2  ;;  %v5385_v50 = vmax.f32 %v5369_v24, %v5371_v20  ;;  %v5320_v43 = vsel %vm5304_vm1, %v7835_v41, -inf  ;;  %v5334_v23 = vmax.f32 %v5317_v3, %v5319_v35 }
 0x357   : > { %v5386_v12 = vmax.f32 %v5370_v34, %v5372_v59  ;;  %v5335_v30 = vmax.f32 %v5318_v61, %v5320_v43  ;;  %v5312_v54 = vsel %vm5296_vm3, %v7835_v41, -inf  ;;  %v5325_v9 = vmax.f32 %v5309_v44, %v5311_v46 }
 0x358   : > { %v5213_v25 = vpop.f32.mrf.mxu3  ;;  %v5326_v55 = vmax.f32 %v5310_v28, %v5312_v54  ;;  %v5379_v17 = vsel %vm5363_vm6, %v7830_v40, -inf  ;;  %v5380_v10 = vsel %vm5364_vm9, %v7835_v41, -inf  ;;  %v4650_v40 = vadd.f32 %v14496_v11, %v14484_v5 }
 0x359   : > { %v5394_v31 = vmax.f32 %v5377_v32, %v5379_v17  ;;  %v5395_v15 = vmax.f32 %v5378_v19, %v5380_v10 }
 0x366   : > { %v5224_v33 = vpop.f32.mrf.mxu0 }
 0x367   : > { %v5271_v47 = vadd.f32 %v5224_v33, %v14490_v29  ;;  %v5237_v4 = vpop.f32.mrf.mxu1 }
 0x368   : > { %v5272_v37 = vadd.f32 %v5237_v4, %v4648_v51 }
 0x369   : > { %v5279_v60 = vperm.slane %v5271_v47, 0 }
 0x36a   : > { %v5280_v13 = vperm.slane %v5272_v37, 0 }
 0x36b   : > { %vm5357_vm15 = vcmp.le.f32.partialorder %v5279_v60, %v14500_v58  ;;  %vm5305_vm13 = vcmp.le.f32.partialorder %v5279_v60, %v14498_v16  ;;  %vm5297_vm0 = vcmp.le.f32.partialorder %v5279_v60, %v14510_v21  ;;  %vm5365_vm2 = vcmp.le.f32.partialorder %v5279_v60, %v14508_v45 }
 0x36c   : > { %vm5358_vm1 = vcmp.le.f32.partialorder %v5280_v13, %v14500_v58  ;;  %v5373_v41 = vsel %vm5357_vm15, %v8046_v18, -inf  ;;  %vm5306_vm10 = vcmp.le.f32.partialorder %v5280_v13, %v14498_v16  ;;  %v5321_v36 = vsel %vm5305_vm13, %v8046_v18, -inf }
 0x36d   : > { %v5374_v14 = vsel %vm5358_vm1, %v8083_v6, -inf  ;;  %v5387_v5 = vmax.f32 %v5385_v50, %v5373_v41  ;;  %v5322_v29 = vsel %vm5306_vm10, %v8083_v6, -inf  ;;  %v5336_v22 = vmax.f32 %v5334_v23, %v5321_v36 }
 0x36e   : > { %v5250_v2 = vpop.f32.mrf.mxu2  ;;  %v5226_v11 = vpop.f32.mrf.mxu0  ;;  %v5388_v42 = vmax.f32 %v5386_v12, %v5374_v14  ;;  %v5337_v57 = vmax.f32 %v5335_v30, %v5322_v29  ;;  %vm5298_vm12 = vcmp.le.f32.partialorder %v5280_v13, %v14510_v21  ;;  %v5313_v1 = vsel %vm5297_vm0, %v8046_v18, -inf }
 0x36f   : > { %v5273_v56 = vadd.f32 %v5250_v2, %v4649_v38  ;;  %v5263_v49 = vpop.f32.mrf.mxu3  ;;  %v5239_v39 = vpop.f32.mrf.mxu1  ;;  %v5314_v26 = vsel %vm5298_vm12, %v8083_v6, -inf  ;;  %v5327_v52 = vmax.f32 %v5325_v9, %v5313_v1  ;;  %vm5366_vm4 = vcmp.le.f32.partialorder %v5280_v13, %v14508_v45 }
 0x370   : > { %v5274_v27 = vadd.f32 %v5263_v49, %v4650_v40  ;;  %v5328_v53 = vmax.f32 %v5326_v55, %v5314_v26  ;;  %v5381_v8 = vsel %vm5365_vm2, %v8046_v18, -inf  ;;  %v5382_v48 = vsel %vm5366_vm4, %v8083_v6, -inf }
 0x371   : > { %v5281_v7 = vperm.slane %v5273_v56, 0  ;;  %v5396_v20 = vmax.f32 %v5394_v31, %v5381_v8  ;;  %v5397_v59 = vmax.f32 %v5395_v15, %v5382_v48  ;;  %vm5409_vm15 = vcmask 7168   ;;  %v248_v31 = vld [vmem:[%s14614_s4 + $0x8] sm:$0xff] }
 0x372   : > { %v5282_v0 = vperm.slane %v5274_v27, 0 }
 0x373   : > { %vm5359_vm7 = vcmp.le.f32.partialorder %v5281_v7, %v14500_v58  ;;  %vm5307_vm6 = vcmp.le.f32.partialorder %v5281_v7, %v14498_v16  ;;  %vm5299_vm3 = vcmp.le.f32.partialorder %v5281_v7, %v14510_v21  ;;  %vm5367_vm9 = vcmp.le.f32.partialorder %v5281_v7, %v14508_v45 }
 0x374   : > { %vm5360_vm8 = vcmp.le.f32.partialorder %v5282_v0, %v14500_v58  ;;  %v5375_v24 = vsel %vm5359_vm7, %v8126_v62, -inf  ;;  %vm5308_vm5 = vcmp.le.f32.partialorder %v5282_v0, %v14498_v16  ;;  %v5323_v18 = vsel %vm5307_vm6, %v8126_v62, -inf }
 0x375   : > { %v5376_v6 = vsel %vm5360_vm8, %v8154_v63, -inf  ;;  %v5389_v34 = vmax.f32 %v5387_v5, %v5375_v24  ;;  %v5324_v25 = vsel %vm5308_vm5, %v8154_v63, -inf  ;;  %v5338_v50 = vmax.f32 %v5336_v22, %v5323_v18 }
 0x376   : > { %v5252_v12 = vpop.f32.mrf.mxu2  ;;  %v5390_v3 = vmax.f32 %v5388_v42, %v5376_v6  ;;  %v5339_v61 = vmax.f32 %v5337_v57, %v5324_v25  ;;  %vm5300_vm11 = vcmp.le.f32.partialorder %v5282_v0, %v14510_v21  ;;  %v5315_v35 = vsel %vm5299_vm3, %v8126_v62, -inf }
 0x377   : > { %v5265_v58 = vpop.f32.mrf.mxu3  ;;  %v5316_v43 = vsel %vm5300_vm11, %v8154_v63, -inf  ;;  %v5329_v23 = vmax.f32 %v5327_v52, %v5315_v35  ;;  %vm5368_vm14 = vcmp.le.f32.partialorder %v5282_v0, %v14508_v45  ;;  %v5383_v16 = vsel %vm5367_vm9, %v8126_v62, -inf  ;;  %v247_v45 = vld [vmem:[%s14614_s4] sm:$0xff] }
 0x378   : > { %v5391_v30 = vmax.f32 %v5389_v34, %v5390_v3  ;;  %v5340_v44 = vmax.f32 %v5338_v50, %v5339_v61  ;;  %v5330_v28 = vmax.f32 %v5328_v53, %v5316_v43  ;;  %v5384_v46 = vsel %vm5368_vm14, %v8154_v63, -inf }
 0x379   : > { %v5398_v54 = vmax.f32 %v5396_v20, %v5383_v16  ;;  %v5399_v21 = vmax.f32 %v5397_v59, %v5384_v46 }
 0x37a   : > { %5392 = vmax.xlane.f32.xlu1 %v5391_v30  ;;  %5341 = vmax.xlane.f32.xlu0 %v5340_v44  ;;  %v5331_v9 = vmax.f32 %v5329_v23, %v5330_v28 }
 0x37b   : > { %v5400_v55 = vmax.f32 %v5398_v54, %v5399_v21 }
 0x37c   : > { %5332 = vmax.xlane.f32.xlu2 %v5331_v9 }
 0x384   : > { %5401 = vmax.xlane.f32.xlu2 %v5400_v55 }
 0x3ed   : > { %v5393_v32 = vpop.xlane.xlu1 %5392  ;;  %v5342_v10 = vpop.xlane.xlu0 %5341 }
 0x3ef   : > { %v5333_v62 = vpop.xlane.xlu2 %5332 }
 0x3f0   : > { %v5403_v19 = vsub.f32 %v5393_v32, %v5333_v62 }
 0x3f2   : > { %v5405_v17 = vmul.f32 %v5403_v19, %v247_v45 }
 0x3f4   : > { %v5407_v63 = vadd.f32 %v5405_v17, %v5333_v62 }
 0x3f6   : > { %5410 = vst.msk [vmem:[%s241_s16] sm:$0xff] %vm5409_vm15, %v5407_v63 }
 0x3f7   : > { %v5402_v15 = vpop.xlane.xlu2 %5401 }
 0x3f8   : > { %v5404_v51 = vsub.f32 %v5402_v15, %v5342_v10 }
 0x3fa   : > { %v5406_v33 = vmul.f32 %v5404_v51, %v248_v31 }
 0x3fc   : > { %v5408_v47 = vadd.f32 %v5406_v33, %v5342_v10 }
 0x3fe   : > { %5411 = vst.msk [vmem:[%s241_s16 + $0x8] sm:$0xff] %vm5409_vm15, %v5408_v47 }
 0x3ff PF: > { %s15_s18 = sadd.s32 1, %s7623_s18  }
 0x400   : > { %p12_p4 = scmp.ge.s32.totalorder %s15_s18, 4  }
 0x402   :  { %14 = sbr.rel (!%p12_p4) target bundleno = 1 (0x1), region = 73 }

</bundles_post_ra>
